<compile_context>
chip_gen: v7x
topology: tpu7x:2x2x1
jax: 0.10.0
libtpu: 0.0.40
codegen_flags: <defaults>
</compile_context>

<pallas_src>
import functools

import jax
import jax.numpy as jnp
from jax.experimental import pallas as pl
from jax.experimental.pallas import tpu as pltpu

EPS = 1e-5


def _linear_block_kernel(num_groups, inv_group_size,
                         x_ref, w1_ref, b1_ref, g1w_ref, g1b_ref,
                         w2_ref, b2_ref, g2w_ref, g2b_ref, out_ref):
    x = x_ref[...].astype(jnp.float32)           # (TB, C) residual kept in f32
    TB, C = x.shape
    NG = num_groups
    GS = C // NG

    # Group-indicator one-hot matrices built on the VPU (iota + range compare,
    # no integer divide, no HBM input).
    def group_onehot(shape, ch_axis, grp_axis):
        ch = jax.lax.broadcasted_iota(jnp.int32, shape, ch_axis)
        lo = jax.lax.broadcasted_iota(jnp.int32, shape, grp_axis) * GS
        return ((ch >= lo) & (ch < lo + GS)).astype(jnp.float32)

    g_fwd = group_onehot((C, NG), 0, 1)          # (C, NG): channel -> group
    g_bwd = group_onehot((NG, C), 1, 0)          # (NG, C): group -> channel

    def group_norm(y, gamma, beta):
        # One matmul computes per-group sum and sum-of-squares.
        stacked = jnp.concatenate([y, y * y], axis=0)                       # (2TB, C)
        red = jnp.dot(stacked, g_fwd, preferred_element_type=jnp.float32)   # (2TB, NG)
        mean = red[:TB] * inv_group_size
        var = jnp.maximum(red[TB:] * inv_group_size - mean * mean, 0.0)
        inv_std = jax.lax.rsqrt(var + EPS)                                  # group space
        # One matmul broadcasts both mean and inv_std back to channel space.
        back = jnp.dot(jnp.concatenate([mean, inv_std], axis=0), g_bwd,
                       preferred_element_type=jnp.float32)                  # (2TB, C)
        return (y - back[:TB]) * back[TB:] * gamma + beta

    # --- first linear (bf16 MXU operands, f32 accumulate) + GN + ReLU ---
    y = jnp.dot(x.astype(jnp.bfloat16), w1_ref[...],
                preferred_element_type=jnp.float32) + b1_ref[...]
    y = group_norm(y, g1w_ref[...], g1b_ref[...])
    y = jnp.maximum(y, 0.0)
    # TODO(synk): training-mode dropout (p=0.2) not applied; inference semantics.

    # --- second linear + GN + ReLU ---
    y = jnp.dot(y.astype(jnp.bfloat16), w2_ref[...],
                preferred_element_type=jnp.float32) + b2_ref[...]
    y = group_norm(y, g2w_ref[...], g2b_ref[...])
    y = jnp.maximum(y, 0.0)

    out_ref[...] = (x + y).astype(out_ref.dtype)


def _pick_batch_tile(B):
    for tb in (256, 128, 64, 32, 16, 8):
        if B % tb == 0:
            return tb
    return B  # full-extent block (allowed even if not (8,128)-aligned)


def linear_block(x, params, *, num_groups=8, batch_tile=None):
    """x: (B, C) float32. params: dict from make_params (f32 weights)."""
    B, C = x.shape
    assert C % num_groups == 0, "linear_size must be divisible by num_groups"
    group_size = C // num_groups
    tb = batch_tile if batch_tile is not None else _pick_batch_tile(B)
    assert B % tb == 0

    # bf16 weights: dominant HBM traffic halved; MXU-native on v5e/v6e/v7x.
    w1 = params["w1"].astype(jnp.bfloat16)
    w2 = params["w2"].astype(jnp.bfloat16)

    kernel = functools.partial(_linear_block_kernel, num_groups,
                               1.0 / float(group_size))

    row_spec = pl.BlockSpec((tb, C), lambda i: (i, 0))   # batch-tiled
    mat_spec = pl.BlockSpec((C, C), lambda i: (0, 0))    # weights stay resident
    vec_spec = pl.BlockSpec((1, C), lambda i: (0, 0))    # bias / GN affine

    return pl.pallas_call(
        kernel,
        out_shape=jax.ShapeDtypeStruct((B, C), x.dtype),
        grid_spec=pltpu.PrefetchScalarGridSpec(
            num_scalar_prefetch=0,
            grid=(B // tb,),
            in_specs=[row_spec, mat_spec, vec_spec, vec_spec, vec_spec,
                      mat_spec, vec_spec, vec_spec, vec_spec],
            out_specs=row_spec,
        ),
        compiler_params=pltpu.CompilerParams(
            dimension_semantics=("parallel",)),  # megacore split on v7x
    )(x, w1, params["b1"], params["g1w"], params["g1b"],
      w2, params["b2"], params["g2w"], params["g2b"])


def make_params(key, l_size):
    """Deterministic init matching nn.Linear / nn.GroupNorm shapes."""
    k1, k2, k3, k4 = jax.random.split(key, 4)
    bound = 1.0 / jnp.sqrt(l_size)
    # nn.Linear stores weight as (out, in); we keep (in, out) so y = x @ W.
    w1 = jax.random.uniform(k1, (l_size, l_size), jnp.float32, -bound, bound)
    b1 = jax.random.uniform(k2, (1, l_size), jnp.float32, -bound, bound)
    w2 = jax.random.uniform(k3, (l_size, l_size), jnp.float32, -bound, bound)
    b2 = jax.random.uniform(k4, (1, l_size), jnp.float32, -bound, bound)
    ones = jnp.ones((1, l_size), jnp.float32)    # GroupNorm affine defaults
    zeros = jnp.zeros((1, l_size), jnp.float32)
    return dict(w1=w1, b1=b1, g1w=ones, g1b=zeros,
                w2=w2, b2=b2, g2w=ones, g2b=zeros)


def _reference(x, params, num_groups=8):
    """Pure-JAX reference (eval mode), using the same bf16 matmul operands."""
    B, C = x.shape
    gs = C // num_groups
    w1 = params["w1"].astype(jnp.bfloat16)
    w2 = params["w2"].astype(jnp.bfloat16)

    def gn(y, gamma, beta):
        yg = y.reshape(B, num_groups, gs)
        mean = yg.mean(axis=-1, keepdims=True)
        var = yg.var(axis=-1, keepdims=True)
        yhat = ((yg - mean) / jnp.sqrt(var + EPS)).reshape(B, C)
        return yhat * gamma + beta

    y = jnp.dot(x.astype(jnp.bfloat16), w1,
                preferred_element_type=jnp.float32) + params["b1"]
    y = jnp.maximum(gn(y, params["g1w"], params["g1b"]), 0.0)
    y = jnp.dot(y.astype(jnp.bfloat16), w2,
                preferred_element_type=jnp.float32) + params["b2"]
    y = jnp.maximum(gn(y, params["g2w"], params["g2b"]), 0.0)
    return x + y


if __name__ == "__main__":
    B, L = 256, 256  # batch rows, linear_size (divisible by 8 groups / 128 lanes)
    key = jax.random.PRNGKey(0)
    kx, kp = jax.random.split(key)
    x = jax.random.normal(kx, (B, L), jnp.float32)
    params = make_params(kp, L)

    out = linear_block(x, params)
    out = jax.block_until_ready(out)

    ref = _reference(x, params)
    assert out.shape == ref.shape
    assert jnp.allclose(out, ref, atol=1e-2, rtol=1e-2), "mismatch vs reference"

    print("KERNEL_OK")
</pallas_src>

<mosaic_0001>
module attributes {stable_mosaic.version = 11 : i64} {
  func.func @_linear_block_kernel(%arg0: i32, %arg1: memref<256x256xf32, #tpu.memory_space<vmem>>, %arg2: memref<256x256xbf16, #tpu.memory_space<vmem>>, %arg3: memref<1x256xf32, #tpu.memory_space<vmem>>, %arg4: memref<1x256xf32, #tpu.memory_space<vmem>>, %arg5: memref<1x256xf32, #tpu.memory_space<vmem>>, %arg6: memref<256x256xbf16, #tpu.memory_space<vmem>>, %arg7: memref<1x256xf32, #tpu.memory_space<vmem>>, %arg8: memref<1x256xf32, #tpu.memory_space<vmem>>, %arg9: memref<1x256xf32, #tpu.memory_space<vmem>>, %arg10: memref<256x256xf32, #tpu.memory_space<vmem>>) attributes {dimension_semantics = [#tpu.dimension_semantics<parallel>], iteration_bounds = array<i64: 1>, scalar_prefetch = 0 : i64, scratch_operands = 0 : i64, tpu.core_type = #tpu.core_type<tc>, window_params = [{transform_indices = @transform_0, window_bounds = array<i64: 256, 256>}, {pipeline_mode = #tpu.pipeline_mode<synchronous>, transform_indices = @transform_1, window_bounds = array<i64: 256, 256>}, {pipeline_mode = #tpu.pipeline_mode<synchronous>, transform_indices = @transform_2, window_bounds = array<i64: 1, 256>}, {pipeline_mode = #tpu.pipeline_mode<synchronous>, transform_indices = @transform_3, window_bounds = array<i64: 1, 256>}, {pipeline_mode = #tpu.pipeline_mode<synchronous>, transform_indices = @transform_4, window_bounds = array<i64: 1, 256>}, {pipeline_mode = #tpu.pipeline_mode<synchronous>, transform_indices = @transform_5, window_bounds = array<i64: 256, 256>}, {pipeline_mode = #tpu.pipeline_mode<synchronous>, transform_indices = @transform_6, window_bounds = array<i64: 1, 256>}, {pipeline_mode = #tpu.pipeline_mode<synchronous>, transform_indices = @transform_7, window_bounds = array<i64: 1, 256>}, {pipeline_mode = #tpu.pipeline_mode<synchronous>, transform_indices = @transform_8, window_bounds = array<i64: 1, 256>}, {transform_indices = @transform_9, window_bounds = array<i64: 256, 256>}]} {
    %c0 = arith.constant 0 : index
    %c0_0 = arith.constant 0 : index
    %0 = vector.load %arg1[%c0, %c0_0] : memref<256x256xf32, #tpu.memory_space<vmem>>, vector<256x256xf32>
    %1 = tpu.iota {dimensions = array<i32: 0>} : vector<256x8xi32>
    %2 = tpu.iota {dimensions = array<i32: 1>} : vector<256x8xi32>
    %c32_i32 = arith.constant 32 : i32
    %3 = vector.broadcast %c32_i32 : i32 to vector<256x8xi32>
    %4 = arith.muli %2, %3 : vector<256x8xi32>
    %5 = arith.cmpi sge, %1, %4 : vector<256x8xi32>
    %c32_i32_1 = arith.constant 32 : i32
    %6 = vector.broadcast %c32_i32_1 : i32 to vector<256x8xi32>
    %7 = arith.addi %4, %6 : vector<256x8xi32>
    %8 = arith.cmpi slt, %1, %7 : vector<256x8xi32>
    %9 = arith.andi %5, %8 : vector<256x8xi1>
    %10 = arith.extui %9 : vector<256x8xi1> to vector<256x8xi32>
    %11 = arith.sitofp %10 : vector<256x8xi32> to vector<256x8xf32>
    %12 = tpu.iota {dimensions = array<i32: 1>} : vector<8x256xi32>
    %13 = tpu.iota {dimensions = array<i32: 0>} : vector<8x256xi32>
    %c32_i32_2 = arith.constant 32 : i32
    %14 = vector.broadcast %c32_i32_2 : i32 to vector<8x256xi32>
    %15 = arith.muli %13, %14 : vector<8x256xi32>
    %16 = arith.cmpi sge, %12, %15 : vector<8x256xi32>
    %c32_i32_3 = arith.constant 32 : i32
    %17 = vector.broadcast %c32_i32_3 : i32 to vector<8x256xi32>
    %18 = arith.addi %15, %17 : vector<8x256xi32>
    %19 = arith.cmpi slt, %12, %18 : vector<8x256xi32>
    %20 = arith.andi %16, %19 : vector<8x256xi1>
    %21 = arith.extui %20 : vector<8x256xi1> to vector<8x256xi32>
    %22 = arith.sitofp %21 : vector<8x256xi32> to vector<8x256xf32>
    %23 = arith.truncf %0 : vector<256x256xf32> to vector<256x256xbf16>
    %c0_4 = arith.constant 0 : index
    %c0_5 = arith.constant 0 : index
    %24 = vector.load %arg2[%c0_4, %c0_5] : memref<256x256xbf16, #tpu.memory_space<vmem>>, vector<256x256xbf16>
    %cst = arith.constant dense<0.000000e+00> : vector<256x256xf32>
    %25 = tpu.matmul %23, %24, %cst {dimension_numbers = #tpu.dot_dimension_numbers<[1], [0], [0], [1], [0, 0, 1, 1], [], []>} : vector<256x256xbf16>, vector<256x256xbf16>, vector<256x256xf32> -> vector<256x256xf32>
    %c0_6 = arith.constant 0 : index
    %c0_7 = arith.constant 0 : index
    %26 = vector.load %arg3[%c0_6, %c0_7] : memref<1x256xf32, #tpu.memory_space<vmem>>, vector<1x256xf32>
    %27 = vector.broadcast %26 : vector<1x256xf32> to vector<256x256xf32>
    %28 = arith.addf %25, %27 : vector<256x256xf32>
    %c0_8 = arith.constant 0 : index
    %c0_9 = arith.constant 0 : index
    %29 = vector.load %arg4[%c0_8, %c0_9] : memref<1x256xf32, #tpu.memory_space<vmem>>, vector<1x256xf32>
    %c0_10 = arith.constant 0 : index
    %c0_11 = arith.constant 0 : index
    %30 = vector.load %arg5[%c0_10, %c0_11] : memref<1x256xf32, #tpu.memory_space<vmem>>, vector<1x256xf32>
    %31 = arith.mulf %28, %28 : vector<256x256xf32>
    %32 = tpu.concatenate %28, %31 in 0 : vector<256x256xf32>, vector<256x256xf32> -> vector<512x256xf32>
    %cst_12 = arith.constant dense<0.000000e+00> : vector<512x8xf32>
    %33 = tpu.matmul %32, %11, %cst_12 {dimension_numbers = #tpu.dot_dimension_numbers<[1], [0], [0], [1], [0, 0, 1, 1], [], []>} : vector<512x256xf32>, vector<256x8xf32>, vector<512x8xf32> -> vector<512x8xf32>
    %34 = vector.extract_strided_slice %33 {offsets = [0, 0], sizes = [256, 8], strides = [1, 1]} : vector<512x8xf32> to vector<256x8xf32>
    %cst_13 = arith.constant 3.125000e-02 : f32
    %35 = vector.broadcast %cst_13 : f32 to vector<256x8xf32>
    %36 = arith.mulf %34, %35 : vector<256x8xf32>
    %37 = vector.extract_strided_slice %33 {offsets = [256, 0], sizes = [256, 8], strides = [1, 1]} : vector<512x8xf32> to vector<256x8xf32>
    %cst_14 = arith.constant 3.125000e-02 : f32
    %38 = vector.broadcast %cst_14 : f32 to vector<256x8xf32>
    %39 = arith.mulf %37, %38 : vector<256x8xf32>
    %40 = arith.mulf %36, %36 : vector<256x8xf32>
    %41 = arith.subf %39, %40 : vector<256x8xf32>
    %cst_15 = arith.constant 0.000000e+00 : f32
    %42 = vector.broadcast %cst_15 : f32 to vector<256x8xf32>
    %43 = arith.maximumf %41, %42 : vector<256x8xf32>
    %cst_16 = arith.constant 9.99999974E-6 : f32
    %44 = vector.broadcast %cst_16 : f32 to vector<256x8xf32>
    %45 = arith.addf %43, %44 : vector<256x8xf32>
    %46 = math.rsqrt %45 : vector<256x8xf32>
    %47 = tpu.concatenate %36, %46 in 0 : vector<256x8xf32>, vector<256x8xf32> -> vector<512x8xf32>
    %cst_17 = arith.constant dense<0.000000e+00> : vector<512x256xf32>
    %48 = tpu.matmul %47, %22, %cst_17 {dimension_numbers = #tpu.dot_dimension_numbers<[1], [0], [0], [1], [0, 0, 1, 1], [], []>} : vector<512x8xf32>, vector<8x256xf32>, vector<512x256xf32> -> vector<512x256xf32>
    %49 = vector.extract_strided_slice %48 {offsets = [0, 0], sizes = [256, 256], strides = [1, 1]} : vector<512x256xf32> to vector<256x256xf32>
    %50 = arith.subf %28, %49 : vector<256x256xf32>
    %51 = vector.extract_strided_slice %48 {offsets = [256, 0], sizes = [256, 256], strides = [1, 1]} : vector<512x256xf32> to vector<256x256xf32>
    %52 = arith.mulf %50, %51 : vector<256x256xf32>
    %53 = vector.broadcast %29 : vector<1x256xf32> to vector<256x256xf32>
    %54 = arith.mulf %52, %53 : vector<256x256xf32>
    %55 = vector.broadcast %30 : vector<1x256xf32> to vector<256x256xf32>
    %56 = arith.addf %54, %55 : vector<256x256xf32>
    %cst_18 = arith.constant 0.000000e+00 : f32
    %57 = vector.broadcast %cst_18 : f32 to vector<256x256xf32>
    %58 = arith.maximumf %56, %57 : vector<256x256xf32>
    %59 = arith.truncf %58 : vector<256x256xf32> to vector<256x256xbf16>
    %c0_19 = arith.constant 0 : index
    %c0_20 = arith.constant 0 : index
    %60 = vector.load %arg6[%c0_19, %c0_20] : memref<256x256xbf16, #tpu.memory_space<vmem>>, vector<256x256xbf16>
    %cst_21 = arith.constant dense<0.000000e+00> : vector<256x256xf32>
    %61 = tpu.matmul %59, %60, %cst_21 {dimension_numbers = #tpu.dot_dimension_numbers<[1], [0], [0], [1], [0, 0, 1, 1], [], []>} : vector<256x256xbf16>, vector<256x256xbf16>, vector<256x256xf32> -> vector<256x256xf32>
    %c0_22 = arith.constant 0 : index
    %c0_23 = arith.constant 0 : index
    %62 = vector.load %arg7[%c0_22, %c0_23] : memref<1x256xf32, #tpu.memory_space<vmem>>, vector<1x256xf32>
    %63 = vector.broadcast %62 : vector<1x256xf32> to vector<256x256xf32>
    %64 = arith.addf %61, %63 : vector<256x256xf32>
    %c0_24 = arith.constant 0 : index
    %c0_25 = arith.constant 0 : index
    %65 = vector.load %arg8[%c0_24, %c0_25] : memref<1x256xf32, #tpu.memory_space<vmem>>, vector<1x256xf32>
    %c0_26 = arith.constant 0 : index
    %c0_27 = arith.constant 0 : index
    %66 = vector.load %arg9[%c0_26, %c0_27] : memref<1x256xf32, #tpu.memory_space<vmem>>, vector<1x256xf32>
    %67 = arith.mulf %64, %64 : vector<256x256xf32>
    %68 = tpu.concatenate %64, %67 in 0 : vector<256x256xf32>, vector<256x256xf32> -> vector<512x256xf32>
    %cst_28 = arith.constant dense<0.000000e+00> : vector<512x8xf32>
    %69 = tpu.matmul %68, %11, %cst_28 {dimension_numbers = #tpu.dot_dimension_numbers<[1], [0], [0], [1], [0, 0, 1, 1], [], []>} : vector<512x256xf32>, vector<256x8xf32>, vector<512x8xf32> -> vector<512x8xf32>
    %70 = vector.extract_strided_slice %69 {offsets = [0, 0], sizes = [256, 8], strides = [1, 1]} : vector<512x8xf32> to vector<256x8xf32>
    %cst_29 = arith.constant 3.125000e-02 : f32
    %71 = vector.broadcast %cst_29 : f32 to vector<256x8xf32>
    %72 = arith.mulf %70, %71 : vector<256x8xf32>
    %73 = vector.extract_strided_slice %69 {offsets = [256, 0], sizes = [256, 8], strides = [1, 1]} : vector<512x8xf32> to vector<256x8xf32>
    %cst_30 = arith.constant 3.125000e-02 : f32
    %74 = vector.broadcast %cst_30 : f32 to vector<256x8xf32>
    %75 = arith.mulf %73, %74 : vector<256x8xf32>
    %76 = arith.mulf %72, %72 : vector<256x8xf32>
    %77 = arith.subf %75, %76 : vector<256x8xf32>
    %cst_31 = arith.constant 0.000000e+00 : f32
    %78 = vector.broadcast %cst_31 : f32 to vector<256x8xf32>
    %79 = arith.maximumf %77, %78 : vector<256x8xf32>
    %cst_32 = arith.constant 9.99999974E-6 : f32
    %80 = vector.broadcast %cst_32 : f32 to vector<256x8xf32>
    %81 = arith.addf %79, %80 : vector<256x8xf32>
    %82 = math.rsqrt %81 : vector<256x8xf32>
    %83 = tpu.concatenate %72, %82 in 0 : vector<256x8xf32>, vector<256x8xf32> -> vector<512x8xf32>
    %cst_33 = arith.constant dense<0.000000e+00> : vector<512x256xf32>
    %84 = tpu.matmul %83, %22, %cst_33 {dimension_numbers = #tpu.dot_dimension_numbers<[1], [0], [0], [1], [0, 0, 1, 1], [], []>} : vector<512x8xf32>, vector<8x256xf32>, vector<512x256xf32> -> vector<512x256xf32>
    %85 = vector.extract_strided_slice %84 {offsets = [0, 0], sizes = [256, 256], strides = [1, 1]} : vector<512x256xf32> to vector<256x256xf32>
    %86 = arith.subf %64, %85 : vector<256x256xf32>
    %87 = vector.extract_strided_slice %84 {offsets = [256, 0], sizes = [256, 256], strides = [1, 1]} : vector<512x256xf32> to vector<256x256xf32>
    %88 = arith.mulf %86, %87 : vector<256x256xf32>
    %89 = vector.broadcast %65 : vector<1x256xf32> to vector<256x256xf32>
    %90 = arith.mulf %88, %89 : vector<256x256xf32>
    %91 = vector.broadcast %66 : vector<1x256xf32> to vector<256x256xf32>
    %92 = arith.addf %90, %91 : vector<256x256xf32>
    %cst_34 = arith.constant 0.000000e+00 : f32
    %93 = vector.broadcast %cst_34 : f32 to vector<256x256xf32>
    %94 = arith.maximumf %92, %93 : vector<256x256xf32>
    %95 = arith.addf %0, %94 : vector<256x256xf32>
    %c0_35 = arith.constant 0 : index
    %c0_36 = arith.constant 0 : index
    %96 = vector.load %arg10[%c0_35, %c0_36] : memref<256x256xf32, #tpu.memory_space<vmem>>, vector<256x256xf32>
    tpu.vector_store %arg10[%c0_35, %c0_36], %95 {strides = array<i32>} : memref<256x256xf32, #tpu.memory_space<vmem>>, vector<256x256xf32>,
    return
  }
  func.func @transform_0(%arg0: i32) -> (i32, i32) {
    %c0_i32 = arith.constant 0 : i32
    %c0_i32_0 = arith.constant 0 : i32
    return %arg0, %c0_i32 : i32, i32
  }
  func.func @transform_1(%arg0: i32) -> (i32, i32) {
    %c0_i32 = arith.constant 0 : i32
    %c0_i32_0 = arith.constant 0 : i32
    %c0_i32_1 = arith.constant 0 : i32
    return %c0_i32, %c0_i32_0 : i32, i32
  }
  func.func @transform_2(%arg0: i32) -> (i32, i32) {
    %c0_i32 = arith.constant 0 : i32
    %c0_i32_0 = arith.constant 0 : i32
    %c0_i32_1 = arith.constant 0 : i32
    return %c0_i32, %c0_i32_0 : i32, i32
  }
  func.func @transform_3(%arg0: i32) -> (i32, i32) {
    %c0_i32 = arith.constant 0 : i32
    %c0_i32_0 = arith.constant 0 : i32
    %c0_i32_1 = arith.constant 0 : i32
    return %c0_i32, %c0_i32_0 : i32, i32
  }
  func.func @transform_4(%arg0: i32) -> (i32, i32) {
    %c0_i32 = arith.constant 0 : i32
    %c0_i32_0 = arith.constant 0 : i32
    %c0_i32_1 = arith.constant 0 : i32
    return %c0_i32, %c0_i32_0 : i32, i32
  }
  func.func @transform_5(%arg0: i32) -> (i32, i32) {
    %c0_i32 = arith.constant 0 : i32
    %c0_i32_0 = arith.constant 0 : i32
    %c0_i32_1 = arith.constant 0 : i32
    return %c0_i32, %c0_i32_0 : i32, i32
  }
  func.func @transform_6(%arg0: i32) -> (i32, i32) {
    %c0_i32 = arith.constant 0 : i32
    %c0_i32_0 = arith.constant 0 : i32
    %c0_i32_1 = arith.constant 0 : i32
    return %c0_i32, %c0_i32_0 : i32, i32
  }
  func.func @transform_7(%arg0: i32) -> (i32, i32) {
    %c0_i32 = arith.constant 0 : i32
    %c0_i32_0 = arith.constant 0 : i32
    %c0_i32_1 = arith.constant 0 : i32
    return %c0_i32, %c0_i32_0 : i32, i32
  }
  func.func @transform_8(%arg0: i32) -> (i32, i32) {
    %c0_i32 = arith.constant 0 : i32
    %c0_i32_0 = arith.constant 0 : i32
    %c0_i32_1 = arith.constant 0 : i32
    return %c0_i32, %c0_i32_0 : i32, i32
  }
  func.func @transform_9(%arg0: i32) -> (i32, i32) {
    %c0_i32 = arith.constant 0 : i32
    %c0_i32_0 = arith.constant 0 : i32
    return %arg0, %c0_i32 : i32, i32
  }
}

</mosaic_0001>

<bundles_post_ra>
// kernel: tpu_custom_call.1
= control target key start
LH: loop header
LB: loop body
LE: loop exit
PB: predicated region body
PF: predicated region fallthrough
CT: control target
= control target key end

     0   :  { %14 = vsyncpa [#allocation3], 0  ;;  %s8304_s0 = inlined_call_operand.hbm [shape: f32[256,256], index: 0, kind: input, shape index: {}]   ;;  %s8305_s1 = inlined_call_operand.hbm [shape: bf16[256,256], index: 1, kind: input, shape index: {}]   ;;  %s8306_s2 = inlined_call_operand.vmem [shape: f32[1,256], index: 2, kind: input, shape index: {}]   ;;  %s8307_s3 = inlined_call_operand.vmem [shape: f32[1,256], index: 3, kind: input, shape index: {}]   ;;  %s8308_s4 = inlined_call_operand.vmem [shape: f32[1,256], index: 4, kind: input, shape index: {}]   ;;  %s8309_s5 = inlined_call_operand.hbm [shape: bf16[256,256], index: 5, kind: input, shape index: {}]   ;;  %s8310_s6 = inlined_call_operand.vmem [shape: f32[1,256], index: 6, kind: input, shape index: {}]   ;;  %s8311_s7 = inlined_call_operand.vmem [shape: f32[1,256], index: 7, kind: input, shape index: {}]   ;;  %s8312_s8 = inlined_call_operand.vmem [shape: f32[1,256], index: 8, kind: input, shape index: {}]   ;;  %s8313_s9 = inlined_call_operand.hbm [shape: f32[256,256], index: 9, kind: output, shape index: {}]  }
   0x1   :  { %15 = vsyncpa [#allocation6], 0 }
   0x2   :  { %16 = vsyncpa [#allocation4], 0  ;;  %s5453_s30 = smov [#allocation5]   ;;  %s5359_s13 = scalar_lea.hbm %s8305_s1, 4096 }
   0x3   :  { %s34_s10 = sshll.u32 %s5453_s30, 4  ;;  %p5360_p0 = scmp.ne.s32.totalorder %s8305_s1, %s5359_s13  ;;  %s35_s10 = int_to_ptr.vmem [resolvable:$true] %s34_s10 }
   0x4   :  { %p5363_p1 = scmp.lt.u32.totalorder %s5359_s13, %s8305_s1 }
   0x6   :  { %p5365_p2 = pnand %p5363_p1, %p5360_p0 }
   0x8   :  { %5368 = shalt.err (!%p5365_p2)
}
   0x9   :  { %s5369_s18 = scalar_lea.vmem %s35_s10, 4096  ;;  %p5374_p4 = scmp.lt.s32.totalorder %s35_s10, %s35_s10 }
   0xa   :  { %p5370_p3 = scmp.ne.s32.totalorder %s35_s10, %s5369_s18  ;;  %p5375_p5 = scmp.lt.s32.totalorder %s5369_s18, %s5369_s18 }
   0xc   :  { %p5376_p6 = por %p5375_p5, %p5374_p4 }
   0xe   :  { %p5377_p7 = pnand %p5376_p6, %p5370_p3 }
  0x10   :  { %5380 = shalt.err (!%p5377_p7)
}
  0x11   :  { %s5454_s19 = smov 128   ;;  %s5455_s20 = smov 8  }
  0x12   :  { %40 = dma.hbm_to_vmem [thread:$0]  %s8305_s1, 4096, %s35_s10, [#allocation6], %s5454_s19, %s5454_s19, %s5455_s20  }
  0x13   :  { %s5456_s23 = smov [#allocation2]   ;;  %s5381_s27 = scalar_lea.hbm %s8304_s0, 8192 }
  0x14   :  { %s22_s24 = sshll.u32 %s5456_s23, 4  ;;  %p5382_p8 = scmp.ne.s32.totalorder %s8304_s0, %s5381_s27  ;;  %s23_s24 = int_to_ptr.vmem [resolvable:$true] %s22_s24 }
  0x15   :  { %p5385_p9 = scmp.lt.u32.totalorder %s5381_s27, %s8304_s0 }
  0x17   :  { %p5387_p10 = pnand %p5385_p9, %p5382_p8 }
  0x19   :  { %5390 = shalt.err (!%p5387_p10)
}
  0x1a   :  { %s5391_s12 = scalar_lea.vmem %s23_s24, 8192  ;;  %p5396_p12 = scmp.lt.s32.totalorder %s23_s24, %s23_s24 }
  0x1b   :  { %p5392_p11 = scmp.ne.s32.totalorder %s23_s24, %s5391_s12  ;;  %p5397_p13 = scmp.lt.s32.totalorder %s5391_s12, %s5391_s12 }
  0x1d   :  { %p5398_p0 = por %p5397_p13, %p5396_p12 }
  0x1f   :  { %p5399_p1 = pnand %p5398_p0, %p5392_p11 }
  0x21   :  { %5402 = shalt.err (!%p5399_p1)
}
  0x22   :  { %s5457_s1 = smov 256   ;;  %s5458_s10 = smov 16  }
  0x23   :  { %28 = dma.hbm_to_vmem [thread:$0]  %s8304_s0, 8192, %s23_s24, [#allocation3], %s5457_s1, %s5457_s1, %s5458_s10  }
  0x24   :  { %s5459_s15 = smov [#allocation7]   ;;  %s5403_s21 = scalar_lea.hbm %s8309_s5, 4096 }
  0x25   :  { %s52_s16 = sshll.u32 %s5459_s15, 4  ;;  %p5404_p2 = scmp.ne.s32.totalorder %s8309_s5, %s5403_s21  ;;  %s53_s16 = int_to_ptr.vmem [resolvable:$true] %s52_s16 }
  0x26   :  { %p5407_p3 = scmp.lt.u32.totalorder %s5403_s21, %s8309_s5 }
  0x28   :  { %p5409_p4 = pnand %p5407_p3, %p5404_p2 }
  0x2a   :  { %5412 = shalt.err (!%p5409_p4)
}
  0x2b   :  { %s5413_s27 = scalar_lea.vmem %s53_s16, 4096  ;;  %p5418_p6 = scmp.lt.s32.totalorder %s53_s16, %s53_s16 }
  0x2c   :  { %p5414_p5 = scmp.ne.s32.totalorder %s53_s16, %s5413_s27  ;;  %p5419_p7 = scmp.lt.s32.totalorder %s5413_s27, %s5413_s27 }
  0x2e   :  { %p5420_p8 = por %p5419_p7, %p5418_p6 }
  0x30   :  { %p5421_p9 = pnand %p5420_p8, %p5414_p5 }
  0x32   :  { %5424 = shalt.err (!%p5421_p9)
}
  0x33   :  { %58 = dma.hbm_to_vmem [thread:$0]  %s8309_s5, 4096, %s53_s16, [#allocation6], %s5454_s19, %s5454_s19, %s5455_s20  }
  0x34   :  { %5447 = dma.done.wait [#allocation3], 8192  }
  0x35   :  { %5448 = vsyncadd [#allocation3], 4294959104 }
  0x36   :  { %5449 = dma.done.wait [#allocation6], 8192  }
  0x37   :  { %5450 = vsyncadd [#allocation6], 4294959104  ;;  %v5071_v0 = vld [vmem:[#allocation5 + $0x4] ss:$8 sps:$4 sm:$0xff]   ;;  %v5073_v1 = vld [vmem:[#allocation5] ss:$8 sps:$4 sm:$0xff]   ;;  %v138_v34 = vlaneseq }
  0x38   :  { %584 = vmatprep.subr.bf16.mxu0 %v5071_v0  ;;  %v5074_v2 = vld [vmem:[#allocation5 + $0x14] ss:$8 sps:$4 sm:$0xff]   ;;  %v5076_v3 = vld [vmem:[#allocation5 + $0x10] ss:$8 sps:$4 sm:$0xff]   ;;  %v5077_v4 = vld [vmem:[#allocation5 + $0x24] ss:$8 sps:$4 sm:$0xff]  }
  0x39   :  { %585 = vmatpush1.bf16.msra.mxu0 %v5073_v1  ;;  %v5079_v5 = vld [vmem:[#allocation5 + $0x20] ss:$8 sps:$4 sm:$0xff]   ;;  %v5080_v6 = vld [vmem:[#allocation5 + $0x34] ss:$8 sps:$4 sm:$0xff]   ;;  %v5082_v7 = vld [vmem:[#allocation5 + $0x30] ss:$8 sps:$4 sm:$0xff]  }
  0x3a   :  { %586 = vmatprep.subr.bf16.mxu0 %v5074_v2  ;;  %v5083_v8 = vld [vmem:[#allocation5 + $0x44] ss:$8 sps:$4 sm:$0xff]   ;;  %v5085_v9 = vld [vmem:[#allocation5 + $0x40] ss:$8 sps:$4 sm:$0xff]   ;;  %v5086_v10 = vld [vmem:[#allocation5 + $0x54] ss:$8 sps:$4 sm:$0xff]  }
  0x3b   :  { %v5088_v11 = vld [vmem:[#allocation5 + $0x50] ss:$8 sps:$4 sm:$0xff]   ;;  %v5089_v12 = vld [vmem:[#allocation5 + $0x64] ss:$8 sps:$4 sm:$0xff]   ;;  %v5091_v16 = vld [vmem:[#allocation5 + $0x60] ss:$8 sps:$4 sm:$0xff]  }
  0x3c   :  { %v75_v13 = vld [vmem:[#allocation2 + $0x8] sm:$0xff]  ;;  %v77_v14 = vld [vmem:[#allocation2 + $0x18] sm:$0xff]  ;;  %v74_v36 = vld [vmem:[#allocation2] sm:$0xff]  ;;  %v8346_v38 = vmov 0.0|0.0   ;;  %v5561_v41 = vshrl.u32 %v138_v34, 7  ;;  %v5563_v42 = vand.u32 127, %v138_v34 }
  0x3d   :  { %587 = vmatpush1.bf16.msra.mxu0 %v5076_v3  ;;  %v349_v15 = vpack.c.bf16 %v77_v14, %v75_v13  ;;  %v5092_v17 = vld [vmem:[#allocation5 + $0x74] ss:$8 sps:$4 sm:$0xff]   ;;  %v5094_v18 = vld [vmem:[#allocation5 + $0x70] ss:$8 sps:$4 sm:$0xff]   ;;  %v5095_v19 = vld [vmem:[#allocation5 + $0x84] ss:$8 sps:$4 sm:$0xff]   ;;  %4963 = vmatprep.subr.bf16.mxu1 %v8346_v38 }
  0x3e   :  { %588 = vmatprep.subr.bf16.mxu0 %v5077_v4  ;;  %v5097_v20 = vld [vmem:[#allocation5 + $0x80] ss:$8 sps:$4 sm:$0xff]   ;;  %v5098_v21 = vld [vmem:[#allocation5 + $0x94] ss:$8 sps:$4 sm:$0xff]   ;;  %v5100_v22 = vld [vmem:[#allocation5 + $0x90] ss:$8 sps:$4 sm:$0xff]  }
  0x3f   :  { %616 = vmatprep.mubr.bf16.mxu0 %v349_v15  ;;  %v5101_v23 = vld [vmem:[#allocation5 + $0xa4] ss:$8 sps:$4 sm:$0xff]   ;;  %v5103_v24 = vld [vmem:[#allocation5 + $0xa0] ss:$8 sps:$4 sm:$0xff]   ;;  %v5104_v25 = vld [vmem:[#allocation5 + $0xb4] ss:$8 sps:$4 sm:$0xff]  }
  0x40   :  { %v5106_v26 = vld [vmem:[#allocation5 + $0xb0] ss:$8 sps:$4 sm:$0xff]   ;;  %v5107_v27 = vld [vmem:[#allocation5 + $0xc4] ss:$8 sps:$4 sm:$0xff]   ;;  %v5109_v28 = vld [vmem:[#allocation5 + $0xc0] ss:$8 sps:$4 sm:$0xff]  }
  0x41   :  { %589 = vmatpush1.bf16.msra.mxu0 %v5079_v5  ;;  %v5110_v29 = vld [vmem:[#allocation5 + $0xd4] ss:$8 sps:$4 sm:$0xff]   ;;  %v5112_v30 = vld [vmem:[#allocation5 + $0xd0] ss:$8 sps:$4 sm:$0xff]   ;;  %v5113_v31 = vld [vmem:[#allocation5 + $0xe4] ss:$8 sps:$4 sm:$0xff]  }
  0x42   :  { %590 = vmatprep.subr.bf16.mxu0 %v5080_v6  ;;  %v5115_v32 = vld [vmem:[#allocation5 + $0xe0] ss:$8 sps:$4 sm:$0xff]   ;;  %v5116_v33 = vld [vmem:[#allocation5 + $0xf4] ss:$8 sps:$4 sm:$0xff]   ;;  %v5118_v35 = vld [vmem:[#allocation5 + $0xf0] ss:$8 sps:$4 sm:$0xff]  }
  0x43   :  { %v76_v37 = vld [vmem:[#allocation2 + $0x10] sm:$0xff]  ;;  %v79_v39 = vld [vmem:[#allocation2 + $0x28] sm:$0xff]  ;;  %v81_v40 = vld [vmem:[#allocation2 + $0x38] sm:$0xff]  ;;  %v140_v44 = vadd.s32 8, %v5561_v41  ;;  %v5567_v45 = vmul.u32 32, %v5563_v42  ;;  %v141_v47 = vadd.s32 16, %v5561_v41 }
  0x44   :  { %v348_v43 = vpack.c.bf16 %v76_v37, %v74_v36  ;;  %v351_v46 = vpack.c.bf16 %v81_v40, %v79_v39  ;;  %v142_v49 = vadd.s32 24, %v5561_v41  ;;  %v143_v50 = vadd.s32 32, %v5561_v41  ;;  %v78_v51 = vld [vmem:[#allocation2 + $0x20] sm:$0xff]  ;;  %v80_v52 = vld [vmem:[#allocation2 + $0x30] sm:$0xff]  ;;  %v83_v55 = vld [vmem:[#allocation2 + $0x48] sm:$0xff] }
  0x45   :  { %591 = vmatpush1.bf16.msra.mxu0 %v5082_v7  ;;  %vm174_vm0 = vcmp.ge.s32.totalorder %v5561_v41, %v5567_v45  ;;  %v5573_v48 = vadd.s32 32, %v5567_v45  ;;  %vm175_vm1 = vcmp.ge.s32.totalorder %v140_v44, %v5567_v45  ;;  %vm176_vm5 = vcmp.ge.s32.totalorder %v141_v47, %v5567_v45  ;;  %v85_v56 = vld [vmem:[#allocation2 + $0x58] sm:$0xff]  ;;  %v82_v5 = vld [vmem:[#allocation2 + $0x40] sm:$0xff]  ;;  %v84_v6 = vld [vmem:[#allocation2 + $0x50] sm:$0xff] }
  0x46   :  { %592 = vmatprep.subr.bf16.mxu0 %v5083_v8  ;;  %v144_v54 = vadd.s32 40, %v5561_v41  ;;  %vm177_vm8 = vcmp.ge.s32.totalorder %v142_v49, %v5567_v45  ;;  %v145_v58 = vadd.s32 48, %v5561_v41  ;;  %v350_v59 = vpack.c.bf16 %v80_v52, %v78_v51  ;;  %v87_v7 = vld [vmem:[#allocation2 + $0x68] sm:$0xff]  ;;  %v89_v8 = vld [vmem:[#allocation2 + $0x78] sm:$0xff]  ;;  %v92_v36 = vld [vmem:[#allocation2 + $0x90] sm:$0xff] }
  0x47   :  { %vm207_vm2 = vcmp.lt.s32.totalorder %v5561_v41, %v5573_v48  ;;  %vm208_vm3 = vcmp.lt.s32.totalorder %v140_v44, %v5573_v48  ;;  %vm209_vm6 = vcmp.lt.s32.totalorder %v141_v47, %v5573_v48  ;;  %vm210_vm9 = vcmp.lt.s32.totalorder %v142_v49, %v5573_v48  ;;  %v95_v40 = vld [vmem:[#allocation2 + $0xa8] sm:$0xff] }
  0x48   :  { %vm5581_vm4 = vmand %vm174_vm0, %vm207_vm2  ;;  %v8348_v60 = vmov 1.0|1.0   ;;  %v8508_v61 = vmov 0  ;;  %vm178_vm12 = vcmp.ge.s32.totalorder %v143_v50, %v5567_v45  ;;  %vm211_vm13 = vcmp.lt.s32.totalorder %v143_v50, %v5573_v48 }
  0x49   :  { %593 = vmatpush1.bf16.msra.mxu0 %v5085_v9  ;;  %vm5588_vm7 = vmand %vm175_vm1, %vm208_vm3  ;;  %v146_v62 = vadd.s32 56, %v5561_v41  ;;  %v353_v63 = vpack.c.bf16 %v85_v56, %v83_v55  ;;  %v8511_v0 = vmov 0  ;;  %vm179_vm15 = vcmp.ge.s32.totalorder %v144_v54, %v5567_v45  ;;  %v94_v55 = vld [vmem:[#allocation2 + $0xa0] sm:$0xff]  ;;  %v96_v56 = vld [vmem:[#allocation2 + $0xb0] sm:$0xff] }
  0x4a   :  { %594 = vmatprep.subr.bf16.mxu0 %v5086_v10  ;;  %vm8315_vm10 = vmpackc.low %vm5588_vm7, %vm5581_vm4  ;;  %vm212_vm0 = vcmp.lt.s32.totalorder %v144_v54, %v5573_v48  ;;  %v147_v1 = vadd.s32 64, %v5561_v41  ;;  %v8514_v2 = vmov 0  ;;  %vm180_vm3 = vcmp.ge.s32.totalorder %v145_v58, %v5567_v45 }
  0x4b   :  { %4965 = vmatpush1.bf16.msk.msra.mxu1 %vm8315_vm10, %v8348_v60  ;;  %vm5605_vm11 = vmand %vm176_vm5, %vm209_vm6  ;;  %vm213_vm5 = vcmp.lt.s32.totalorder %v145_v58, %v5573_v48  ;;  %v148_v3 = vadd.s32 72, %v5561_v41  ;;  %v8517_v4 = vmov 0  ;;  %v8520_v9 = vmov 0  ;;  %v99_v58 = vld [vmem:[#allocation2 + $0xc8] sm:$0xff] }
  0x4c   :  { %v8509_v61 = vsel %vm5605_vm11, 4294967295, %v8508_v61  ;;  %4966 = vmatprep.subr.bf16.mxu1 %v8346_v38  ;;  %vm5613_vm14 = vmand %vm177_vm8, %vm210_vm9  ;;  %vm181_vm8 = vcmp.ge.s32.totalorder %v146_v62, %v5567_v45  ;;  %vm214_vm9 = vcmp.lt.s32.totalorder %v146_v62, %v5573_v48  ;;  %v149_v10 = vadd.s32 80, %v5561_v41 }
  0x4d   :  { %595 = vmatpush1.bf16.msra.mxu0 %v5088_v11  ;;  %8510 = vst [vmem:[#allocation12_spill] sm:$0xff] %v8509_v61  ;;  %v8512_v0 = vsel %vm5613_vm14, 4294967295, %v8511_v0  ;;  %vm8314_vm1 = vmpackc.low %vm5613_vm14, %vm5605_vm11  ;;  %v8523_v11 = vmov 0  ;;  %vm183_vm10 = vcmp.ge.s32.totalorder %v148_v3, %v5567_v45  ;;  %v352_v13 = vpack.c.bf16 %v84_v6, %v82_v5 }
  0x4e   :  { %596 = vmatprep.subr.bf16.mxu0 %v5089_v12  ;;  %8513 = vst [vmem:[#allocation13_spill] sm:$0xff] %v8512_v0  ;;  %vm5624_vm2 = vmand %vm178_vm12, %vm211_vm13  ;;  %vm216_vm12 = vcmp.lt.s32.totalorder %v148_v3, %v5573_v48  ;;  %v150_v12 = vadd.s32 88, %v5561_v41  ;;  %v151_v14 = vadd.s32 96, %v5561_v41  ;;  %v355_v15 = vpack.c.bf16 %v89_v8, %v87_v7 }
  0x4f   :  { %v8515_v2 = vsel %vm5624_vm2, 4294967295, %v8514_v2  ;;  %4968 = vmatpush1.bf16.msk.msra.mxu1 %vm8314_vm1, %v8348_v60  ;;  %vm5637_vm6 = vmand %vm179_vm15, %vm212_vm0  ;;  %vm182_vm15 = vcmp.ge.s32.totalorder %v147_v1, %v5567_v45  ;;  %vm215_vm0 = vcmp.lt.s32.totalorder %v147_v1, %v5573_v48  ;;  %v157_v34 = vadd.s32 144, %v5561_v41 }
  0x50   :  { %8516 = vst [vmem:[#allocation14_spill] sm:$0xff] %v8515_v2  ;;  %v8518_v4 = vsel %vm5637_vm6, 4294967295, %v8517_v4  ;;  %4969 = vmatprep.subr.bf16.mxu1 %v8346_v38  ;;  %vm5650_vm13 = vmand %vm180_vm3, %vm213_vm5  ;;  %v8552_v37 = vmov 0  ;;  %v158_v39 = vadd.s32 152, %v5561_v41  ;;  %v8556_v47 = vmov 0 }
  0x51   :  { %597 = vmatpush1.bf16.msra.mxu0 %v5091_v16  ;;  %8519 = vst [vmem:[#allocation15_spill] sm:$0xff] %v8518_v4  ;;  %v8521_v9 = vsel %vm5650_vm13, 4294967295, %v8520_v9  ;;  %vm5657_vm1 = vmand %vm181_vm8, %vm214_vm9  ;;  %v8527_v16 = vmov 0  ;;  %v159_v49 = vadd.s32 160, %v5561_v41  ;;  %v8559_v50 = vmov 0 }
  0x52   :  { %598 = vmatprep.subr.bf16.mxu0 %v5092_v17  ;;  %8522 = vst [vmem:[#allocation16_spill] sm:$0xff] %v8521_v9  ;;  %v8524_v11 = vsel %vm5657_vm1, 4294967295, %v8523_v11  ;;  %vm8526_vm3 = vmpackc.low %vm5637_vm6, %vm5624_vm2  ;;  %v152_v17 = vadd.s32 104, %v5561_v41  ;;  %vm217_vm2 = vcmp.lt.s32.totalorder %v149_v10, %v5573_v48  ;;  %vm193_vm14 = vcmp.ge.s32.totalorder %v158_v39, %v5567_v45 }
  0x53   :  { %8525 = vst [vmem:[#allocation17_spill] sm:$0xff] %v8524_v11  ;;  %4971 = vmatpush1.bf16.msk.msra.mxu1 %vm8526_vm3, %v8348_v60  ;;  %vm5676_vm8 = vmand %vm182_vm15, %vm215_vm0  ;;  %vm184_vm3 = vcmp.ge.s32.totalorder %v149_v10, %v5567_v45  ;;  %vm219_vm0 = vcmp.lt.s32.totalorder %v151_v14, %v5573_v48  ;;  %v160_v51 = vadd.s32 168, %v5561_v41  ;;  %v8562_v52 = vmov 0  ;;  %v98_v10 = vld [vmem:[#allocation2 + $0xc0] sm:$0xff] }
  0x54   :  { %4972 = vmatprep.subr.bf16.mxu1 %v8346_v38  ;;  %v8528_v16 = vsel %vm5676_vm8, 4294967295, %v8527_v16  ;;  %vm5681_vm9 = vmand %vm183_vm10, %vm216_vm12  ;;  %vm186_vm12 = vcmp.ge.s32.totalorder %v151_v14, %v5567_v45  ;;  %vm220_vm6 = vcmp.lt.s32.totalorder %v152_v17, %v5573_v48  ;;  %vm8537_vm10 = vcmp.lt.s32.totalorder %v150_v12, %v5573_v48 }
  0x55   :  { %599 = vmatpush1.bf16.msra.mxu0 %v5094_v18  ;;  %8529 = vst [vmem:[#allocation18_spill] sm:$0xff] %v8528_v16  ;;  %v8530_v18 = vmov 0  ;;  %vm8533_vm15 = vmpackc.low %vm5657_vm1, %vm5650_vm13  ;;  %vm8538_vm13 = vcmp.ge.s32.totalorder %v150_v12, %v5567_v45  ;;  %v8566_v54 = vmov 0  ;;  %v161_v62 = vadd.s32 176, %v5561_v41  ;;  %v100_v12 = vld [vmem:[#allocation2 + $0xd0] sm:$0xff]  ;;  %v8671_v53 = vld [vmem:[#allocation13_spill] sm:$0xff] }
  0x56   :  { %600 = vmatprep.subr.bf16.mxu0 %v5095_v19  ;;  %v8531_v18 = vsel %vm5681_vm9, 4294967295, %v8530_v18  ;;  %v86_v19 = vld [vmem:[#allocation2 + $0x60] sm:$0xff]  ;;  %vm5702_vm5 = vmand %vm184_vm3, %vm217_vm2  ;;  %v358_v1 = vpack.c.bf16 %v96_v56, %v94_v55  ;;  %v8569_v3 = vmov 0  ;;  %v163_v5 = vadd.s32 192, %v5561_v41  ;;  %v111_v55 = vld [vmem:[#allocation2 + $0x128] sm:$0xff] }
  0x57   :  { %8532 = vst [vmem:[#allocation19_spill] sm:$0xff] %v8531_v18  ;;  %4974 = vmatpush1.bf16.msk.msra.mxu1 %vm8533_vm15, %v8348_v60  ;;  %vm187_vm15 = vcmp.ge.s32.totalorder %v152_v17, %v5567_v45  ;;  %vm5713_vm1 = vmand %vm8538_vm13, %vm8537_vm10  ;;  %v8572_v7 = vmov 0  ;;  %v164_v8 = vadd.s32 200, %v5561_v41  ;;  %v165_v14 = vadd.s32 208, %v5561_v41  ;;  %v105_v17 = vld [vmem:[#allocation2 + $0xf8] sm:$0xff] }
  0x58   :  { %4975 = vmatprep.subr.bf16.mxu1 %v8346_v38  ;;  %vm5718_vm2 = vmand %vm186_vm12, %vm219_vm0  ;;  %v113_v56 = vld [vmem:[#allocation2 + $0x138] sm:$0xff] }
  0x59   :  { %601 = vmatpush1.bf16.msra.mxu0 %v5097_v20  ;;  %v88_v20 = vld [vmem:[#allocation2 + $0x70] sm:$0xff]  ;;  %vm8545_vm3 = vmpackc.low %vm5681_vm9, %vm5676_vm8  ;;  %vm225_vm8 = vcmp.lt.s32.totalorder %v157_v34, %v5573_v48 }
  0x5a   :  { %602 = vmatprep.subr.bf16.mxu0 %v5098_v21  ;;  %v8534_v21 = vmov 0  ;;  %vm5728_vm11 = vmand %vm187_vm15, %vm220_vm6 }
  0x5b   :  { %v8535_v21 = vsel %vm5702_vm5, 4294967295, %v8534_v21  ;;  %4977 = vmatpush1.bf16.msk.msra.mxu1 %vm8545_vm3, %v8348_v60  ;;  %vm8321_vm13 = vmpackc.low %vm5713_vm1, %vm5702_vm5 }
  0x5c   :  { %8536 = vst [vmem:[#allocation20_spill] sm:$0xff] %v8535_v21  ;;  %4978 = vmatprep.subr.bf16.mxu1 %v8346_v38  ;;  %v8380_v21 = vmov 0.0  }
  0x5d   :  { %603 = vmatpush1.bf16.msra.mxu0 %v5100_v22  ;;  %v153_v22 = vadd.s32 112, %v5561_v41 }
  0x5e   :  { %604 = vmatprep.subr.bf16.mxu0 %v5101_v23  ;;  %v91_v23 = vld [vmem:[#allocation2 + $0x88] sm:$0xff] }
  0x5f   :  { %vm188_vm10 = vcmp.ge.s32.totalorder %v153_v22, %v5567_v45  ;;  %vm221_vm12 = vcmp.lt.s32.totalorder %v153_v22, %v5573_v48  ;;  %4980 = vmatpush1.bf16.msk.msra.mxu1 %vm8321_vm13, %v8348_v60  ;;  %v8584_v22 = vmov 0 }
  0x60   :  { %vm5753_vm15 = vmand %vm188_vm10, %vm221_vm12  ;;  %4981 = vmatprep.subr.bf16.mxu1 %v8346_v38 }
  0x61   :  { %605 = vmatpush1.bf16.msra.mxu0 %v5103_v24  ;;  %v93_v24 = vld [vmem:[#allocation2 + $0x98] sm:$0xff] }
  0x62   :  { %606 = vmatprep.subr.bf16.mxu0 %v5104_v25  ;;  %v8539_v25 = vmov 0 }
  0x63   :  { %v8540_v25 = vsel %vm5713_vm1, 4294967295, %v8539_v25  ;;  %vm192_vm1 = vcmp.ge.s32.totalorder %v157_v34, %v5567_v45  ;;  %v104_v34 = vld [vmem:[#allocation2 + $0xf0] sm:$0xff] }
  0x64   :  { %8541 = vst [vmem:[#allocation21_spill] sm:$0xff] %v8540_v25 }
  0x65   :  { %607 = vmatpush1.bf16.msra.mxu0 %v5106_v26  ;;  %v154_v26 = vadd.s32 120, %v5561_v41 }
  0x66   :  { %608 = vmatprep.subr.bf16.mxu0 %v5107_v27  ;;  %v8542_v27 = vmov 0 }
  0x67   :  { %v8543_v27 = vsel %vm5718_vm2, 4294967295, %v8542_v27  ;;  %vm189_vm0 = vcmp.ge.s32.totalorder %v154_v26, %v5567_v45  ;;  %vm222_vm3 = vcmp.lt.s32.totalorder %v154_v26, %v5573_v48 }
  0x68   :  { %8544 = vst [vmem:[#allocation22_spill] sm:$0xff] %v8543_v27  ;;  %vm5759_vm6 = vmand %vm189_vm0, %vm222_vm3 }
  0x69   :  { %609 = vmatpush1.bf16.msra.mxu0 %v5109_v28  ;;  %v354_v28 = vpack.c.bf16 %v88_v20, %v86_v19  ;;  %v8553_v37 = vsel %vm5759_vm6, 4294967295, %v8552_v37  ;;  %vm8555_vm0 = vmpackc.low %vm5728_vm11, %vm5718_vm2  ;;  %v8581_v19 = vmov 0  ;;  %v166_v20 = vadd.s32 216, %v5561_v41 }
  0x6a   :  { %610 = vmatprep.subr.bf16.mxu0 %v5110_v29  ;;  %v8546_v29 = vmov 0  ;;  %8554 = vst [vmem:[#allocation25_spill] sm:$0xff] %v8553_v37  ;;  %4983 = vmatpush1.bf16.msk.msra.mxu1 %vm8555_vm0, %v8348_v60  ;;  %vm226_vm0 = vcmp.lt.s32.totalorder %v158_v39, %v5573_v48  ;;  %vm5793_vm3 = vmand %vm192_vm1, %vm225_vm8  ;;  %vm227_vm8 = vcmp.lt.s32.totalorder %v159_v49, %v5573_v48  ;;  %v109_v39 = vld [vmem:[#allocation2 + $0x118] sm:$0xff] }
  0x6b   :  { %v8547_v29 = vsel %vm5728_vm11, 4294967295, %v8546_v29  ;;  %4984 = vmatprep.subr.bf16.mxu1 %v8346_v38  ;;  %v8563_v52 = vsel %vm5793_vm3, 4294967295, %v8562_v52 }
  0x6c   :  { %8548 = vst [vmem:[#allocation23_spill] sm:$0xff] %v8547_v29  ;;  %8564 = vst [vmem:[#allocation28_spill] sm:$0xff] %v8563_v52 }
  0x6d   :  { %611 = vmatpush1.bf16.msra.mxu0 %v5112_v30  ;;  %v357_v30 = vpack.c.bf16 %v93_v24, %v91_v23  ;;  %v360_v23 = vpack.c.bf16 %v100_v12, %v98_v10  ;;  %v8588_v24 = vmov 0  ;;  %v114_v10 = vld [vmem:[#allocation2 + $0x140] sm:$0xff]  ;;  %v116_v12 = vld [vmem:[#allocation2 + $0x150] sm:$0xff] }
  0x6e   :  { %612 = vmatprep.subr.bf16.mxu0 %v5113_v31  ;;  %v155_v31 = vadd.s32 128, %v5561_v41 }
  0x70   :  { %vm190_vm10 = vcmp.ge.s32.totalorder %v155_v31, %v5567_v45  ;;  %vm223_vm12 = vcmp.lt.s32.totalorder %v155_v31, %v5573_v48  ;;  %v8591_v31 = vmov 0 }
  0x71   :  { %613 = vmatpush1.bf16.msra.mxu0 %v5115_v32  ;;  %v156_v32 = vadd.s32 136, %v5561_v41  ;;  %vm5781_vm9 = vmand %vm190_vm10, %vm223_vm12 }
  0x72   :  { %614 = vmatprep.subr.bf16.mxu0 %v5116_v33  ;;  %v8549_v33 = vmov 0  ;;  %v8557_v47 = vsel %vm5781_vm9, 4294967295, %v8556_v47  ;;  %vm8565_vm10 = vmpackc.low %vm5759_vm6, %vm5753_vm15 }
  0x73   :  { %v8550_v33 = vsel %vm5753_vm15, 4294967295, %v8549_v33  ;;  %vm191_vm13 = vcmp.ge.s32.totalorder %v156_v32, %v5567_v45  ;;  %vm224_vm5 = vcmp.lt.s32.totalorder %v156_v32, %v5573_v48  ;;  %8558 = vst [vmem:[#allocation26_spill] sm:$0xff] %v8557_v47  ;;  %4986 = vmatpush1.bf16.msk.msra.mxu1 %vm8565_vm10, %v8348_v60  ;;  %vm5803_vm12 = vmand %vm193_vm14, %vm226_vm0  ;;  %vm195_vm14 = vcmp.ge.s32.totalorder %v160_v51, %v5567_v45  ;;  %v102_v32 = vld [vmem:[#allocation2 + $0xe0] sm:$0xff] }
  0x74   :  { %8551 = vst [vmem:[#allocation24_spill] sm:$0xff] %v8550_v33  ;;  %vm5788_vm2 = vmand %vm191_vm13, %vm224_vm5  ;;  %v8567_v54 = vsel %vm5803_vm12, 4294967295, %v8566_v54  ;;  %4987 = vmatprep.subr.bf16.mxu1 %v8346_v38  ;;  %vm194_vm5 = vcmp.ge.s32.totalorder %v159_v49, %v5567_v45  ;;  %vm228_vm13 = vcmp.lt.s32.totalorder %v160_v51, %v5573_v48  ;;  %vm196_vm15 = vcmp.ge.s32.totalorder %v161_v62, %v5567_v45  ;;  %v106_v49 = vld [vmem:[#allocation2 + $0x100] sm:$0xff]  ;;  %v108_v51 = vld [vmem:[#allocation2 + $0x110] sm:$0xff] }
  0x75   :  { %615 = vmatpush1.bf16.msra.mxu0 %v5118_v35  ;;  %v90_v35 = vld [vmem:[#allocation2 + $0x80] sm:$0xff]  ;;  %v8560_v50 = vsel %vm5788_vm2, 4294967295, %v8559_v50  ;;  %8568 = vst [vmem:[#allocation29_spill] sm:$0xff] %v8567_v54  ;;  %vm8330_vm1 = vmpackc.low %vm5788_vm2, %vm5781_vm9  ;;  %vm229_vm9 = vcmp.lt.s32.totalorder %v161_v62, %v5573_v48  ;;  %vm231_vm2 = vcmp.lt.s32.totalorder %v163_v5, %v5573_v48 }
  0x76   :  { %v356_v44 = vpack.c.bf16 %v92_v36, %v90_v35  ;;  %8561 = vst [vmem:[#allocation27_spill] sm:$0xff] %v8560_v50  ;;  %vm5828_vm10 = vmand %vm194_vm5, %vm227_vm8  ;;  %vm232_vm8 = vcmp.lt.s32.totalorder %v164_v8, %v5573_v48  ;;  %v8594_v35 = vmov 0  ;;  %v107_v36 = vld [vmem:[#allocation2 + $0x108] sm:$0xff]  ;;  %v110_v62 = vld [vmem:[#allocation2 + $0x120] sm:$0xff] }
  0x77   :  { %4989 = vmatpush1.bf16.msk.msra.mxu1 %vm8330_vm1, %v8348_v60  ;;  %v8570_v3 = vsel %vm5828_vm10, 4294967295, %v8569_v3  ;;  %vm5834_vm0 = vmand %vm195_vm14, %vm228_vm13  ;;  %vm198_vm1 = vcmp.ge.s32.totalorder %v163_v5, %v5567_v45  ;;  %v117_v5 = vld [vmem:[#allocation2 + $0x158] sm:$0xff] }
  0x78   :  { %617 = vmatmul.mubr.bf16.vlgmr.msra.gmra.mrb[0].mxu0 %v348_v43  ;;  %v97_v43 = vld [vmem:[#allocation2 + $0xb8] sm:$0xff]  ;;  %8571 = vst [vmem:[#allocation30_spill] sm:$0xff] %v8570_v3  ;;  %4990 = vmatprep.subr.bf16.mxu1 %v8346_v38  ;;  %v8573_v7 = vsel %vm5834_vm0, 4294967295, %v8572_v7  ;;  %vm8575_vm14 = vmpackc.low %vm5803_vm12, %vm5793_vm3 }
  0x79   :  { %626 = vmatprep.mubr.bf16.mxu0 %v351_v46  ;;  %v359_v46 = vpack.c.bf16 %v97_v43, %v95_v40  ;;  %8574 = vst [vmem:[#allocation31_spill] sm:$0xff] %v8573_v7  ;;  %vm5856_vm5 = vmand %vm196_vm15, %vm229_vm9  ;;  %v362_v40 = vpack.c.bf16 %v104_v34, %v102_v32  ;;  %v365_v43 = vpack.c.bf16 %v109_v39, %v107_v36  ;;  %v123_v32 = vld [vmem:[#allocation2 + $0x188] sm:$0xff]  ;;  %v125_v34 = vld [vmem:[#allocation2 + $0x198] sm:$0xff]  ;;  %v8604_v36 = vmov 0 }
  0x7a   :  { %vm5872_vm9 = vmand %vm198_vm1, %vm231_vm2  ;;  %vm233_vm1 = vcmp.lt.s32.totalorder %v165_v14, %v5573_v48 }
  0x7b   :  { %4992 = vmatpush1.bf16.msk.msra.mxu1 %vm8575_vm14, %v8348_v60  ;;  %vm199_vm14 = vcmp.ge.s32.totalorder %v164_v8, %v5567_v45  ;;  %v8585_v22 = vsel %vm5872_vm9, 4294967295, %v8584_v22  ;;  %vm8587_vm15 = vmpackc.low %vm5834_vm0, %vm5828_vm10 }
  0x7c   :  { %4993 = vmatprep.subr.bf16.mxu1 %v8346_v38  ;;  %8586 = vst [vmem:[#allocation34_spill] sm:$0xff] %v8585_v22  ;;  %vm5882_vm6 = vmand %vm199_vm14, %vm232_vm8 }
  0x7d   :  { %v8589_v24 = vsel %vm5882_vm6, 4294967295, %v8588_v24 }
  0x7e   :  { %8590 = vst [vmem:[#allocation35_spill] sm:$0xff] %v8589_v24 }
  0x7f   :  { %4995 = vmatpush1.bf16.msk.msra.mxu1 %vm8587_vm15, %v8348_v60  ;;  %vm234_vm15 = vcmp.lt.s32.totalorder %v166_v20, %v5573_v48 }
  0x80   :  { %627 = vmatmul.mubr.bf16.gmra.mrb[4].mxu0 %v350_v59  ;;  %v101_v59 = vld [vmem:[#allocation2 + $0xd8] sm:$0xff]  ;;  %4996 = vmatprep.subr.bf16.mxu1 %v8346_v38 }
  0x81   :  { %636 = vmatprep.mubr.bf16.mxu0 %v353_v63  ;;  %v162_v63 = vadd.s32 184, %v5561_v41  ;;  %v361_v6 = vpack.c.bf16 %v101_v59, %v99_v58  ;;  %v364_v58 = vpack.c.bf16 %v108_v51, %v106_v49  ;;  %v367_v59 = vpack.c.bf16 %v113_v56, %v111_v55  ;;  %v127_v49 = vld [vmem:[#allocation2 + $0x1a8] sm:$0xff]  ;;  %v129_v51 = vld [vmem:[#allocation2 + $0x1b8] sm:$0xff] }
  0x82   :  { %v375_v56 = vpack.c.bf16 %v129_v51, %v127_v49 }
  0x83   :  { %vm8579_vm13 = vcmp.lt.s32.totalorder %v162_v63, %v5573_v48  ;;  %vm8580_vm3 = vcmp.ge.s32.totalorder %v162_v63, %v5567_v45  ;;  %v112_v63 = vld [vmem:[#allocation2 + $0x130] sm:$0xff] }
  0x84   :  { %vm5867_vm12 = vmand %vm8580_vm3, %vm8579_vm13  ;;  %vm200_vm3 = vcmp.ge.s32.totalorder %v165_v14, %v5567_v45  ;;  %vm201_vm13 = vcmp.ge.s32.totalorder %v166_v20, %v5567_v45  ;;  %v119_v14 = vld [vmem:[#allocation2 + $0x168] sm:$0xff] }
  0x85   :  { %v8582_v19 = vsel %vm5867_vm12, 4294967295, %v8581_v19  ;;  %vm8337_vm2 = vmpackc.low %vm5867_vm12, %vm5856_vm5 }
  0x86   :  { %8583 = vst [vmem:[#allocation33_spill] sm:$0xff] %v8582_v19  ;;  %4998 = vmatpush1.bf16.msk.msra.mxu1 %vm8337_vm2, %v8348_v60  ;;  %vm5907_vm14 = vmand %vm200_vm3, %vm233_vm1 }
  0x87   :  { %v8592_v31 = vsel %vm5907_vm14, 4294967295, %v8591_v31  ;;  %4999 = vmatprep.subr.bf16.mxu1 %v8346_v38  ;;  %vm5912_vm8 = vmand %vm201_vm13, %vm234_vm15 }
  0x88   :  { %637 = vmatmul.mubr.bf16.gmra.mrb[8].mxu0 %v352_v13  ;;  %v8576_v13 = vmov 0  ;;  %8593 = vst [vmem:[#allocation36_spill] sm:$0xff] %v8592_v31  ;;  %v8595_v35 = vsel %vm5912_vm8, 4294967295, %v8594_v35  ;;  %vm8597_vm13 = vmpackc.low %vm5882_vm6, %vm5872_vm9 }
  0x89   :  { %646 = vmatprep.mubr.bf16.mxu0 %v355_v15  ;;  %v8577_v13 = vsel %vm5856_vm5, 4294967295, %v8576_v13  ;;  %v103_v15 = vld [vmem:[#allocation2 + $0xe8] sm:$0xff]  ;;  %8596 = vst [vmem:[#allocation37_spill] sm:$0xff] %v8595_v35  ;;  %vm8340_vm15 = vmpackc.low %vm5912_vm8, %vm5907_vm14 }
  0x8a   :  { %8578 = vst [vmem:[#allocation32_spill] sm:$0xff] %v8577_v13  ;;  %v363_v26 = vpack.c.bf16 %v105_v17, %v103_v15  ;;  %5001 = vmatpush1.bf16.msk.msra.mxu1 %vm8597_vm13, %v8348_v60  ;;  %v121_v15 = vld [vmem:[#allocation2 + $0x178] sm:$0xff]  ;;  %v368_v17 = vpack.c.bf16 %v116_v12, %v114_v10  ;;  %v135_v10 = vld [vmem:[#allocation2 + $0x1e8] sm:$0xff] }
  0x8b   :  { %5002 = vmatprep.subr.bf16.mxu1 %v8346_v38  ;;  %v371_v20 = vpack.c.bf16 %v121_v15, %v119_v14  ;;  %v137_v12 = vld [vmem:[#allocation2 + $0x1f8] sm:$0xff] }
  0x8c   :  { %v379_v15 = vpack.c.bf16 %v137_v12, %v135_v10 }
  0x8e   :  { %5004 = vmatpush1.bf16.msk.msra.mxu1 %vm8340_vm15, %v8348_v60 }
  0x8f   :  { %5005 = vmatprep.subr.bf16.mxu1 %v8346_v38 }
  0x90   :  { %647 = vmatmul.mubr.bf16.gmra.mrb[12].mxu0 %v354_v28  ;;  %v167_v28 = vadd.s32 224, %v5561_v41 }
  0x91   :  { %656 = vmatprep.mubr.bf16.mxu0 %v357_v30  ;;  %v168_v30 = vadd.s32 232, %v5561_v41 }
  0x92   :  { %vm202_vm10 = vcmp.ge.s32.totalorder %v167_v28, %v5567_v45  ;;  %vm235_vm5 = vcmp.lt.s32.totalorder %v167_v28, %v5573_v48  ;;  %v118_v28 = vld [vmem:[#allocation2 + $0x160] sm:$0xff] }
  0x93   :  { %vm203_vm3 = vcmp.ge.s32.totalorder %v168_v30, %v5567_v45  ;;  %vm236_vm1 = vcmp.lt.s32.totalorder %v168_v30, %v5573_v48  ;;  %vm5931_vm2 = vmand %vm202_vm10, %vm235_vm5  ;;  %v120_v30 = vld [vmem:[#allocation2 + $0x170] sm:$0xff] }
  0x94   :  { %vm5935_vm12 = vmand %vm203_vm3, %vm236_vm1  ;;  %v370_v39 = vpack.c.bf16 %v120_v30, %v118_v28  ;;  %v336_v28 = vmul.u32 32, %v5561_v41 }
  0x95   :  { %vm8339_vm10 = vmpackc.low %vm5935_vm12, %vm5931_vm2 }
  0x96   :  { %5007 = vmatpush1.bf16.msk.msra.mxu1 %vm8339_vm10, %v8348_v60  ;;  %v339_v30 = vadd.s32 32, %v336_v28 }
  0x97   :  { %5008 = vmatprep.subr.bf16.mxu1 %v8346_v38 }
  0x98   :  { %657 = vmatmul.mubr.bf16.gmra.mrb[16].mxu0 %v356_v44  ;;  %v8598_v44 = vmov 0 }
  0x99   :  { %666 = vmatprep.mubr.bf16.mxu0 %v359_v46  ;;  %v8599_v44 = vsel %vm5931_vm2, 4294967295, %v8598_v44  ;;  %v8601_v46 = vmov 0 }
  0x9a   :  { %8600 = vst [vmem:[#allocation38_spill] sm:$0xff] %v8599_v44  ;;  %v8602_v46 = vsel %vm5935_vm12, 4294967295, %v8601_v46 }
  0x9b   :  { %8603 = vst [vmem:[#allocation39_spill] sm:$0xff] %v8602_v46 }
  0xa0   :  { %667 = vmatmul.mubr.bf16.gmra.mrb[20].mxu0 %v358_v1  ;;  %v115_v1 = vld [vmem:[#allocation2 + $0x148] sm:$0xff] }
  0xa1   :  { %676 = vmatprep.mubr.bf16.mxu0 %v361_v6  ;;  %v366_v6 = vpack.c.bf16 %v112_v63, %v110_v62  ;;  %v369_v8 = vpack.c.bf16 %v117_v5, %v115_v1  ;;  %v131_v62 = vld [vmem:[#allocation2 + $0x1c8] sm:$0xff]  ;;  %v133_v63 = vld [vmem:[#allocation2 + $0x1d8] sm:$0xff] }
  0xa2   :  { %v377_v5 = vpack.c.bf16 %v133_v63, %v131_v62 }
  0xa8   :  { %677 = vmatmul.mubr.bf16.gmra.mrb[24].mxu0 %v360_v23  ;;  %v169_v23 = vadd.s32 240, %v5561_v41 }
  0xa9   :  { %686 = vmatprep.mubr.bf16.mxu0 %v363_v26  ;;  %v170_v26 = vadd.s32 248, %v5561_v41 }
  0xaa   :  { %vm204_vm5 = vcmp.ge.s32.totalorder %v169_v23, %v5567_v45  ;;  %vm237_vm1 = vcmp.lt.s32.totalorder %v169_v23, %v5573_v48 }
  0xab   :  { %vm205_vm3 = vcmp.ge.s32.totalorder %v170_v26, %v5567_v45  ;;  %vm238_vm13 = vcmp.lt.s32.totalorder %v170_v26, %v5573_v48  ;;  %vm5963_vm10 = vmand %vm204_vm5, %vm237_vm1  ;;  %v122_v45 = vld [vmem:[#allocation2 + $0x180] sm:$0xff]  ;;  %v124_v48 = vld [vmem:[#allocation2 + $0x190] sm:$0xff]  ;;  %v335_v26 = vadd.s32 128, %v5563_v42 }
  0xac   :  { %v8605_v36 = vsel %vm5963_vm10, 4294967295, %v8604_v36  ;;  %vm5967_vm15 = vmand %vm205_vm3, %vm238_vm13  ;;  %v372_v55 = vpack.c.bf16 %v124_v48, %v122_v45  ;;  %vm337_vm3 = vcmp.ge.s32.totalorder %v5563_v42, %v336_v28  ;;  %vm340_vm13 = vcmp.lt.s32.totalorder %v5563_v42, %v339_v30 }
  0xad   :  { %8606 = vst [vmem:[#allocation40_spill] sm:$0xff] %v8605_v36  ;;  %vm8342_vm2 = vmpackc.low %vm5967_vm15, %vm5963_vm10  ;;  %vm338_vm5 = vcmp.ge.s32.totalorder %v335_v26, %v336_v28  ;;  %vm341_vm1 = vcmp.lt.s32.totalorder %v335_v26, %v339_v30  ;;  %v6001_v42 = vsub.s32 1, %v5561_v41  ;;  %v6007_v45 = vsub.s32 0, %v5561_v41 }
  0xae   :  { %5010 = vmatpush1.bf16.msk.msra.mxu1 %vm8342_vm2, %v8348_v60  ;;  %vm5985_vm2 = vmand %vm338_vm5, %vm341_vm1  ;;  %vm1452_vm5 = vcmask 64512  }
  0xaf   :  { %vm5992_vm10 = vmand %vm337_vm3, %vm340_vm13  ;;  %8616 = vst [vmem:[#allocation44_spill] sm:$0xff] %v6001_v42 }
  0xb0   :  { %687 = vmatmul.mubr.bf16.gmra.mrb[28].mxu0 %v362_v40  ;;  %v8607_v40 = vmov 0  ;;  %8617 = vst [vmem:[#allocation45_spill] sm:$0xff] %v6007_v45  ;;  %vm8669_vm3 = vmpackc.low %vm5588_vm7, %vm5581_vm4  ;;  %vm8672_vm4 = vnez %v8671_v53 }
  0xb1   :  { %696 = vmatprep.mubr.bf16.mxu0 %v365_v43  ;;  %v8608_v40 = vsel %vm5967_vm15, 4294967295, %v8607_v40  ;;  %v373_v43 = vpack.c.bf16 %v125_v34, %v123_v32  ;;  %v8610_v32 = vmov 0  ;;  %v8344_v34 = vmov 1.0  }
  0xb2   :  { %8609 = vst [vmem:[#allocation41_spill] sm:$0xff] %v8608_v40  ;;  %v8611_v32 = vsel %vm5985_vm2, 4294967295, %v8610_v32  ;;  %4767 = vmatprep.subr.msk.mxu0 %vm5985_vm2, %v8344_v34 }
  0xb3   :  { %8612 = vst [vmem:[#allocation42_spill] sm:$0xff] %v8611_v32  ;;  %4768 = vmatpush1.msk.msra.mxu0 %vm5992_vm10, %v8344_v34 }
  0xb4   :  { %5011 = vmatprep.subr.bf16.mxu0 %v8346_v38 }
  0xb8   :  { %697 = vmatmul.mubr.bf16.gmra.mrb[32].mxu0 %v364_v58  ;;  %v126_v58 = vld [vmem:[#allocation2 + $0x1a0] sm:$0xff] }
  0xb9   :  { %706 = vmatprep.mubr.bf16.mxu0 %v367_v59  ;;  %v128_v59 = vld [vmem:[#allocation2 + $0x1b0] sm:$0xff] }
  0xba   :  { %v374_v1 = vpack.c.bf16 %v128_v59, %v126_v58 }
  0xc0   :  { %707 = vmatmul.mubr.bf16.gmra.mrb[36].mxu0 %v366_v6  ;;  %v130_v6 = vld [vmem:[#allocation2 + $0x1c0] sm:$0xff] }
  0xc1   :  { %716 = vmatprep.mubr.bf16.mxu0 %v369_v8  ;;  %v132_v8 = vld [vmem:[#allocation2 + $0x1d0] sm:$0xff] }
  0xc2   :  { %v376_v14 = vpack.c.bf16 %v132_v8, %v130_v6 }
  0xc8   :  { %717 = vmatmul.mubr.bf16.gmra.mrb[40].mxu0 %v368_v17  ;;  %v134_v17 = vld [vmem:[#allocation2 + $0x1e0] sm:$0xff] }
  0xc9   :  { %726 = vmatprep.mubr.bf16.mxu0 %v371_v20  ;;  %v136_v20 = vld [vmem:[#allocation2 + $0x1f0] sm:$0xff] }
  0xca   :  { %v378_v23 = vpack.c.bf16 %v136_v20, %v134_v17 }
  0xd0   :  { %727 = vmatmul.mubr.bf16.gmra.mrb[44].mxu0 %v370_v39  ;;  %v8613_v39 = vmov 0 }
  0xd1   :  { %736 = vmatprep.mubr.bf16.mxu0 %v373_v43  ;;  %v8614_v39 = vsel %vm5992_vm10, 4294967295, %v8613_v39  ;;  %v412_v43 = vld [vmem:[%s8306_s2] sm:$0x3] }
  0xd2   :  { %8615 = vst [vmem:[#allocation43_spill] sm:$0xff] %v8614_v39  ;;  %v6010_v48 = vrot.slane %v412_v43, %v6001_v42  ;;  %v6013_v49 = vrot.slane %v412_v43, %v6007_v45 }
  0xd8   :  { %737 = vmatmul.mubr.bf16.gmra.mrb[48].mxu0 %v372_v55 }
  0xd9   :  { %746 = vmatprep.mubr.bf16.mxu0 %v375_v56 }
  0xe0   :  { %747 = vmatmul.mubr.bf16.gmra.mrb[52].mxu0 %v374_v1 }
  0xe1   :  { %756 = vmatprep.mubr.bf16.mxu0 %v377_v5 }
  0xe8   :  { %757 = vmatmul.mubr.bf16.gmra.mrb[56].mxu0 %v376_v14 }
  0xe9   :  { %766 = vmatprep.mubr.bf16.mxu0 %v379_v15 }
  0xf0   :  { %767 = vmatmul.mubr.bf16.gmra.mrb[60].mxu0 %v378_v23 }
  0xf1   :  { %1709 = vmatprep.mubr.f32.mxu0 %v8380_v21 }
 0x14b   :  { %v618_v51 = vpop.f32.mrb[0].mxu0 }
 0x14c   :  { %v620_v55 = vpop.f32.mrb[1].mxu0  ;;  %v6019_v59 = vadd.f32 %v618_v51, %v6013_v49 }
 0x14d   :  { %v6016_v56 = vadd.f32 %v620_v55, %v6010_v48  ;;  %v622_v58 = vpop.f32.mrb[2].mxu0 }
 0x14e   :  { %v624_v62 = vpop.f32.mrb[3].mxu0  ;;  %v6028_v41 = vadd.f32 %v622_v58, %v6013_v49 }
 0x14f   :  { %v6022_v63 = vadd.f32 %v624_v62, %v6010_v48  ;;  %907 = vmatprep.mubr.f32.mxu1 %v6016_v56 }
 0x150   :  { %908 = vmatmul.mubr.f32.vlgmr.msra.gmra.mrb[0].mxu1 %v6019_v59 }
 0x151   :  { %912 = vmatprep.mubr.f32.mxu1 %v6022_v63 }
 0x153   :  { %v628_v1 = vpop.f32.mrb[4].mxu0 }
 0x154   :  { %v630_v5 = vpop.f32.mrb[5].mxu0  ;;  %913 = vmatmul.mubr.f32.gmra.mrb[2].mxu1 %v6028_v41  ;;  %v6035_v10 = vadd.f32 %v628_v1, %v6013_v49 }
 0x155   :  { %v6032_v6 = vadd.f32 %v630_v5, %v6010_v48  ;;  %v632_v8 = vpop.f32.mrb[6].mxu0 }
 0x156   :  { %v634_v12 = vpop.f32.mrb[7].mxu0  ;;  %v6044_v15 = vadd.f32 %v632_v8, %v6013_v49 }
 0x157   :  { %v6038_v14 = vadd.f32 %v634_v12, %v6010_v48  ;;  %917 = vmatprep.mubr.f32.mxu1 %v6032_v6 }
 0x158   :  { %918 = vmatmul.mubr.f32.gmra.mrb[4].mxu1 %v6035_v10 }
 0x159   :  { %922 = vmatprep.mubr.f32.mxu1 %v6038_v14 }
 0x15b   :  { %v638_v17 = vpop.f32.mrb[8].mxu0 }
 0x15c   :  { %v640_v20 = vpop.f32.mrb[9].mxu0  ;;  %923 = vmatmul.mubr.f32.gmra.mrb[6].mxu1 %v6044_v15  ;;  %v6051_v28 = vadd.f32 %v638_v17, %v6013_v49 }
 0x15d   :  { %v6048_v23 = vadd.f32 %v640_v20, %v6010_v48  ;;  %v642_v26 = vpop.f32.mrb[10].mxu0 }
 0x15e   :  { %v644_v30 = vpop.f32.mrb[11].mxu0  ;;  %v6060_v51 = vadd.f32 %v642_v26, %v6013_v49 }
 0x15f   :  { %v6054_v43 = vadd.f32 %v644_v30, %v6010_v48  ;;  %927 = vmatprep.mubr.f32.mxu1 %v6048_v23 }
 0x160   :  { %928 = vmatmul.mubr.f32.gmra.mrb[8].mxu1 %v6051_v28 }
 0x161   :  { %932 = vmatprep.mubr.f32.mxu1 %v6054_v43 }
 0x163   :  { %v648_v55 = vpop.f32.mrb[12].mxu0 }
 0x164   :  { %v650_v58 = vpop.f32.mrb[13].mxu0  ;;  %933 = vmatmul.mubr.f32.gmra.mrb[10].mxu1 %v6060_v51  ;;  %v6067_v5 = vadd.f32 %v648_v55, %v6013_v49 }
 0x165   :  { %v6064_v62 = vadd.f32 %v650_v58, %v6010_v48  ;;  %v652_v1 = vpop.f32.mrb[14].mxu0 }
 0x166   :  { %v654_v8 = vpop.f32.mrb[15].mxu0  ;;  %v6076_v17 = vadd.f32 %v652_v1, %v6013_v49 }
 0x167   :  { %v6070_v12 = vadd.f32 %v654_v8, %v6010_v48  ;;  %937 = vmatprep.mubr.f32.mxu1 %v6064_v62 }
 0x168   :  { %938 = vmatmul.mubr.f32.gmra.mrb[12].mxu1 %v6067_v5 }
 0x169   :  { %8618 = vst [vmem:[#allocation46_spill] sm:$0xff] %v6070_v12  ;;  %942 = vmatprep.mubr.f32.mxu1 %v6070_v12 }
 0x16b   :  { %v658_v20 = vpop.f32.mrb[16].mxu0 }
 0x16c   :  { %v660_v26 = vpop.f32.mrb[17].mxu0  ;;  %943 = vmatmul.mubr.f32.gmra.mrb[14].mxu1 %v6076_v17  ;;  %v6083_v58 = vadd.f32 %v658_v20, %v6013_v49 }
 0x16d   :  { %v6080_v30 = vadd.f32 %v660_v26, %v6010_v48  ;;  %v662_v55 = vpop.f32.mrb[18].mxu0 }
 0x16e   :  { %8620 = vst [vmem:[#allocation48_spill] sm:$0xff] %v6083_v58  ;;  %v664_v8 = vpop.f32.mrb[19].mxu0  ;;  %v6092_v1 = vadd.f32 %v662_v55, %v6013_v49 }
 0x16f   :  { %8619 = vst [vmem:[#allocation47_spill] sm:$0xff] %v6080_v30  ;;  %v6086_v34 = vadd.f32 %v664_v8, %v6010_v48  ;;  %947 = vmatprep.mubr.f32.mxu1 %v6080_v30 }
 0x170   :  { %948 = vmatmul.mubr.f32.gmra.mrb[16].mxu1 %v6083_v58  ;;  %8622 = vst [vmem:[#allocation50_spill] sm:$0xff] %v6092_v1 }
 0x171   :  { %8621 = vst [vmem:[#allocation49_spill] sm:$0xff] %v6086_v34  ;;  %952 = vmatprep.mubr.f32.mxu1 %v6086_v34 }
 0x173   :  { %v668_v38 = vpop.f32.mrb[20].mxu0 }
 0x174   :  { %v670_v26 = vpop.f32.mrb[21].mxu0  ;;  %953 = vmatmul.mubr.f32.gmra.mrb[18].mxu1 %v6092_v1  ;;  %v6099_v8 = vadd.f32 %v668_v38, %v6013_v49 }
 0x175   :  { %v6096_v20 = vadd.f32 %v670_v26, %v6010_v48  ;;  %v672_v60 = vpop.f32.mrb[22].mxu0 }
 0x176   :  { %8624 = vst [vmem:[#allocation52_spill] sm:$0xff] %v6099_v8  ;;  %v674_v39 = vpop.f32.mrb[23].mxu0  ;;  %v6108_v55 = vadd.f32 %v672_v60, %v6013_v49 }
 0x177   :  { %8623 = vst [vmem:[#allocation51_spill] sm:$0xff] %v6096_v20  ;;  %v6102_v42 = vadd.f32 %v674_v39, %v6010_v48  ;;  %957 = vmatprep.mubr.f32.mxu1 %v6096_v20 }
 0x178   :  { %958 = vmatmul.mubr.f32.gmra.mrb[20].mxu1 %v6099_v8  ;;  %8626 = vst [vmem:[#allocation54_spill] sm:$0xff] %v6108_v55 }
 0x179   :  { %8625 = vst [vmem:[#allocation53_spill] sm:$0xff] %v6102_v42  ;;  %962 = vmatprep.mubr.f32.mxu1 %v6102_v42 }
 0x17b   :  { %v678_v45 = vpop.f32.mrb[24].mxu0 }
 0x17c   :  { %v680_v26 = vpop.f32.mrb[25].mxu0  ;;  %963 = vmatmul.mubr.f32.gmra.mrb[22].mxu1 %v6108_v55  ;;  %v6115_v39 = vadd.f32 %v678_v45, %v6013_v49 }
 0x17d   :  { %v6112_v38 = vadd.f32 %v680_v26, %v6010_v48  ;;  %v682_v32 = vpop.f32.mrb[26].mxu0 }
 0x17e   :  { %8628 = vst [vmem:[#allocation56_spill] sm:$0xff] %v6115_v39  ;;  %v684_v36 = vpop.f32.mrb[27].mxu0  ;;  %v6124_v60 = vadd.f32 %v682_v32, %v6013_v49 }
 0x17f   :  { %8627 = vst [vmem:[#allocation55_spill] sm:$0xff] %v6112_v38  ;;  %v6118_v40 = vadd.f32 %v684_v36, %v6010_v48  ;;  %967 = vmatprep.mubr.f32.mxu1 %v6112_v38 }
 0x180   :  { %968 = vmatmul.mubr.f32.gmra.mrb[24].mxu1 %v6115_v39  ;;  %8630 = vst [vmem:[#allocation58_spill] sm:$0xff] %v6124_v60 }
 0x181   :  { %8629 = vst [vmem:[#allocation57_spill] sm:$0xff] %v6118_v40  ;;  %972 = vmatprep.mubr.f32.mxu1 %v6118_v40 }
 0x183   :  { %v688_v44 = vpop.f32.mrb[28].mxu0 }
 0x184   :  { %v690_v26 = vpop.f32.mrb[29].mxu0  ;;  %973 = vmatmul.mubr.f32.gmra.mrb[26].mxu1 %v6124_v60  ;;  %v6131_v36 = vadd.f32 %v688_v44, %v6013_v49 }
 0x185   :  { %v6128_v45 = vadd.f32 %v690_v26, %v6010_v48  ;;  %v692_v46 = vpop.f32.mrb[30].mxu0 }
 0x186   :  { %8632 = vst [vmem:[#allocation60_spill] sm:$0xff] %v6131_v36  ;;  %v694_v31 = vpop.f32.mrb[31].mxu0  ;;  %v6140_v32 = vadd.f32 %v692_v46, %v6013_v49 }
 0x187   :  { %8631 = vst [vmem:[#allocation59_spill] sm:$0xff] %v6128_v45  ;;  %v6134_v35 = vadd.f32 %v694_v31, %v6010_v48  ;;  %977 = vmatprep.mubr.f32.mxu1 %v6128_v45 }
 0x188   :  { %978 = vmatmul.mubr.f32.gmra.mrb[28].mxu1 %v6131_v36  ;;  %8634 = vst [vmem:[#allocation62_spill] sm:$0xff] %v6140_v32 }
 0x189   :  { %8633 = vst [vmem:[#allocation61_spill] sm:$0xff] %v6134_v35  ;;  %982 = vmatprep.mubr.f32.mxu1 %v6134_v35 }
 0x18b   :  { %v698_v22 = vpop.f32.mrb[32].mxu0 }
 0x18c   :  { %v700_v26 = vpop.f32.mrb[33].mxu0  ;;  %983 = vmatmul.mubr.f32.gmra.mrb[30].mxu1 %v6140_v32  ;;  %v6147_v31 = vadd.f32 %v698_v22, %v6013_v49 }
 0x18d   :  { %v6144_v44 = vadd.f32 %v700_v26, %v6010_v48  ;;  %v702_v24 = vpop.f32.mrb[34].mxu0 }
 0x18e   :  { %8636 = vst [vmem:[#allocation64_spill] sm:$0xff] %v6147_v31  ;;  %v704_v13 = vpop.f32.mrb[35].mxu0  ;;  %v6156_v46 = vadd.f32 %v702_v24, %v6013_v49 }
 0x18f   :  { %8635 = vst [vmem:[#allocation63_spill] sm:$0xff] %v6144_v44  ;;  %v6150_v19 = vadd.f32 %v704_v13, %v6010_v48  ;;  %987 = vmatprep.mubr.f32.mxu1 %v6144_v44 }
 0x190   :  { %988 = vmatmul.mubr.f32.gmra.mrb[32].mxu1 %v6147_v31  ;;  %8638 = vst [vmem:[#allocation66_spill] sm:$0xff] %v6156_v46 }
 0x191   :  { %8637 = vst [vmem:[#allocation65_spill] sm:$0xff] %v6150_v19  ;;  %992 = vmatprep.mubr.f32.mxu1 %v6150_v19 }
 0x193   :  { %v708_v3 = vpop.f32.mrb[36].mxu0 }
 0x194   :  { %v710_v26 = vpop.f32.mrb[37].mxu0  ;;  %993 = vmatmul.mubr.f32.gmra.mrb[34].mxu1 %v6156_v46  ;;  %v6163_v13 = vadd.f32 %v708_v3, %v6013_v49 }
 0x195   :  { %v6160_v22 = vadd.f32 %v710_v26, %v6010_v48  ;;  %v712_v7 = vpop.f32.mrb[38].mxu0 }
 0x196   :  { %8640 = vst [vmem:[#allocation68_spill] sm:$0xff] %v6163_v13  ;;  %v714_v52 = vpop.f32.mrb[39].mxu0  ;;  %v6172_v24 = vadd.f32 %v712_v7, %v6013_v49 }
 0x197   :  { %8639 = vst [vmem:[#allocation67_spill] sm:$0xff] %v6160_v22  ;;  %v6166_v54 = vadd.f32 %v714_v52, %v6010_v48  ;;  %997 = vmatprep.mubr.f32.mxu1 %v6160_v22 }
 0x198   :  { %998 = vmatmul.mubr.f32.gmra.mrb[36].mxu1 %v6163_v13  ;;  %8642 = vst [vmem:[#allocation70_spill] sm:$0xff] %v6172_v24 }
 0x199   :  { %8641 = vst [vmem:[#allocation69_spill] sm:$0xff] %v6166_v54  ;;  %1002 = vmatprep.mubr.f32.mxu1 %v6166_v54 }
 0x19b   :  { %v718_v47 = vpop.f32.mrb[40].mxu0 }
 0x19c   :  { %v720_v26 = vpop.f32.mrb[41].mxu0  ;;  %1003 = vmatmul.mubr.f32.gmra.mrb[38].mxu1 %v6172_v24  ;;  %v6179_v52 = vadd.f32 %v718_v47, %v6013_v49 }
 0x19d   :  { %v6176_v3 = vadd.f32 %v720_v26, %v6010_v48  ;;  %v722_v50 = vpop.f32.mrb[42].mxu0 }
 0x19e   :  { %8644 = vst [vmem:[#allocation72_spill] sm:$0xff] %v6179_v52  ;;  %v724_v33 = vpop.f32.mrb[43].mxu0  ;;  %v6188_v7 = vadd.f32 %v722_v50, %v6013_v49 }
 0x19f   :  { %8643 = vst [vmem:[#allocation71_spill] sm:$0xff] %v6176_v3  ;;  %v6182_v37 = vadd.f32 %v724_v33, %v6010_v48  ;;  %1007 = vmatprep.mubr.f32.mxu1 %v6176_v3 }
 0x1a0   :  { %1008 = vmatmul.mubr.f32.gmra.mrb[40].mxu1 %v6179_v52  ;;  %8646 = vst [vmem:[#allocation74_spill] sm:$0xff] %v6188_v7 }
 0x1a1   :  { %8645 = vst [vmem:[#allocation73_spill] sm:$0xff] %v6182_v37  ;;  %1012 = vmatprep.mubr.f32.mxu1 %v6182_v37 }
 0x1a3   :  { %v728_v27 = vpop.f32.mrb[44].mxu0 }
 0x1a4   :  { %v730_v26 = vpop.f32.mrb[45].mxu0  ;;  %1013 = vmatmul.mubr.f32.gmra.mrb[42].mxu1 %v6188_v7  ;;  %v6196_v33 = vadd.f32 %v728_v27, %v6013_v49 }
 0x1a5   :  { %v6192_v47 = vadd.f32 %v730_v26, %v6010_v48  ;;  %v732_v29 = vpop.f32.mrb[46].mxu0 }
 0x1a6   :  { %8648 = vst [vmem:[#allocation76_spill] sm:$0xff] %v6196_v33  ;;  %v734_v25 = vpop.f32.mrb[47].mxu0  ;;  %v6205_v50 = vadd.f32 %v732_v29, %v6013_v49 }
 0x1a7   :  { %8647 = vst [vmem:[#allocation75_spill] sm:$0xff] %v6192_v47  ;;  %v6199_v16 = vadd.f32 %v734_v25, %v6010_v48  ;;  %1017 = vmatprep.mubr.f32.mxu1 %v6192_v47 }
 0x1a8   :  { %1018 = vmatmul.mubr.f32.gmra.mrb[44].mxu1 %v6196_v33  ;;  %8650 = vst [vmem:[#allocation78_spill] sm:$0xff] %v6205_v50 }
 0x1a9   :  { %8649 = vst [vmem:[#allocation77_spill] sm:$0xff] %v6199_v16  ;;  %1022 = vmatprep.mubr.f32.mxu1 %v6199_v16 }
 0x1ab   :  { %v738_v26 = vpop.f32.mrb[48].mxu0 }
 0x1ac   :  { %v740_v18 = vpop.f32.mrb[49].mxu0  ;;  %1023 = vmatmul.mubr.f32.gmra.mrb[46].mxu1 %v6205_v50  ;;  %v6212_v25 = vadd.f32 %v738_v26, %v6013_v49 }
 0x1ad   :  { %v6209_v27 = vadd.f32 %v740_v18, %v6010_v48  ;;  %v742_v21 = vpop.f32.mrb[50].mxu0 }
 0x1ae   :  { %8652 = vst [vmem:[#allocation80_spill] sm:$0xff] %v6212_v25  ;;  %v744_v9 = vpop.f32.mrb[51].mxu0  ;;  %v6221_v29 = vadd.f32 %v742_v21, %v6013_v49 }
 0x1af   :  { %8651 = vst [vmem:[#allocation79_spill] sm:$0xff] %v6209_v27  ;;  %v6215_v11 = vadd.f32 %v744_v9, %v6010_v48  ;;  %1027 = vmatprep.mubr.f32.mxu1 %v6209_v27  ;;  %v828_v57 = vmul.f32 %v6209_v27, %v6209_v27 }
 0x1b0   :  { %1028 = vmatmul.mubr.f32.gmra.mrb[48].mxu1 %v6212_v25  ;;  %8654 = vst [vmem:[#allocation82_spill] sm:$0xff] %v6221_v29 }
 0x1b1   :  { %8653 = vst [vmem:[#allocation81_spill] sm:$0xff] %v6215_v11  ;;  %1032 = vmatprep.mubr.f32.mxu1 %v6215_v11 }
 0x1b3   :  { %v748_v2 = vpop.f32.mrb[52].mxu0 }
 0x1b4   :  { %v750_v18 = vpop.f32.mrb[53].mxu0  ;;  %1033 = vmatmul.mubr.f32.gmra.mrb[50].mxu1 %v6221_v29  ;;  %v6228_v9 = vadd.f32 %v748_v2, %v6013_v49 }
 0x1b5   :  { %v6225_v26 = vadd.f32 %v750_v18, %v6010_v48  ;;  %v752_v4 = vpop.f32.mrb[54].mxu0 }
 0x1b6   :  { %8656 = vst [vmem:[#allocation84_spill] sm:$0xff] %v6228_v9  ;;  %v754_v61 = vpop.f32.mrb[55].mxu0  ;;  %v6237_v21 = vadd.f32 %v752_v4, %v6013_v49 }
 0x1b7   :  { %8655 = vst [vmem:[#allocation83_spill] sm:$0xff] %v6225_v26  ;;  %v6231_v0 = vadd.f32 %v754_v61, %v6010_v48  ;;  %1037 = vmatprep.mubr.f32.mxu1 %v6225_v26 }
 0x1b8   :  { %1038 = vmatmul.mubr.f32.gmra.mrb[52].mxu1 %v6228_v9  ;;  %8658 = vst [vmem:[#allocation86_spill] sm:$0xff] %v6237_v21 }
 0x1b9   :  { %8657 = vst [vmem:[#allocation85_spill] sm:$0xff] %v6231_v0  ;;  %1042 = vmatprep.mubr.f32.mxu1 %v6231_v0 }
 0x1bb   :  { %v758_v29 = vpop.f32.mrb[56].mxu0 }
 0x1bc   :  { %v760_v18 = vpop.f32.mrb[57].mxu0  ;;  %1043 = vmatmul.mubr.f32.gmra.mrb[54].mxu1 %v6237_v21  ;;  %v6244_v61 = vadd.f32 %v758_v29, %v6013_v49 }
 0x1bd   :  { %v6241_v2 = vadd.f32 %v760_v18, %v6010_v48  ;;  %v762_v11 = vpop.f32.mrb[58].mxu0 }
 0x1be   :  { %8660 = vst [vmem:[#allocation88_spill] sm:$0xff] %v6244_v61  ;;  %v764_v25 = vpop.f32.mrb[59].mxu0  ;;  %v6253_v4 = vadd.f32 %v762_v11, %v6013_v49 }
 0x1bf   :  { %8659 = vst [vmem:[#allocation87_spill] sm:$0xff] %v6241_v2  ;;  %v6247_v26 = vadd.f32 %v764_v25, %v6010_v48  ;;  %1047 = vmatprep.mubr.f32.mxu1 %v6241_v2 }
 0x1c0   :  { %1048 = vmatmul.mubr.f32.gmra.mrb[56].mxu1 %v6244_v61  ;;  %8662 = vst [vmem:[#allocation90_spill] sm:$0xff] %v6253_v4 }
 0x1c1   :  { %8661 = vst [vmem:[#allocation89_spill] sm:$0xff] %v6247_v26  ;;  %1052 = vmatprep.mubr.f32.mxu1 %v6247_v26 }
 0x1c3   :  { %v768_v21 = vpop.f32.mrb[60].mxu0 }
 0x1c4   :  { %v770_v18 = vpop.f32.mrb[61].mxu0  ;;  %1053 = vmatmul.mubr.f32.gmra.mrb[58].mxu1 %v6253_v4  ;;  %v6260_v25 = vadd.f32 %v768_v21, %v6013_v49  ;;  %v779_v21 = vmul.f32 %v6019_v59, %v6019_v59 }
 0x1c5   :  { %v6257_v29 = vadd.f32 %v770_v18, %v6010_v48  ;;  %v772_v0 = vpop.f32.mrb[62].mxu0  ;;  %v780_v18 = vmul.f32 %v6016_v56, %v6016_v56 }
 0x1c6   :  { %8664 = vst [vmem:[#allocation92_spill] sm:$0xff] %v6260_v25  ;;  %v774_v9 = vpop.f32.mrb[63].mxu0  ;;  %v6269_v11 = vadd.f32 %v772_v0, %v6013_v49  ;;  %v784_v0 = vmul.f32 %v6032_v6, %v6032_v6  ;;  %v783_v49 = vmul.f32 %v6035_v10, %v6035_v10 }
 0x1c7   :  { %8663 = vst [vmem:[#allocation91_spill] sm:$0xff] %v6257_v29  ;;  %v6263_v2 = vadd.f32 %v774_v9, %v6010_v48  ;;  %1057 = vmatprep.mubr.f32.mxu1 %v6257_v29  ;;  %v782_v48 = vmul.f32 %v6022_v63, %v6022_v63  ;;  %v781_v9 = vmul.f32 %v6028_v41, %v6028_v41 }
 0x1c8   :  { %1058 = vmatmul.mubr.f32.gmra.mrb[60].mxu1 %v6260_v25  ;;  %8666 = vst [vmem:[#allocation94_spill] sm:$0xff] %v6269_v11 }
 0x1c9   :  { %8665 = vst [vmem:[#allocation93_spill] sm:$0xff] %v6263_v2  ;;  %1062 = vmatprep.mubr.f32.mxu1 %v6263_v2 }
 0x1cc   :  { %1063 = vmatmul.mubr.f32.gmra.mrb[62].mxu1 %v6269_v11 }
 0x1cd   :  { %1067 = vmatprep.mubr.f32.mxu1 %v780_v18  ;;  %v786_v18 = vmul.f32 %v6038_v14, %v6038_v14 }
 0x1d0   :  { %1068 = vmatmul.mubr.f32.gmra.mrb[64].mxu1 %v779_v21  ;;  %v785_v21 = vmul.f32 %v6044_v15, %v6044_v15 }
 0x1d1   :  { %1072 = vmatprep.mubr.f32.mxu1 %v782_v48  ;;  %v788_v48 = vmul.f32 %v6048_v23, %v6048_v23 }
 0x1d4   :  { %1073 = vmatmul.mubr.f32.gmra.mrb[66].mxu1 %v781_v9  ;;  %v787_v9 = vmul.f32 %v6051_v28, %v6051_v28 }
 0x1d5   :  { %1077 = vmatprep.mubr.f32.mxu1 %v784_v0  ;;  %v790_v0 = vmul.f32 %v6054_v43, %v6054_v43 }
 0x1d8   :  { %1078 = vmatmul.mubr.f32.gmra.mrb[68].mxu1 %v783_v49  ;;  %v789_v49 = vmul.f32 %v6060_v51, %v6060_v51 }
 0x1d9   :  { %1082 = vmatprep.mubr.f32.mxu1 %v786_v18  ;;  %v792_v18 = vmul.f32 %v6064_v62, %v6064_v62 }
 0x1dc   :  { %1083 = vmatmul.mubr.f32.gmra.mrb[70].mxu1 %v785_v21  ;;  %v791_v21 = vmul.f32 %v6067_v5, %v6067_v5 }
 0x1dd   :  { %1087 = vmatprep.mubr.f32.mxu1 %v788_v48  ;;  %v794_v48 = vmul.f32 %v6070_v12, %v6070_v12  ;;  %v5148_v12 = vld [vmem:[#allocation7 + $0x94] ss:$8 sps:$4 sm:$0xff]  }
 0x1e0   :  { %1088 = vmatmul.mubr.f32.gmra.mrb[72].mxu1 %v787_v9  ;;  %v793_v9 = vmul.f32 %v6076_v17, %v6076_v17 }
 0x1e1   :  { %1092 = vmatprep.mubr.f32.mxu1 %v790_v0  ;;  %v796_v0 = vmul.f32 %v6080_v30, %v6080_v30 }
 0x1e4   :  { %1093 = vmatmul.mubr.f32.gmra.mrb[74].mxu1 %v789_v49  ;;  %v795_v49 = vmul.f32 %v6083_v58, %v6083_v58  ;;  %v5146_v58 = vld [vmem:[#allocation7 + $0x90] ss:$8 sps:$4 sm:$0xff]  }
 0x1e5   :  { %1097 = vmatprep.mubr.f32.mxu1 %v792_v18  ;;  %v798_v18 = vmul.f32 %v6086_v34, %v6086_v34 }
 0x1e8   :  { %1098 = vmatmul.mubr.f32.gmra.mrb[76].mxu1 %v791_v21  ;;  %v797_v21 = vmul.f32 %v6092_v1, %v6092_v1 }
 0x1e9   :  { %1102 = vmatprep.mubr.f32.mxu1 %v794_v48  ;;  %v800_v48 = vmul.f32 %v6096_v20, %v6096_v20 }
 0x1ec   :  { %1103 = vmatmul.mubr.f32.gmra.mrb[78].mxu1 %v793_v9  ;;  %v799_v9 = vmul.f32 %v6099_v8, %v6099_v8 }
 0x1ed   :  { %1107 = vmatprep.mubr.f32.mxu1 %v796_v0  ;;  %v802_v0 = vmul.f32 %v6102_v42, %v6102_v42 }
 0x1f0   :  { %1108 = vmatmul.mubr.f32.gmra.mrb[80].mxu1 %v795_v49  ;;  %v801_v49 = vmul.f32 %v6108_v55, %v6108_v55 }
 0x1f1   :  { %1112 = vmatprep.mubr.f32.mxu1 %v798_v18  ;;  %v804_v18 = vmul.f32 %v6112_v38, %v6112_v38  ;;  %v5143_v38 = vld [vmem:[#allocation7 + $0x80] ss:$8 sps:$4 sm:$0xff]  }
 0x1f4   :  { %1113 = vmatmul.mubr.f32.gmra.mrb[82].mxu1 %v797_v21  ;;  %v803_v21 = vmul.f32 %v6115_v39, %v6115_v39 }
 0x1f5   :  { %1117 = vmatprep.mubr.f32.mxu1 %v800_v48  ;;  %v806_v48 = vmul.f32 %v6118_v40, %v6118_v40 }
 0x1f8   :  { %1118 = vmatmul.mubr.f32.gmra.mrb[84].mxu1 %v799_v9  ;;  %v805_v9 = vmul.f32 %v6124_v60, %v6124_v60 }
 0x1f9   :  { %1122 = vmatprep.mubr.f32.mxu1 %v802_v0  ;;  %v808_v0 = vmul.f32 %v6128_v45, %v6128_v45  ;;  %v5140_v45 = vld [vmem:[#allocation7 + $0x70] ss:$8 sps:$4 sm:$0xff]  }
 0x1fc   :  { %1123 = vmatmul.mubr.f32.gmra.mrb[86].mxu1 %v801_v49  ;;  %v807_v49 = vmul.f32 %v6131_v36, %v6131_v36 }
 0x1fd   :  { %1127 = vmatprep.mubr.f32.mxu1 %v804_v18  ;;  %v810_v18 = vmul.f32 %v6134_v35, %v6134_v35 }
 0x200   :  { %1128 = vmatmul.mubr.f32.gmra.mrb[88].mxu1 %v803_v21  ;;  %v809_v21 = vmul.f32 %v6140_v32, %v6140_v32 }
 0x201   :  { %1132 = vmatprep.mubr.f32.mxu1 %v806_v48  ;;  %v812_v48 = vmul.f32 %v6144_v44, %v6144_v44  ;;  %v5137_v44 = vld [vmem:[#allocation7 + $0x60] ss:$8 sps:$4 sm:$0xff]  }
 0x204   :  { %1133 = vmatmul.mubr.f32.gmra.mrb[90].mxu1 %v805_v9  ;;  %v811_v9 = vmul.f32 %v6147_v31, %v6147_v31 }
 0x205   :  { %1137 = vmatprep.mubr.f32.mxu1 %v808_v0  ;;  %v814_v0 = vmul.f32 %v6150_v19, %v6150_v19  ;;  %v5121_v19 = vld [vmem:[#allocation7 + $0x4] ss:$8 sps:$4 sm:$0xff]  }
 0x206   :  { %2672 = vmatprep.subr.bf16.mxu1 %v5121_v19 }
 0x208   :  { %1138 = vmatmul.mubr.f32.gmra.mrb[92].mxu1 %v807_v49  ;;  %v813_v49 = vmul.f32 %v6156_v46, %v6156_v46  ;;  %v820_v46 = vmul.f32 %v6176_v3, %v6176_v3  ;;  %v8705_v3 = vld [vmem:[#allocation22_spill] sm:$0xff] }
 0x209   :  { %1142 = vmatprep.mubr.f32.mxu1 %v810_v18  ;;  %v816_v18 = vmul.f32 %v6160_v22, %v6160_v22 }
 0x20c   :  { %1143 = vmatmul.mubr.f32.gmra.mrb[94].mxu1 %v809_v21  ;;  %v815_v21 = vmul.f32 %v6163_v13, %v6163_v13 }
 0x20d   :  { %1147 = vmatprep.mubr.f32.mxu1 %v812_v48  ;;  %v818_v48 = vmul.f32 %v6166_v54, %v6166_v54  ;;  %v824_v54 = vmul.f32 %v6192_v47, %v6192_v47  ;;  %v8677_v47 = vld [vmem:[#allocation81_spill] sm:$0xff] }
 0x20e   :  { %v830_v53 = vmul.f32 %v8677_v47, %v8677_v47  ;;  %v8683_v47 = vld [vmem:[#allocation82_spill] sm:$0xff] }
 0x210   :  { %1148 = vmatmul.mubr.f32.gmra.mrb[96].mxu1 %v811_v9  ;;  %v817_v9 = vmul.f32 %v6172_v24, %v6172_v24 }
 0x211   :  { %1152 = vmatprep.mubr.f32.mxu1 %v814_v0  ;;  %v5119_v0 = vld [vmem:[#allocation7] ss:$8 sps:$4 sm:$0xff]  }
 0x212   :  { %2673 = vmatpush1.bf16.msra.mxu1 %v5119_v0 }
 0x214   :  { %1153 = vmatmul.mubr.f32.gmra.mrb[98].mxu1 %v813_v49  ;;  %v819_v49 = vmul.f32 %v6179_v52, %v6179_v52 }
 0x215   :  { %1157 = vmatprep.mubr.f32.mxu1 %v816_v18  ;;  %v822_v18 = vmul.f32 %v6182_v37, %v6182_v37  ;;  %v8668_v37 = vmov 1.0|1.0  }
 0x218   :  { %1158 = vmatmul.mubr.f32.gmra.mrb[100].mxu1 %v815_v21  ;;  %v821_v21 = vmul.f32 %v6188_v7, %v6188_v7 }
 0x219   :  { %1162 = vmatprep.mubr.f32.mxu1 %v818_v48 }
 0x21c   :  { %1163 = vmatmul.mubr.f32.gmra.mrb[102].mxu1 %v817_v9 }
 0x21d   :  { %1167 = vmatprep.mubr.f32.mxu1 %v820_v46  ;;  %v823_v46 = vmul.f32 %v6196_v33, %v6196_v33  ;;  %v5124_v33 = vld [vmem:[#allocation7 + $0x14] ss:$8 sps:$4 sm:$0xff]  }
 0x21e   :  { %2674 = vmatprep.subr.bf16.mxu1 %v5124_v33  ;;  %v8690_v33 = vld [vmem:[#allocation84_spill] sm:$0xff] }
 0x220   :  { %1168 = vmatmul.mubr.f32.gmra.mrb[104].mxu1 %v819_v49  ;;  %v826_v49 = vmul.f32 %v6199_v16, %v6199_v16 }
 0x221   :  { %1172 = vmatprep.mubr.f32.mxu1 %v822_v18  ;;  %v8667_v18 = vmov 0.0  }
 0x223   :  { %v909_v48 = vpop.f32.mrb[0].mxu1 }
 0x224   :  { %v6362_v9 = vmul.f32 0.03125, %v909_v48  ;;  %v911_v19 = vpop.f32.mrb[1].mxu1  ;;  %1173 = vmatmul.mubr.f32.gmra.mrb[106].mxu1 %v821_v21  ;;  %v8670_v48 = vmov 0.0|0.0  }
 0x225   :  { %1177 = vmatprep.mubr.f32.mxu1 %v824_v54  ;;  %v825_v19 = vmul.f32 %v6205_v50, %v6205_v50 }
 0x226   :  { %4769 = vmatmul.mubr.msk.f32.vlgmr.msra.gmra.mrb[64].mxu0 %vm1452_vm5, %v6362_v9 }
 0x227   :  { %v914_v0 = vpop.f32.mrb[2].mxu1  ;;  %1715 = vmatprep.mubr.f32.mxu0 %v8667_v18  ;;  %5013 = vmatpush1.bf16.msk.msra.mxu0 %vm8669_vm3, %v8668_v37 }
 0x228   :  { %v6377_v54 = vmul.f32 0.03125, %v914_v0  ;;  %v916_v21 = vpop.f32.mrb[3].mxu1  ;;  %1178 = vmatmul.mubr.f32.gmra.mrb[108].mxu1 %v823_v46  ;;  %5014 = vmatprep.subr.bf16.mxu0 %v8670_v48  ;;  %v8673_v0 = vld [vmem:[#allocation12_spill] sm:$0xff] }
 0x229   :  { %1182 = vmatprep.mubr.f32.mxu1 %v826_v49  ;;  %vm8674_vm7 = vnez %v8673_v0  ;;  %v8676_v21 = vld [vmem:[#allocation80_spill] sm:$0xff]  ;;  %v8680_v0 = vld [vmem:[#allocation14_spill] sm:$0xff] }
 0x22a   :  { %4770 = vmatmul.mubr.msk.f32.gmra.mrb[66].mxu0 %vm1452_vm5, %v6377_v54  ;;  %vm8675_vm1 = vmpackc.low %vm8672_vm4, %vm8674_vm7  ;;  %v827_v27 = vmul.f32 %v8676_v21, %v8676_v21  ;;  %vm8681_vm3 = vnez %v8680_v0  ;;  %v829_v21 = vmul.f32 %v8683_v47, %v8683_v47  ;;  %v8684_v0 = vld [vmem:[#allocation83_spill] sm:$0xff] }
 0x22b   :  { %v919_v16 = vpop.f32.mrb[4].mxu1  ;;  %1721 = vmatprep.mubr.f32.mxu0 %v8667_v18  ;;  %5016 = vmatpush1.bf16.msk.msra.mxu0 %vm8675_vm1, %v8668_v37  ;;  %v832_v7 = vmul.f32 %v8684_v0, %v8684_v0  ;;  %v8691_v0 = vld [vmem:[#allocation85_spill] sm:$0xff]  ;;  %v8698_v47 = vld [vmem:[#allocation87_spill] sm:$0xff] }
 0x22c   :  { %v6393_v46 = vmul.f32 0.03125, %v919_v16  ;;  %v921_v49 = vpop.f32.mrb[5].mxu1  ;;  %1183 = vmatmul.mubr.f32.gmra.mrb[110].mxu1 %v825_v19  ;;  %5017 = vmatprep.subr.bf16.mxu0 %v8670_v48  ;;  %v8678_v16 = vld [vmem:[#allocation15_spill] sm:$0xff] }
 0x22d   :  { %1187 = vmatprep.mubr.f32.mxu1 %v828_v57  ;;  %vm8679_vm13 = vnez %v8678_v16  ;;  %v5122_v49 = vld [vmem:[#allocation7 + $0x10] ss:$8 sps:$4 sm:$0xff]  }
 0x22e   :  { %4771 = vmatmul.mubr.msk.f32.gmra.mrb[68].mxu0 %vm1452_vm5, %v6393_v46  ;;  %vm8682_vm4 = vmpackc.low %vm8679_vm13, %vm8681_vm3  ;;  %2675 = vmatpush1.bf16.msra.mxu1 %v5122_v49  ;;  %v831_v49 = vmul.f32 %v8690_v33, %v8690_v33 }
 0x22f   :  { %v924_v50 = vpop.f32.mrb[6].mxu1  ;;  %1727 = vmatprep.mubr.f32.mxu0 %v8667_v18  ;;  %5019 = vmatpush1.bf16.msk.msra.mxu0 %vm8682_vm4, %v8668_v37 }
 0x230   :  { %v6409_v19 = vmul.f32 0.03125, %v924_v50  ;;  %v926_v57 = vpop.f32.mrb[7].mxu1  ;;  %1188 = vmatmul.mubr.f32.gmra.mrb[112].mxu1 %v827_v27  ;;  %5020 = vmatprep.subr.bf16.mxu0 %v8670_v48 }
 0x231   :  { %1192 = vmatprep.mubr.f32.mxu1 %v830_v53  ;;  %v8685_v53 = vld [vmem:[#allocation17_spill] sm:$0xff]  ;;  %v8687_v57 = vld [vmem:[#allocation16_spill] sm:$0xff] }
 0x232   :  { %4772 = vmatmul.mubr.msk.f32.gmra.mrb[70].mxu0 %vm1452_vm5, %v6409_v19  ;;  %vm8686_vm7 = vnez %v8685_v53  ;;  %vm8688_vm1 = vnez %v8687_v57  ;;  %v8694_v57 = vld [vmem:[#allocation18_spill] sm:$0xff] }
 0x233   :  { %v929_v16 = vpop.f32.mrb[8].mxu1  ;;  %1733 = vmatprep.mubr.f32.mxu0 %v8667_v18  ;;  %vm8689_vm13 = vmpackc.low %vm8686_vm7, %vm8688_vm1  ;;  %vm8695_vm4 = vnez %v8694_v57  ;;  %v8701_v57 = vld [vmem:[#allocation20_spill] sm:$0xff] }
 0x234   :  { %v6419_v50 = vmul.f32 0.03125, %v929_v16  ;;  %v931_v27 = vpop.f32.mrb[9].mxu1  ;;  %1193 = vmatmul.mubr.f32.gmra.mrb[114].mxu1 %v829_v21  ;;  %5022 = vmatpush1.bf16.msk.msra.mxu0 %vm8689_vm13, %v8668_v37  ;;  %v834_v21 = vmul.f32 %v8691_v0, %v8691_v0  ;;  %v8697_v0 = vld [vmem:[#allocation86_spill] sm:$0xff]  ;;  %vm8702_vm13 = vnez %v8701_v57  ;;  %v5125_v57 = vld [vmem:[#allocation7 + $0x20] ss:$8 sps:$4 sm:$0xff]  }
 0x235   :  { %1197 = vmatprep.mubr.f32.mxu1 %v832_v7  ;;  %5023 = vmatprep.subr.bf16.mxu0 %v8670_v48  ;;  %v8692_v7 = vld [vmem:[#allocation19_spill] sm:$0xff]  ;;  %v833_v33 = vmul.f32 %v8697_v0, %v8697_v0 }
 0x236   :  { %4773 = vmatmul.mubr.msk.f32.gmra.mrb[72].mxu0 %vm1452_vm5, %v6419_v50  ;;  %vm8693_vm3 = vnez %v8692_v7 }
 0x237   :  { %v934_v16 = vpop.f32.mrb[10].mxu1  ;;  %1739 = vmatprep.mubr.f32.mxu0 %v8667_v18  ;;  %vm8696_vm7 = vmpackc.low %vm8693_vm3, %vm8695_vm4  ;;  %vm8706_vm4 = vnez %v8705_v3 }
 0x238   :  { %v6435_v27 = vmul.f32 0.03125, %v934_v16  ;;  %v936_v53 = vpop.f32.mrb[11].mxu1  ;;  %1198 = vmatmul.mubr.f32.gmra.mrb[116].mxu1 %v831_v49  ;;  %5025 = vmatpush1.bf16.msk.msra.mxu0 %vm8696_vm7, %v8668_v37  ;;  %v836_v49 = vmul.f32 %v8698_v47, %v8698_v47  ;;  %v835_v47 = vmul.f32 %v6244_v61, %v6244_v61  ;;  %vm8707_vm7 = vmpackc.low %vm5728_vm11, %vm8706_vm4  ;;  %v8743_v61 = vld [vmem:[#allocation40_spill] sm:$0xff] }
 0x239   :  { %1202 = vmatprep.mubr.f32.mxu1 %v834_v21  ;;  %5026 = vmatprep.subr.bf16.mxu0 %v8670_v48  ;;  %v8699_v21 = vld [vmem:[#allocation21_spill] sm:$0xff] }
 0x23a   :  { %4774 = vmatmul.mubr.msk.f32.gmra.mrb[74].mxu0 %vm1452_vm5, %v6435_v27  ;;  %vm8700_vm1 = vnez %v8699_v21 }
 0x23b   :  { %v939_v16 = vpop.f32.mrb[12].mxu1  ;;  %1745 = vmatprep.mubr.f32.mxu0 %v8667_v18  ;;  %vm8703_vm3 = vmpackc.low %vm8700_vm1, %vm8702_vm13 }
 0x23c   :  { %v6451_v53 = vmul.f32 0.03125, %v939_v16  ;;  %v941_v7 = vpop.f32.mrb[13].mxu1  ;;  %1203 = vmatmul.mubr.f32.gmra.mrb[118].mxu1 %v833_v33  ;;  %5028 = vmatpush1.bf16.msk.msra.mxu0 %vm8703_vm3, %v8668_v37  ;;  %v838_v33 = vmul.f32 %v6247_v26, %v6247_v26  ;;  %v8710_v26 = vld [vmem:[#allocation24_spill] sm:$0xff] }
 0x23d   :  { %1207 = vmatprep.mubr.f32.mxu1 %v836_v49  ;;  %5029 = vmatprep.subr.bf16.mxu0 %v8670_v48  ;;  %v5127_v49 = vld [vmem:[#allocation7 + $0x24] ss:$8 sps:$4 sm:$0xff]   ;;  %vm8711_vm1 = vnez %v8710_v26 }
 0x23e   :  { %4775 = vmatmul.mubr.msk.f32.gmra.mrb[76].mxu0 %vm1452_vm5, %v6451_v53  ;;  %2676 = vmatprep.subr.bf16.mxu1 %v5127_v49 }
 0x23f   :  { %v944_v16 = vpop.f32.mrb[14].mxu1  ;;  %1751 = vmatprep.mubr.f32.mxu0 %v8667_v18  ;;  %2677 = vmatpush1.bf16.msra.mxu1 %v5125_v57  ;;  %v839_v57 = vmul.f32 %v6260_v25, %v6260_v25 }
 0x240   :  { %v6467_v7 = vmul.f32 0.03125, %v944_v16  ;;  %v946_v21 = vpop.f32.mrb[15].mxu1  ;;  %1208 = vmatmul.mubr.f32.gmra.mrb[120].mxu1 %v835_v47  ;;  %5031 = vmatpush1.bf16.msk.msra.mxu0 %vm8707_vm7, %v8668_v37  ;;  %v837_v16 = vmul.f32 %v6253_v4, %v6253_v4  ;;  %v5131_v4 = vld [vmem:[#allocation7 + $0x40] ss:$8 sps:$4 sm:$0xff]  }
 0x241   :  { %1212 = vmatprep.mubr.f32.mxu1 %v838_v33  ;;  %5032 = vmatprep.subr.bf16.mxu0 %v8670_v48  ;;  %v840_v21 = vmul.f32 %v6257_v29, %v6257_v29  ;;  %v8708_v33 = vld [vmem:[#allocation25_spill] sm:$0xff] }
 0x242   :  { %4776 = vmatmul.mubr.msk.f32.gmra.mrb[78].mxu0 %vm1452_vm5, %v6467_v7  ;;  %vm8709_vm11 = vnez %v8708_v33  ;;  %v841_v33 = vmul.f32 %v6269_v11, %v6269_v11  ;;  %v8727_v29 = vld [vmem:[#allocation33_spill] sm:$0xff]  ;;  %v8729_v11 = vld [vmem:[#allocation32_spill] sm:$0xff] }
 0x243   :  { %v949_v47 = vpop.f32.mrb[16].mxu1  ;;  %1757 = vmatprep.mubr.f32.mxu0 %v8667_v18  ;;  %vm8712_vm13 = vmpackc.low %vm8709_vm11, %vm8711_vm1 }
 0x244   :  { %v6483_v3 = vmul.f32 0.03125, %v949_v47  ;;  %v951_v0 = vpop.f32.mrb[17].mxu1  ;;  %1213 = vmatmul.mubr.f32.gmra.mrb[122].mxu1 %v837_v16  ;;  %5034 = vmatpush1.bf16.msk.msra.mxu0 %vm8712_vm13, %v8668_v37  ;;  %v842_v16 = vmul.f32 %v6263_v2, %v6263_v2 }
 0x245   :  { %1217 = vmatprep.mubr.f32.mxu1 %v840_v21  ;;  %5035 = vmatprep.subr.bf16.mxu0 %v8670_v48  ;;  %v8713_v21 = vld [vmem:[#allocation27_spill] sm:$0xff]  ;;  %v8715_v0 = vld [vmem:[#allocation26_spill] sm:$0xff] }
 0x246   :  { %4777 = vmatmul.mubr.msk.f32.gmra.mrb[80].mxu0 %vm1452_vm5, %v6483_v3  ;;  %vm8714_vm3 = vnez %v8713_v21  ;;  %vm8716_vm4 = vnez %v8715_v0  ;;  %v8718_v21 = vld [vmem:[#allocation29_spill] sm:$0xff]  ;;  %v8720_v0 = vld [vmem:[#allocation28_spill] sm:$0xff] }
 0x247   :  { %v954_v49 = vpop.f32.mrb[18].mxu1  ;;  %1763 = vmatprep.mubr.f32.mxu0 %v8667_v18  ;;  %vm8717_vm7 = vmpackc.low %vm8714_vm3, %vm8716_vm4  ;;  %vm8719_vm11 = vnez %v8718_v21  ;;  %vm8721_vm1 = vnez %v8720_v0  ;;  %v8724_v21 = vld [vmem:[#allocation30_spill] sm:$0xff] }
 0x248   :  { %v6499_v47 = vmul.f32 0.03125, %v954_v49  ;;  %v956_v26 = vpop.f32.mrb[19].mxu1  ;;  %1218 = vmatmul.mubr.f32.gmra.mrb[124].mxu1 %v839_v57  ;;  %5037 = vmatpush1.bf16.msk.msra.mxu0 %vm8717_vm7, %v8668_v37  ;;  %vm8722_vm13 = vmpackc.low %vm8719_vm11, %vm8721_vm1  ;;  %vm8725_vm3 = vnez %v8724_v21  ;;  %vm8728_vm7 = vnez %v8727_v29  ;;  %vm8730_vm11 = vnez %v8729_v11 }
 0x249   :  { %1222 = vmatprep.mubr.f32.mxu1 %v842_v16  ;;  %5038 = vmatprep.subr.bf16.mxu0 %v8670_v48  ;;  %vm8726_vm4 = vmpackc.low %vm5834_vm0, %vm8725_vm3 }
 0x24a   :  { %4778 = vmatmul.mubr.msk.f32.gmra.mrb[82].mxu0 %vm1452_vm5, %v6499_v47  ;;  %vm8731_vm0 = vmpackc.low %vm8728_vm7, %vm8730_vm11 }
 0x24b   :  { %v959_v49 = vpop.f32.mrb[20].mxu1  ;;  %1769 = vmatprep.mubr.f32.mxu0 %v8667_v18  ;;  %vm8734_vm1 = vmpackc.low %vm5882_vm6, %vm5872_vm9 }
 0x24c   :  { %v6513_v57 = vmul.f32 0.03125, %v959_v49  ;;  %v961_v26 = vpop.f32.mrb[21].mxu1  ;;  %1223 = vmatmul.mubr.f32.gmra.mrb[126].mxu1 %v841_v33  ;;  %5040 = vmatpush1.bf16.msk.msra.mxu0 %vm8722_vm13, %v8668_v37  ;;  %v5130_v33 = vld [vmem:[#allocation7 + $0x34] ss:$8 sps:$4 sm:$0xff]   ;;  %vm8737_vm13 = vmpackc.low %vm5912_vm8, %vm5907_vm14  ;;  %vm8744_vm8 = vnez %v8743_v61 }
 0x24d   :  { %5041 = vmatprep.subr.bf16.mxu0 %v8670_v48  ;;  %v5128_v26 = vld [vmem:[#allocation7 + $0x30] ss:$8 sps:$4 sm:$0xff]   ;;  %2678 = vmatprep.subr.bf16.mxu1 %v5130_v33 }
 0x24e   :  { %4779 = vmatmul.mubr.msk.f32.gmra.mrb[84].mxu0 %vm1452_vm5, %v6513_v57  ;;  %2679 = vmatpush1.bf16.msra.mxu1 %v5128_v26 }
 0x24f   :  { %v964_v16 = vpop.f32.mrb[22].mxu1  ;;  %1775 = vmatprep.mubr.f32.mxu0 %v8667_v18 }
 0x250   :  { %v6525_v2 = vmul.f32 0.03125, %v964_v16  ;;  %v966_v49 = vpop.f32.mrb[23].mxu1  ;;  %5043 = vmatpush1.bf16.msk.msra.mxu0 %vm8726_vm4, %v8668_v37 }
 0x251   :  { %5044 = vmatprep.subr.bf16.mxu0 %v8670_v48 }
 0x252   :  { %4780 = vmatmul.mubr.msk.f32.gmra.mrb[86].mxu0 %vm1452_vm5, %v6525_v2 }
 0x253   :  { %v969_v0 = vpop.f32.mrb[24].mxu1  ;;  %1781 = vmatprep.mubr.f32.mxu0 %v8667_v18 }
 0x254   :  { %v6537_v16 = vmul.f32 0.03125, %v969_v0  ;;  %v971_v49 = vpop.f32.mrb[25].mxu1  ;;  %5046 = vmatpush1.bf16.msk.msra.mxu0 %vm8731_vm0, %v8668_v37 }
 0x255   :  { %5047 = vmatprep.subr.bf16.mxu0 %v8670_v48 }
 0x256   :  { %4781 = vmatmul.mubr.msk.f32.gmra.mrb[88].mxu0 %vm1452_vm5, %v6537_v16 }
 0x257   :  { %v974_v33 = vpop.f32.mrb[26].mxu1  ;;  %1787 = vmatprep.mubr.f32.mxu0 %v8667_v18 }
 0x258   :  { %v6549_v21 = vmul.f32 0.03125, %v974_v33  ;;  %v976_v26 = vpop.f32.mrb[27].mxu1  ;;  %5049 = vmatpush1.bf16.msk.msra.mxu0 %vm8734_vm1, %v8668_v37 }
 0x259   :  { %5050 = vmatprep.subr.bf16.mxu0 %v8670_v48  ;;  %v8739_v26 = vld [vmem:[#allocation38_spill] sm:$0xff] }
 0x25a   :  { %4782 = vmatmul.mubr.msk.f32.gmra.mrb[90].mxu0 %vm1452_vm5, %v6549_v21  ;;  %vm8740_vm6 = vnez %v8739_v26 }
 0x25b   :  { %v979_v29 = vpop.f32.mrb[28].mxu1  ;;  %1793 = vmatprep.mubr.f32.mxu0 %v8667_v18  ;;  %vm8741_vm9 = vmpackc.low %vm5935_vm12, %vm8740_vm6 }
 0x25c   :  { %v6561_v11 = vmul.f32 0.03125, %v979_v29  ;;  %v981_v33 = vpop.f32.mrb[29].mxu1  ;;  %5052 = vmatpush1.bf16.msk.msra.mxu0 %vm8737_vm13, %v8668_v37  ;;  %vm8745_vm12 = vmpackc.low %vm5967_vm15, %vm8744_vm8 }
 0x25d   :  { %5053 = vmatprep.subr.bf16.mxu0 %v8670_v48  ;;  %v5133_v33 = vld [vmem:[#allocation7 + $0x44] ss:$8 sps:$4 sm:$0xff]  }
 0x25e   :  { %4783 = vmatmul.mubr.msk.f32.gmra.mrb[92].mxu0 %vm1452_vm5, %v6561_v11  ;;  %2680 = vmatprep.subr.bf16.mxu1 %v5133_v33 }
 0x25f   :  { %v984_v0 = vpop.f32.mrb[30].mxu1  ;;  %1799 = vmatprep.mubr.f32.mxu0 %v8667_v18  ;;  %2681 = vmatpush1.bf16.msra.mxu1 %v5131_v4 }
 0x260   :  { %v6573_v49 = vmul.f32 0.03125, %v984_v0  ;;  %v986_v29 = vpop.f32.mrb[31].mxu1  ;;  %5055 = vmatpush1.bf16.msk.msra.mxu0 %vm8741_vm9, %v8668_v37 }
 0x261   :  { %5056 = vmatprep.subr.bf16.mxu0 %v8670_v48 }
 0x262   :  { %4784 = vmatmul.mubr.msk.f32.gmra.mrb[94].mxu0 %vm1452_vm5, %v6573_v49 }
 0x263   :  { %v989_v25 = vpop.f32.mrb[32].mxu1  ;;  %1805 = vmatprep.mubr.f32.mxu0 %v8667_v18 }
 0x264   :  { %v6585_v0 = vmul.f32 0.03125, %v989_v25  ;;  %v991_v29 = vpop.f32.mrb[33].mxu1  ;;  %5058 = vmatpush1.bf16.msk.msra.mxu0 %vm8745_vm12, %v8668_v37 }
 0x266   :  { %4785 = vmatmul.mubr.msk.f32.gmra.mrb[96].mxu0 %vm1452_vm5, %v6585_v0 }
 0x267   :  { %v994_v48 = vpop.f32.mrb[34].mxu1  ;;  %1811 = vmatprep.mubr.f32.mxu0 %v8667_v18 }
 0x268   :  { %v6596_v33 = vmul.f32 0.03125, %v994_v48  ;;  %v996_v26 = vpop.f32.mrb[35].mxu1  ;;  %v5134_v48 = vld [vmem:[#allocation7 + $0x50] ss:$8 sps:$4 sm:$0xff]  }
 0x269   :  { %v5136_v26 = vld [vmem:[#allocation7 + $0x54] ss:$8 sps:$4 sm:$0xff]  }
 0x26a   :  { %4786 = vmatmul.mubr.msk.f32.gmra.mrb[98].mxu0 %vm1452_vm5, %v6596_v33  ;;  %2682 = vmatprep.subr.bf16.mxu1 %v5136_v26 }
 0x26b   :  { %v999_v4 = vpop.f32.mrb[36].mxu1  ;;  %1817 = vmatprep.mubr.f32.mxu0 %v8667_v18  ;;  %2683 = vmatpush1.bf16.msra.mxu1 %v5134_v48 }
 0x26c   :  { %v6601_v52 = vmul.f32 0.03125, %v999_v4  ;;  %v1001_v25 = vpop.f32.mrb[37].mxu1 }
 0x26e   :  { %4787 = vmatmul.mubr.msk.f32.gmra.mrb[100].mxu0 %vm1452_vm5, %v6601_v52 }
 0x26f   :  { %v1004_v37 = vpop.f32.mrb[38].mxu1  ;;  %1823 = vmatprep.mubr.f32.mxu0 %v8667_v18 }
 0x270   :  { %v6606_v29 = vmul.f32 0.03125, %v1004_v37  ;;  %v1006_v61 = vpop.f32.mrb[39].mxu1 }
 0x272   :  { %4788 = vmatmul.mubr.msk.f32.gmra.mrb[102].mxu0 %vm1452_vm5, %v6606_v29 }
 0x273   :  { %v1009_v24 = vpop.f32.mrb[40].mxu1  ;;  %1829 = vmatprep.mubr.f32.mxu0 %v8667_v18 }
 0x274   :  { %v6611_v4 = vmul.f32 0.03125, %v1009_v24  ;;  %v1011_v25 = vpop.f32.mrb[41].mxu1 }
 0x276   :  { %4789 = vmatmul.mubr.msk.f32.gmra.mrb[104].mxu0 %vm1452_vm5, %v6611_v4 }
 0x277   :  { %v1014_v22 = vpop.f32.mrb[42].mxu1  ;;  %1835 = vmatprep.mubr.f32.mxu0 %v8667_v18 }
 0x278   :  { %v6616_v37 = vmul.f32 0.03125, %v1014_v22  ;;  %v1016_v61 = vpop.f32.mrb[43].mxu1 }
 0x279   :  { %v5139_v61 = vld [vmem:[#allocation7 + $0x64] ss:$8 sps:$4 sm:$0xff]  }
 0x27a   :  { %4790 = vmatmul.mubr.msk.f32.gmra.mrb[106].mxu0 %vm1452_vm5, %v6616_v37  ;;  %2684 = vmatprep.subr.bf16.mxu1 %v5139_v61 }
 0x27b   :  { %v1019_v26 = vpop.f32.mrb[44].mxu1  ;;  %1841 = vmatprep.mubr.f32.mxu0 %v8667_v18  ;;  %2685 = vmatpush1.bf16.msra.mxu1 %v5137_v44 }
 0x27c   :  { %v6621_v13 = vmul.f32 0.03125, %v1019_v26  ;;  %v1021_v24 = vpop.f32.mrb[45].mxu1 }
 0x27e   :  { %4791 = vmatmul.mubr.msk.f32.gmra.mrb[108].mxu0 %vm1452_vm5, %v6621_v13 }
 0x27f   :  { %v1024_v48 = vpop.f32.mrb[46].mxu1  ;;  %1847 = vmatprep.mubr.f32.mxu0 %v8667_v18 }
 0x280   :  { %v6626_v25 = vmul.f32 0.03125, %v1024_v48  ;;  %v1026_v22 = vpop.f32.mrb[47].mxu1 }
 0x282   :  { %4792 = vmatmul.mubr.msk.f32.gmra.mrb[110].mxu0 %vm1452_vm5, %v6626_v25 }
 0x283   :  { %v1029_v31 = vpop.f32.mrb[48].mxu1  ;;  %1853 = vmatprep.mubr.f32.mxu0 %v8667_v18 }
 0x284   :  { %v6631_v26 = vmul.f32 0.03125, %v1029_v31  ;;  %v1031_v24 = vpop.f32.mrb[49].mxu1 }
 0x286   :  { %4793 = vmatmul.mubr.msk.f32.gmra.mrb[112].mxu0 %vm1452_vm5, %v6631_v26 }
 0x287   :  { %v1034_v35 = vpop.f32.mrb[50].mxu1  ;;  %1859 = vmatprep.mubr.f32.mxu0 %v8667_v18 }
 0x288   :  { %v6636_v48 = vmul.f32 0.03125, %v1034_v35  ;;  %v1036_v22 = vpop.f32.mrb[51].mxu1 }
 0x289   :  { %v5142_v22 = vld [vmem:[#allocation7 + $0x74] ss:$8 sps:$4 sm:$0xff]  }
 0x28a   :  { %4794 = vmatmul.mubr.msk.f32.gmra.mrb[114].mxu0 %vm1452_vm5, %v6636_v48  ;;  %2686 = vmatprep.subr.bf16.mxu1 %v5142_v22 }
 0x28b   :  { %v1039_v61 = vpop.f32.mrb[52].mxu1  ;;  %1865 = vmatprep.mubr.f32.mxu0 %v8667_v18  ;;  %2687 = vmatpush1.bf16.msra.mxu1 %v5140_v45 }
 0x28c   :  { %v6641_v32 = vmul.f32 0.03125, %v1039_v61  ;;  %v1041_v44 = vpop.f32.mrb[53].mxu1 }
 0x28e   :  { %4795 = vmatmul.mubr.msk.f32.gmra.mrb[116].mxu0 %vm1452_vm5, %v6641_v32 }
 0x28f   :  { %v1044_v31 = vpop.f32.mrb[54].mxu1  ;;  %1871 = vmatprep.mubr.f32.mxu0 %v8667_v18 }
 0x290   :  { %v6646_v24 = vmul.f32 0.03125, %v1044_v31  ;;  %v1046_v35 = vpop.f32.mrb[55].mxu1 }
 0x292   :  { %4796 = vmatmul.mubr.msk.f32.gmra.mrb[118].mxu0 %vm1452_vm5, %v6646_v24 }
 0x293   :  { %v1049_v36 = vpop.f32.mrb[56].mxu1  ;;  %1877 = vmatprep.mubr.f32.mxu0 %v8667_v18 }
 0x294   :  { %v6651_v61 = vmul.f32 0.03125, %v1049_v36  ;;  %v1051_v44 = vpop.f32.mrb[57].mxu1 }
 0x296   :  { %4797 = vmatmul.mubr.msk.f32.gmra.mrb[120].mxu0 %vm1452_vm5, %v6651_v61 }
 0x297   :  { %v1054_v40 = vpop.f32.mrb[58].mxu1  ;;  %1883 = vmatprep.mubr.f32.mxu0 %v8667_v18 }
 0x298   :  { %v6656_v31 = vmul.f32 0.03125, %v1054_v40  ;;  %v1056_v35 = vpop.f32.mrb[59].mxu1 }
 0x299   :  { %v5145_v35 = vld [vmem:[#allocation7 + $0x84] ss:$8 sps:$4 sm:$0xff]  }
 0x29a   :  { %4798 = vmatmul.mubr.msk.f32.gmra.mrb[122].mxu0 %vm1452_vm5, %v6656_v31  ;;  %2688 = vmatprep.subr.bf16.mxu1 %v5145_v35 }
 0x29b   :  { %v1059_v22 = vpop.f32.mrb[60].mxu1  ;;  %1889 = vmatprep.mubr.f32.mxu0 %v8667_v18  ;;  %2689 = vmatpush1.bf16.msra.mxu1 %v5143_v38 }
 0x29c   :  { %v6661_v60 = vmul.f32 0.03125, %v1059_v22  ;;  %v1061_v45 = vpop.f32.mrb[61].mxu1  ;;  %2690 = vmatprep.subr.bf16.mxu1 %v5148_v12  ;;  %v1296_v12 = vmul.f32 %v6419_v50, %v6419_v50 }
 0x29d   :  { %v1292_v45 = vmul.f32 %v6362_v9, %v6362_v9  ;;  %v1294_v9 = vmul.f32 %v6393_v46, %v6393_v46 }
 0x29e   :  { %4799 = vmatmul.mubr.msk.f32.gmra.mrb[124].mxu0 %vm1452_vm5, %v6661_v60 }
 0x29f   :  { %v1064_v36 = vpop.f32.mrb[62].mxu1  ;;  %1895 = vmatprep.mubr.f32.mxu0 %v8667_v18  ;;  %2691 = vmatpush1.bf16.msra.mxu1 %v5146_v58 }
 0x2a0   :  { %v6666_v44 = vmul.f32 0.03125, %v1064_v36  ;;  %v1066_v40 = vpop.f32.mrb[63].mxu1 }
 0x2a1   :  { %v1293_v40 = vmul.f32 %v6377_v54, %v6377_v54 }
 0x2a2   :  { %4800 = vmatmul.mubr.msk.f32.gmra.mrb[126].mxu0 %vm1452_vm5, %v6666_v44 }
 0x2a3   :  { %v1069_v39 = vpop.f32.mrb[64].mxu1  ;;  %1901 = vmatprep.mubr.f32.mxu0 %v8667_v18 }
 0x2a4   :  { %v1260_v22 = vmul.f32 0.03125, %v1069_v39  ;;  %v1071_v42 = vpop.f32.mrb[65].mxu1 }
 0x2a6   :  { %v1324_v55 = vsub.f32 %v1260_v22, %v1292_v45 }
 0x2a7   :  { %v1074_v20 = vpop.f32.mrb[66].mxu1 }
 0x2a8   :  { %v1356_v36 = vmax.f32 %v1324_v55, 0.0  ;;  %v1261_v8 = vmul.f32 0.03125, %v1074_v20  ;;  %v1076_v34 = vpop.f32.mrb[67].mxu1 }
 0x2aa   :  { %v1388_v1 = vadd.f32 1e-05, %v1356_v36  ;;  %v1325_v30 = vsub.f32 %v1261_v8, %v1293_v40  ;;  %v1295_v8 = vmul.f32 %v6409_v19, %v6409_v19 }
 0x2ab   :  { %v1079_v35 = vpop.f32.mrb[68].mxu1 }
 0x2ac   :  { %5167 = vrsqrt.f32 %v1388_v1  ;;  %v1357_v38 = vmax.f32 %v1325_v30, 0.0  ;;  %v1262_v39 = vmul.f32 0.03125, %v1079_v35  ;;  %v1081_v42 = vpop.f32.mrb[69].mxu1 }
 0x2ae   :  { %v1389_v22 = vadd.f32 1e-05, %v1357_v38  ;;  %v1326_v55 = vsub.f32 %v1262_v39, %v1294_v9 }
 0x2af   :  { %v1084_v20 = vpop.f32.mrb[70].mxu1 }
 0x2b0   :  { %5169 = vrsqrt.f32 %v1389_v22  ;;  %v1358_v54 = vmax.f32 %v1326_v55, 0.0  ;;  %v1263_v34 = vmul.f32 0.03125, %v1084_v20  ;;  %v1086_v45 = vpop.f32.mrb[71].mxu1  ;;  %v1297_v22 = vmul.f32 %v6435_v27, %v6435_v27 }
 0x2b1   :  { %v5151_v45 = vld [vmem:[#allocation7 + $0xa4] ss:$8 sps:$4 sm:$0xff]  }
 0x2b2   :  { %v1390_v36 = vadd.f32 1e-05, %v1358_v54  ;;  %v1327_v1 = vsub.f32 %v1263_v34, %v1295_v8  ;;  %v5149_v8 = vld [vmem:[#allocation7 + $0xa0] ss:$8 sps:$4 sm:$0xff]   ;;  %2692 = vmatprep.subr.bf16.mxu1 %v5151_v45 }
 0x2b3   :  { %v1089_v30 = vpop.f32.mrb[72].mxu1  ;;  %2693 = vmatpush1.bf16.msra.mxu1 %v5149_v8 }
 0x2b4   :  { %5171 = vrsqrt.f32 %v1390_v36  ;;  %v1359_v40 = vmax.f32 %v1327_v1, 0.0  ;;  %v1264_v35 = vmul.f32 0.03125, %v1089_v30  ;;  %v1091_v46 = vpop.f32.mrb[73].mxu1  ;;  %v1298_v30 = vmul.f32 %v6451_v53, %v6451_v53 }
 0x2b6   :  { %v5168_v38 = vpop.eup %5167  ;;  %v1391_v58 = vadd.f32 1e-05, %v1359_v40  ;;  %v1328_v39 = vsub.f32 %v1264_v35, %v1296_v12 }
 0x2b7   :  { %v1094_v9 = vpop.f32.mrb[74].mxu1  ;;  %4801 = vmatmul.mubr.msk.f32.gmra.mrb[128].mxu0 %vm1452_vm5, %v5168_v38 }
 0x2b8   :  { %5173 = vrsqrt.f32 %v1391_v58  ;;  %v1360_v42 = vmax.f32 %v1328_v39, 0.0  ;;  %v1265_v19 = vmul.f32 0.03125, %v1094_v9  ;;  %v1096_v55 = vpop.f32.mrb[75].mxu1  ;;  %1907 = vmatprep.mubr.f32.mxu0 %v8667_v18  ;;  %v1299_v39 = vmul.f32 %v6467_v7, %v6467_v7 }
 0x2ba   :  { %v5170_v20 = vpop.eup %5169  ;;  %v1392_v54 = vadd.f32 1e-05, %v1360_v42  ;;  %v1329_v34 = vsub.f32 %v1265_v19, %v1297_v22 }
 0x2bb   :  { %v1099_v50 = vpop.f32.mrb[76].mxu1  ;;  %4802 = vmatmul.mubr.msk.f32.gmra.mrb[130].mxu0 %vm1452_vm5, %v5170_v20 }
 0x2bc   :  { %5175 = vrsqrt.f32 %v1392_v54  ;;  %v1361_v36 = vmax.f32 %v1329_v34, 0.0  ;;  %v1266_v1 = vmul.f32 0.03125, %v1099_v50  ;;  %v1101_v40 = vpop.f32.mrb[77].mxu1  ;;  %1913 = vmatprep.mubr.f32.mxu0 %v8667_v18  ;;  %v1300_v54 = vmul.f32 %v6483_v3, %v6483_v3 }
 0x2be   :  { %v5172_v27 = vpop.eup %5171  ;;  %v1393_v35 = vadd.f32 1e-05, %v1361_v36  ;;  %v1330_v12 = vsub.f32 %v1266_v1, %v1298_v30  ;;  %v1301_v30 = vmul.f32 %v6499_v47, %v6499_v47 }
 0x2bf   :  { %v1104_v46 = vpop.f32.mrb[78].mxu1  ;;  %4803 = vmatmul.mubr.msk.f32.gmra.mrb[132].mxu0 %vm1452_vm5, %v5172_v27 }
 0x2c0   :  { %5177 = vrsqrt.f32 %v1393_v35  ;;  %v1362_v38 = vmax.f32 %v1330_v12, 0.0  ;;  %v1267_v58 = vmul.f32 0.03125, %v1104_v46  ;;  %v1106_v9 = vpop.f32.mrb[79].mxu1  ;;  %1919 = vmatprep.mubr.f32.mxu0 %v8667_v18  ;;  %v5152_v46 = vld [vmem:[#allocation7 + $0xb0] ss:$8 sps:$4 sm:$0xff]  }
 0x2c1   :  { %v1302_v9 = vmul.f32 %v6513_v57, %v6513_v57 }
 0x2c2   :  { %v5174_v53 = vpop.eup %5173  ;;  %v1394_v42 = vadd.f32 1e-05, %v1362_v38  ;;  %v1331_v19 = vsub.f32 %v1267_v58, %v1299_v39  ;;  %v5154_v38 = vld [vmem:[#allocation7 + $0xb4] ss:$8 sps:$4 sm:$0xff]  }
 0x2c3   :  { %v1109_v22 = vpop.f32.mrb[80].mxu1  ;;  %4804 = vmatmul.mubr.msk.f32.gmra.mrb[134].mxu0 %vm1452_vm5, %v5174_v53  ;;  %2694 = vmatprep.subr.bf16.mxu1 %v5154_v38 }
 0x2c4   :  { %5179 = vrsqrt.f32 %v1394_v42  ;;  %v1363_v55 = vmax.f32 %v1331_v19, 0.0  ;;  %v1268_v20 = vmul.f32 0.03125, %v1109_v22  ;;  %v1111_v34 = vpop.f32.mrb[81].mxu1  ;;  %1925 = vmatprep.mubr.f32.mxu0 %v8667_v18  ;;  %2695 = vmatpush1.bf16.msra.mxu1 %v5152_v46  ;;  %v1305_v46 = vmul.f32 %v6549_v21, %v6549_v21 }
 0x2c6   :  { %v5176_v50 = vpop.eup %5175  ;;  %v1395_v7 = vadd.f32 1e-05, %v1363_v55  ;;  %v1332_v8 = vsub.f32 %v1268_v20, %v1300_v54  ;;  %v1303_v54 = vmul.f32 %v6525_v2, %v6525_v2 }
 0x2c7   :  { %v1114_v45 = vpop.f32.mrb[82].mxu1  ;;  %4805 = vmatmul.mubr.msk.f32.gmra.mrb[136].mxu0 %vm1452_vm5, %v5176_v50 }
 0x2c8   :  { %5181 = vrsqrt.f32 %v1395_v7  ;;  %v1364_v36 = vmax.f32 %v1332_v8, 0.0  ;;  %v1269_v1 = vmul.f32 0.03125, %v1114_v45  ;;  %v1116_v40 = vpop.f32.mrb[83].mxu1  ;;  %1931 = vmatprep.mubr.f32.mxu0 %v8667_v18 }
 0x2ca   :  { %v5178_v27 = vpop.eup %5177  ;;  %v1396_v3 = vadd.f32 1e-05, %v1364_v36  ;;  %v1333_v35 = vsub.f32 %v1269_v1, %v1301_v30  ;;  %v1304_v1 = vmul.f32 %v6537_v16, %v6537_v16 }
 0x2cb   :  { %v1119_v12 = vpop.f32.mrb[84].mxu1  ;;  %4806 = vmatmul.mubr.msk.f32.gmra.mrb[138].mxu0 %vm1452_vm5, %v5178_v27 }
 0x2cc   :  { %5183 = vrsqrt.f32 %v1396_v3  ;;  %v1365_v58 = vmax.f32 %v1333_v35, 0.0  ;;  %v1270_v39 = vmul.f32 0.03125, %v1119_v12  ;;  %v1121_v53 = vpop.f32.mrb[85].mxu1  ;;  %1937 = vmatprep.mubr.f32.mxu0 %v8667_v18 }
 0x2cd   :  { %v5155_v53 = vld [vmem:[#allocation7 + $0xc0] ss:$8 sps:$4 sm:$0xff]  }
 0x2ce   :  { %v5180_v47 = vpop.eup %5179  ;;  %v1397_v42 = vadd.f32 1e-05, %v1365_v58  ;;  %v1334_v19 = vsub.f32 %v1270_v39, %v1302_v9 }
 0x2cf   :  { %v1124_v22 = vpop.f32.mrb[86].mxu1  ;;  %4807 = vmatmul.mubr.msk.f32.gmra.mrb[140].mxu0 %vm1452_vm5, %v5180_v47  ;;  %v5157_v47 = vld [vmem:[#allocation7 + $0xc4] ss:$8 sps:$4 sm:$0xff]  }
 0x2d0   :  { %5185 = vrsqrt.f32 %v1397_v42  ;;  %v1366_v55 = vmax.f32 %v1334_v19, 0.0  ;;  %v1271_v20 = vmul.f32 0.03125, %v1124_v22  ;;  %v1126_v34 = vpop.f32.mrb[87].mxu1  ;;  %1943 = vmatprep.mubr.f32.mxu0 %v8667_v18  ;;  %v1306_v22 = vmul.f32 %v6561_v11, %v6561_v11  ;;  %2696 = vmatprep.subr.bf16.mxu1 %v5157_v47  ;;  %v5158_v47 = vld [vmem:[#allocation7 + $0xd0] ss:$8 sps:$4 sm:$0xff]  }
 0x2d1   :  { %2697 = vmatpush1.bf16.msra.mxu1 %v5155_v53 }
 0x2d2   :  { %v5182_v57 = vpop.eup %5181  ;;  %v1398_v50 = vadd.f32 1e-05, %v1366_v55  ;;  %v1335_v7 = vsub.f32 %v1271_v20, %v1303_v54 }
 0x2d3   :  { %v1129_v8 = vpop.f32.mrb[88].mxu1  ;;  %4808 = vmatmul.mubr.msk.f32.gmra.mrb[142].mxu0 %vm1452_vm5, %v5182_v57 }
 0x2d4   :  { %5187 = vrsqrt.f32 %v1398_v50  ;;  %v1367_v45 = vmax.f32 %v1335_v7, 0.0  ;;  %v1272_v36 = vmul.f32 0.03125, %v1129_v8  ;;  %v1131_v30 = vpop.f32.mrb[89].mxu1  ;;  %1949 = vmatprep.mubr.f32.mxu0 %v8667_v18  ;;  %v1307_v7 = vmul.f32 %v6573_v49, %v6573_v49 }
 0x2d6   :  { %v5184_v40 = vpop.eup %5183  ;;  %v1399_v2 = vadd.f32 1e-05, %v1367_v45  ;;  %v1336_v27 = vsub.f32 %v1272_v36, %v1304_v1 }
 0x2d7   :  { %v1134_v3 = vpop.f32.mrb[90].mxu1  ;;  %4809 = vmatmul.mubr.msk.f32.gmra.mrb[144].mxu0 %vm1452_vm5, %v5184_v40 }
 0x2d8   :  { %5189 = vrsqrt.f32 %v1399_v2  ;;  %v1368_v35 = vmax.f32 %v1336_v27, 0.0  ;;  %v1273_v12 = vmul.f32 0.03125, %v1134_v3  ;;  %v1136_v38 = vpop.f32.mrb[91].mxu1  ;;  %1955 = vmatprep.mubr.f32.mxu0 %v8667_v18  ;;  %v1308_v2 = vmul.f32 %v6585_v0, %v6585_v0 }
 0x2da   :  { %v5186_v58 = vpop.eup %5185  ;;  %v1400_v16 = vadd.f32 1e-05, %v1368_v35  ;;  %v1337_v39 = vsub.f32 %v1273_v12, %v1305_v46 }
 0x2db   :  { %v1139_v9 = vpop.f32.mrb[92].mxu1  ;;  %4810 = vmatmul.mubr.msk.f32.gmra.mrb[146].mxu0 %vm1452_vm5, %v5186_v58  ;;  %v1309_v58 = vmul.f32 %v6596_v33, %v6596_v33 }
 0x2dc   :  { %5191 = vrsqrt.f32 %v1400_v16  ;;  %v1369_v42 = vmax.f32 %v1337_v39, 0.0  ;;  %v1274_v19 = vmul.f32 0.03125, %v1139_v9  ;;  %v1141_v55 = vpop.f32.mrb[93].mxu1  ;;  %1961 = vmatprep.mubr.f32.mxu0 %v8667_v18 }
 0x2dd   :  { %v1310_v55 = vmul.f32 %v6601_v52, %v6601_v52 }
 0x2de   :  { %v5188_v21 = vpop.eup %5187  ;;  %v1401_v20 = vadd.f32 1e-05, %v1369_v42  ;;  %v1338_v54 = vsub.f32 %v1274_v19, %v1306_v22  ;;  %v5160_v42 = vld [vmem:[#allocation7 + $0xd4] ss:$8 sps:$4 sm:$0xff]  }
 0x2df   :  { %v1144_v34 = vpop.f32.mrb[94].mxu1  ;;  %4811 = vmatmul.mubr.msk.f32.gmra.mrb[148].mxu0 %vm1452_vm5, %v5188_v21  ;;  %2698 = vmatprep.subr.bf16.mxu1 %v5160_v42 }
 0x2e0   :  { %5193 = vrsqrt.f32 %v1401_v20  ;;  %v1370_v57 = vmax.f32 %v1338_v54, 0.0  ;;  %v1275_v50 = vmul.f32 0.03125, %v1144_v34  ;;  %v1146_v8 = vpop.f32.mrb[95].mxu1  ;;  %1967 = vmatprep.mubr.f32.mxu0 %v8667_v18  ;;  %2699 = vmatpush1.bf16.msra.mxu1 %v5158_v47 }
 0x2e2   :  { %v5190_v11 = vpop.eup %5189  ;;  %v1402_v45 = vadd.f32 1e-05, %v1370_v57  ;;  %v1339_v36 = vsub.f32 %v1275_v50, %v1307_v7  ;;  %v1311_v7 = vmul.f32 %v6606_v29, %v6606_v29 }
 0x2e3   :  { %v1149_v1 = vpop.f32.mrb[96].mxu1  ;;  %4812 = vmatmul.mubr.msk.f32.gmra.mrb[150].mxu0 %vm1452_vm5, %v5190_v11 }
 0x2e4   :  { %5195 = vrsqrt.f32 %v1402_v45  ;;  %v1371_v30 = vmax.f32 %v1339_v36, 0.0  ;;  %v1276_v40 = vmul.f32 0.03125, %v1149_v1  ;;  %v1151_v27 = vpop.f32.mrb[97].mxu1  ;;  %1973 = vmatprep.mubr.f32.mxu0 %v8667_v18 }
 0x2e6   :  { %v5192_v3 = vpop.eup %5191  ;;  %v1403_v49 = vadd.f32 1e-05, %v1371_v30  ;;  %v1340_v35 = vsub.f32 %v1276_v40, %v1308_v2  ;;  %v1312_v40 = vmul.f32 %v6611_v4, %v6611_v4 }
 0x2e7   :  { %v1154_v12 = vpop.f32.mrb[98].mxu1  ;;  %4813 = vmatmul.mubr.msk.f32.gmra.mrb[152].mxu0 %vm1452_vm5, %v5192_v3 }
 0x2e8   :  { %5197 = vrsqrt.f32 %v1403_v49  ;;  %v1372_v46 = vmax.f32 %v1340_v35, 0.0  ;;  %v1277_v38 = vmul.f32 0.03125, %v1154_v12  ;;  %v1156_v16 = vpop.f32.mrb[99].mxu1  ;;  %1979 = vmatprep.mubr.f32.mxu0 %v8667_v18  ;;  %v5161_v35 = vld [vmem:[#allocation7 + $0xe0] ss:$8 sps:$4 sm:$0xff]  }
 0x2e9   :  { %v5163_v12 = vld [vmem:[#allocation7 + $0xe4] ss:$8 sps:$4 sm:$0xff]  }
 0x2ea   :  { %v5194_v39 = vpop.eup %5193  ;;  %v1404_v0 = vadd.f32 1e-05, %v1372_v46  ;;  %v1341_v9 = vsub.f32 %v1277_v38, %v1309_v58  ;;  %v1313_v58 = vmul.f32 %v6616_v37, %v6616_v37  ;;  %2700 = vmatprep.subr.bf16.mxu1 %v5163_v12  ;;  %v1314_v37 = vmul.f32 %v6621_v13, %v6621_v13 }
 0x2eb   :  { %v1159_v53 = vpop.f32.mrb[100].mxu1  ;;  %4814 = vmatmul.mubr.msk.f32.gmra.mrb[154].mxu0 %vm1452_vm5, %v5194_v39  ;;  %2701 = vmatpush1.bf16.msra.mxu1 %v5161_v35 }
 0x2ec   :  { %5199 = vrsqrt.f32 %v1404_v0  ;;  %v1373_v19 = vmax.f32 %v1341_v9, 0.0  ;;  %v1278_v22 = vmul.f32 0.03125, %v1159_v53  ;;  %v1161_v21 = vpop.f32.mrb[101].mxu1  ;;  %1985 = vmatprep.mubr.f32.mxu0 %v8667_v18 }
 0x2ee   :  { %v5196_v33 = vpop.eup %5195  ;;  %v1405_v20 = vadd.f32 1e-05, %v1373_v19  ;;  %v1342_v54 = vsub.f32 %v1278_v22, %v1310_v55 }
 0x2ef   :  { %v1164_v34 = vpop.f32.mrb[102].mxu1  ;;  %4815 = vmatmul.mubr.msk.f32.gmra.mrb[156].mxu0 %vm1452_vm5, %v5196_v33 }
 0x2f0   :  { %5201 = vrsqrt.f32 %v1405_v20  ;;  %v1374_v57 = vmax.f32 %v1342_v54, 0.0  ;;  %v1279_v50 = vmul.f32 0.03125, %v1164_v34  ;;  %v1166_v8 = vpop.f32.mrb[103].mxu1  ;;  %1991 = vmatprep.mubr.f32.mxu0 %v8667_v18 }
 0x2f2   :  { %v5198_v52 = vpop.eup %5197  ;;  %v1406_v11 = vadd.f32 1e-05, %v1374_v57  ;;  %v1343_v45 = vsub.f32 %v1279_v50, %v1311_v7  ;;  %v1315_v7 = vmul.f32 %v6626_v25, %v6626_v25 }
 0x2f3   :  { %v1169_v36 = vpop.f32.mrb[104].mxu1  ;;  %4816 = vmatmul.mubr.msk.f32.gmra.mrb[158].mxu0 %vm1452_vm5, %v5198_v52 }
 0x2f4   :  { %5203 = vrsqrt.f32 %v1406_v11  ;;  %v1375_v1 = vmax.f32 %v1343_v45, 0.0  ;;  %v1280_v30 = vmul.f32 0.03125, %v1169_v36  ;;  %v1171_v2 = vpop.f32.mrb[105].mxu1  ;;  %1997 = vmatprep.mubr.f32.mxu0 %v8667_v18 }
 0x2f5   :  { %v1316_v2 = vmul.f32 %v6631_v26, %v6631_v26 }
 0x2f6   :  { %v5200_v27 = vpop.eup %5199  ;;  %v1407_v29 = vadd.f32 1e-05, %v1375_v1  ;;  %v1344_v3 = vsub.f32 %v1280_v30, %v1312_v40 }
 0x2f7   :  { %v1174_v49 = vpop.f32.mrb[106].mxu1  ;;  %4817 = vmatmul.mubr.msk.f32.gmra.mrb[160].mxu0 %vm1452_vm5, %v5200_v27 }
 0x2f8   :  { %5205 = vrsqrt.f32 %v1407_v29  ;;  %v1376_v46 = vmax.f32 %v1344_v3, 0.0  ;;  %v1281_v38 = vmul.f32 0.03125, %v1174_v49  ;;  %v1176_v16 = vpop.f32.mrb[107].mxu1  ;;  %2003 = vmatprep.mubr.f32.mxu0 %v8667_v18 }
 0x2f9   :  { %v6749_v4 = vpop.f32.mrb[64].mxu0 }
 0x2fa   :  { %v5202_v39 = vpop.eup %5201  ;;  %v1408_v0 = vadd.f32 1e-05, %v1376_v46  ;;  %v1345_v9 = vsub.f32 %v1281_v38, %v1313_v58  ;;  %v6751_v53 = vpop.f32.mrb[65].mxu0  ;;  %v1317_v58 = vmul.f32 %v6636_v48, %v6636_v48 }
 0x2fb   :  { %v1179_v47 = vpop.f32.mrb[108].mxu1  ;;  %4818 = vmatmul.mubr.msk.f32.gmra.mrb[162].mxu0 %vm1452_vm5, %v5202_v39 }
 0x2fc   :  { %5207 = vrsqrt.f32 %v1408_v0  ;;  %v1377_v42 = vmax.f32 %v1345_v9, 0.0  ;;  %v1282_v19 = vmul.f32 0.03125, %v1179_v47  ;;  %v1181_v22 = vpop.f32.mrb[109].mxu1  ;;  %2009 = vmatprep.mubr.f32.mxu0 %v8667_v18 }
 0x2fd   :  { %v6757_v55 = vpop.f32.mrb[66].mxu0  ;;  %v1318_v22 = vmul.f32 %v6641_v32, %v6641_v32 }
 0x2fe   :  { %v5204_v21 = vpop.eup %5203  ;;  %v1409_v33 = vadd.f32 1e-05, %v1377_v42  ;;  %v1346_v20 = vsub.f32 %v1282_v19, %v1314_v37  ;;  %v6759_v54 = vpop.f32.mrb[67].mxu0 }
 0x2ff   :  { %v1184_v34 = vpop.f32.mrb[110].mxu1  ;;  %4819 = vmatmul.mubr.msk.f32.gmra.mrb[164].mxu0 %vm1452_vm5, %v5204_v21 }
 0x300   :  { %5209 = vrsqrt.f32 %v1409_v33  ;;  %v1378_v57 = vmax.f32 %v1346_v20, 0.0  ;;  %v1283_v50 = vmul.f32 0.03125, %v1184_v34  ;;  %v1186_v13 = vpop.f32.mrb[111].mxu1  ;;  %2015 = vmatprep.mubr.f32.mxu0 %v8667_v18 }
 0x301   :  { %v6765_v8 = vpop.f32.mrb[68].mxu0 }
 0x302   :  { %v5206_v52 = vpop.eup %5205  ;;  %v1410_v11 = vadd.f32 1e-05, %v1378_v57  ;;  %v1347_v45 = vsub.f32 %v1283_v50, %v1315_v7  ;;  %v6767_v36 = vpop.f32.mrb[69].mxu0 }
 0x303   :  { %v1189_v1 = vpop.f32.mrb[112].mxu1  ;;  %4820 = vmatmul.mubr.msk.f32.gmra.mrb[166].mxu0 %vm1452_vm5, %v5206_v52  ;;  %v1319_v52 = vmul.f32 %v6646_v24, %v6646_v24  ;;  %v1320_v24 = vmul.f32 %v6651_v61, %v6651_v61 }
 0x304   :  { %5211 = vrsqrt.f32 %v1410_v11  ;;  %v1379_v30 = vmax.f32 %v1347_v45, 0.0  ;;  %v1284_v40 = vmul.f32 0.03125, %v1189_v1  ;;  %v1191_v25 = vpop.f32.mrb[113].mxu1  ;;  %2021 = vmatprep.mubr.f32.mxu0 %v8667_v18  ;;  %v5164_v45 = vld [vmem:[#allocation7 + $0xf0] ss:$8 sps:$4 sm:$0xff]  }
 0x305   :  { %v6773_v27 = vpop.f32.mrb[70].mxu0  ;;  %v5166_v1 = vld [vmem:[#allocation7 + $0xf4] ss:$8 sps:$4 sm:$0xff]  }
 0x306   :  { %v5208_v29 = vpop.eup %5207  ;;  %v1411_v3 = vadd.f32 1e-05, %v1379_v30  ;;  %v1348_v49 = vsub.f32 %v1284_v40, %v1316_v2  ;;  %v6775_v35 = vpop.f32.mrb[71].mxu0  ;;  %2702 = vmatprep.subr.bf16.mxu1 %v5166_v1 }
 0x307   :  { %v1194_v12 = vpop.f32.mrb[114].mxu1  ;;  %4821 = vmatmul.mubr.msk.f32.gmra.mrb[168].mxu0 %vm1452_vm5, %v5208_v29  ;;  %2703 = vmatpush1.bf16.msra.mxu1 %v5164_v45 }
 0x308   :  { %5213 = vrsqrt.f32 %v1411_v3  ;;  %v1380_v46 = vmax.f32 %v1348_v49, 0.0  ;;  %v1285_v38 = vmul.f32 0.03125, %v1194_v12  ;;  %v1196_v26 = vpop.f32.mrb[115].mxu1  ;;  %2027 = vmatprep.mubr.f32.mxu0 %v8667_v18 }
 0x309   :  { %v6781_v16 = vpop.f32.mrb[72].mxu0 }
 0x30a   :  { %v5210_v39 = vpop.eup %5209  ;;  %v1412_v0 = vadd.f32 1e-05, %v1380_v46  ;;  %v1349_v9 = vsub.f32 %v1285_v38, %v1317_v58  ;;  %v6783_v47 = vpop.f32.mrb[73].mxu0  ;;  %v8746_v38 = vmov 1.0  }
 0x30b   :  { %v1199_v42 = vpop.f32.mrb[116].mxu1  ;;  %4822 = vmatmul.mubr.msk.f32.gmra.mrb[170].mxu0 %vm1452_vm5, %v5210_v39  ;;  %4897 = vmatprep.subr.msk.mxu1 %vm5985_vm2, %v8746_v38 }
 0x30c   :  { %5215 = vrsqrt.f32 %v1412_v0  ;;  %v1381_v19 = vmax.f32 %v1349_v9, 0.0  ;;  %v1286_v37 = vmul.f32 0.03125, %v1199_v42  ;;  %v1201_v48 = vpop.f32.mrb[117].mxu1  ;;  %2033 = vmatprep.mubr.f32.mxu0 %v8667_v18 }
 0x30d   :  { %v6789_v21 = vpop.f32.mrb[74].mxu0 }
 0x30e   :  { %v5212_v33 = vpop.eup %5211  ;;  %v1413_v20 = vadd.f32 1e-05, %v1381_v19  ;;  %v1350_v34 = vsub.f32 %v1286_v37, %v1318_v22  ;;  %v6791_v57 = vpop.f32.mrb[75].mxu0  ;;  %v1321_v37 = vmul.f32 %v6656_v31, %v6656_v31 }
 0x30f   :  { %v1204_v50 = vpop.f32.mrb[118].mxu1  ;;  %4823 = vmatmul.mubr.msk.f32.gmra.mrb[172].mxu0 %vm1452_vm5, %v5212_v33 }
 0x310   :  { %5217 = vrsqrt.f32 %v1413_v20  ;;  %v1382_v7 = vmax.f32 %v1350_v34, 0.0  ;;  %v1287_v13 = vmul.f32 0.03125, %v1204_v50  ;;  %v1206_v32 = vpop.f32.mrb[119].mxu1  ;;  %2039 = vmatprep.mubr.f32.mxu0 %v8667_v18 }
 0x311   :  { %v6797_v11 = vpop.f32.mrb[76].mxu0  ;;  %v1322_v32 = vmul.f32 %v6661_v60, %v6661_v60 }
 0x312   :  { %v5214_v30 = vpop.eup %5213  ;;  %v1414_v40 = vadd.f32 1e-05, %v1382_v7  ;;  %v1351_v2 = vsub.f32 %v1287_v13, %v1319_v52  ;;  %v6799_v25 = vpop.f32.mrb[77].mxu0 }
 0x313   :  { %v1209_v29 = vpop.f32.mrb[120].mxu1  ;;  %4824 = vmatmul.mubr.msk.f32.gmra.mrb[174].mxu0 %vm1452_vm5, %v5214_v30 }
 0x314   :  { %5219 = vrsqrt.f32 %v1414_v40  ;;  %v1383_v3 = vmax.f32 %v1351_v2, 0.0  ;;  %v1288_v49 = vmul.f32 0.03125, %v1209_v29  ;;  %v1211_v12 = vpop.f32.mrb[121].mxu1  ;;  %2045 = vmatprep.mubr.f32.mxu0 %v8667_v18 }
 0x315   :  { %v6805_v46 = vpop.f32.mrb[78].mxu0 }
 0x316   :  { %v5216_v26 = vpop.eup %5215  ;;  %v1415_v39 = vadd.f32 1e-05, %v1383_v3  ;;  %v1352_v0 = vsub.f32 %v1288_v49, %v1320_v24  ;;  %v6810_v9 = vpop.f32.mrb[79].mxu0  ;;  %v1323_v24 = vmul.f32 %v6666_v44, %v6666_v44 }
 0x317   :  { %v1214_v42 = vpop.f32.mrb[122].mxu1  ;;  %4825 = vmatmul.mubr.msk.f32.gmra.mrb[176].mxu0 %vm1452_vm5, %v5216_v26 }
 0x318   :  { %5221 = vrsqrt.f32 %v1415_v39  ;;  %v1384_v61 = vmax.f32 %v1352_v0, 0.0  ;;  %v1289_v19 = vmul.f32 0.03125, %v1214_v42  ;;  %v1216_v22 = vpop.f32.mrb[123].mxu1  ;;  %2051 = vmatprep.mubr.f32.mxu0 %v8667_v18 }
 0x319   :  { %v6816_v48 = vpop.f32.mrb[80].mxu0 }
 0x31a   :  { %v5218_v33 = vpop.eup %5217  ;;  %v1416_v20 = vadd.f32 1e-05, %v1384_v61  ;;  %v1353_v34 = vsub.f32 %v1289_v19, %v1321_v37  ;;  %v6818_v50 = vpop.f32.mrb[81].mxu0 }
 0x31b   :  { %v1219_v7 = vpop.f32.mrb[124].mxu1  ;;  %4826 = vmatmul.mubr.msk.f32.gmra.mrb[178].mxu0 %vm1452_vm5, %v5218_v33 }
 0x31c   :  { %5223 = vrsqrt.f32 %v1416_v20  ;;  %v1385_v13 = vmax.f32 %v1353_v34, 0.0  ;;  %v1290_v52 = vmul.f32 0.03125, %v1219_v7  ;;  %v1221_v31 = vpop.f32.mrb[125].mxu1  ;;  %2057 = vmatprep.mubr.f32.mxu0 %v8667_v18 }
 0x31d   :  { %v6824_v45 = vpop.f32.mrb[82].mxu0 }
 0x31e   :  { %v5220_v1 = vpop.eup %5219  ;;  %v1417_v30 = vadd.f32 1e-05, %v1385_v13  ;;  %v1354_v40 = vsub.f32 %v1290_v52, %v1322_v32  ;;  %v6826_v2 = vpop.f32.mrb[83].mxu0 }
 0x31f   :  { %v1224_v29 = vpop.f32.mrb[126].mxu1  ;;  %4827 = vmatmul.mubr.msk.f32.gmra.mrb[180].mxu0 %vm1452_vm5, %v5220_v1 }
 0x320   :  { %5225 = vrsqrt.f32 %v1417_v30  ;;  %v1386_v3 = vmax.f32 %v1354_v40, 0.0  ;;  %v1291_v49 = vmul.f32 0.03125, %v1224_v29  ;;  %v1226_v60 = vpop.f32.mrb[127].mxu1  ;;  %2063 = vmatprep.mubr.f32.mxu0 %v8667_v18 }
 0x321   :  { %v6832_v12 = vpop.f32.mrb[84].mxu0 }
 0x322   :  { %v5222_v58 = vpop.eup %5221  ;;  %v1418_v26 = vadd.f32 1e-05, %v1386_v3  ;;  %v1355_v39 = vsub.f32 %v1291_v49, %v1323_v24  ;;  %v6834_v0 = vpop.f32.mrb[85].mxu0 }
 0x323   :  { %4828 = vmatmul.mubr.msk.f32.gmra.mrb[182].mxu0 %vm1452_vm5, %v5222_v58 }
 0x324   :  { %5227 = vrsqrt.f32 %v1418_v26  ;;  %v1387_v42 = vmax.f32 %v1355_v39, 0.0  ;;  %2069 = vmatprep.mubr.f32.mxu0 %v8667_v18 }
 0x325   :  { %v6838_v61 = vpop.f32.mrb[86].mxu0 }
 0x326   :  { %v5224_v19 = vpop.eup %5223  ;;  %v1419_v44 = vadd.f32 1e-05, %v1387_v42  ;;  %v6840_v37 = vpop.f32.mrb[87].mxu0 }
 0x327   :  { %4829 = vmatmul.mubr.msk.f32.gmra.mrb[184].mxu0 %vm1452_vm5, %v5224_v19 }
 0x328   :  { %5229 = vrsqrt.f32 %v1419_v44  ;;  %2075 = vmatprep.mubr.f32.mxu0 %v8667_v18 }
 0x329   :  { %v6844_v22 = vpop.f32.mrb[88].mxu0 }
 0x32a   :  { %v5226_v33 = vpop.eup %5225  ;;  %v6846_v20 = vpop.f32.mrb[89].mxu0 }
 0x32b   :  { %4830 = vmatmul.mubr.msk.f32.gmra.mrb[186].mxu0 %vm1452_vm5, %v5226_v33 }
 0x32c   :  { %2081 = vmatprep.mubr.f32.mxu0 %v8667_v18 }
 0x32d   :  { %v6850_v34 = vpop.f32.mrb[90].mxu0 }
 0x32e   :  { %v5228_v7 = vpop.eup %5227  ;;  %v6852_v13 = vpop.f32.mrb[91].mxu0 }
 0x32f   :  { %4831 = vmatmul.mubr.msk.f32.gmra.mrb[188].mxu0 %vm1452_vm5, %v5228_v7 }
 0x330   :  { %2087 = vmatprep.mubr.f32.mxu0 %v8667_v18 }
 0x331   :  { %v6856_v52 = vpop.f32.mrb[92].mxu0 }
 0x332   :  { %v5230_v32 = vpop.eup %5229  ;;  %v6858_v31 = vpop.f32.mrb[93].mxu0 }
 0x333   :  { %4832 = vmatmul.mubr.msk.f32.gmra.mrb[190].mxu0 %vm1452_vm5, %v5230_v32 }
 0x335   :  { %v6861_v1 = vpop.f32.mrb[94].mxu0 }
 0x336   :  { %v6863_v30 = vpop.f32.mrb[95].mxu0 }
 0x339   :  { %v6865_v40 = vpop.f32.mrb[96].mxu0 }
 0x33a   :  { %v6867_v29 = vpop.f32.mrb[97].mxu0 }
 0x33d   :  { %v6869_v3 = vpop.f32.mrb[98].mxu0 }
 0x33e   :  { %8748 = vst [vmem:[#allocation13_spill] sm:$0xff] %v6869_v3  ;;  %v6871_v49 = vpop.f32.mrb[99].mxu0 }
 0x33f   :  { %8749 = vst [vmem:[#allocation12_spill] sm:$0xff] %v6871_v49 }
 0x341   :  { %v6873_v24 = vpop.f32.mrb[100].mxu0 }
 0x342   :  { %8750 = vst [vmem:[#allocation15_spill] sm:$0xff] %v6873_v24  ;;  %v6875_v60 = vpop.f32.mrb[101].mxu0 }
 0x343   :  { %8751 = vst [vmem:[#allocation14_spill] sm:$0xff] %v6875_v60 }
 0x345   :  { %v6877_v58 = vpop.f32.mrb[102].mxu0 }
 0x346   :  { %8752 = vst [vmem:[#allocation17_spill] sm:$0xff] %v6877_v58  ;;  %v6879_v26 = vpop.f32.mrb[103].mxu0 }
 0x347   :  { %8753 = vst [vmem:[#allocation16_spill] sm:$0xff] %v6879_v26 }
 0x349   :  { %v6881_v39 = vpop.f32.mrb[104].mxu0 }
 0x34a   :  { %8754 = vst [vmem:[#allocation19_spill] sm:$0xff] %v6881_v39  ;;  %v6883_v42 = vpop.f32.mrb[105].mxu0 }
 0x34b   :  { %8755 = vst [vmem:[#allocation18_spill] sm:$0xff] %v6883_v42 }
 0x34d   :  { %v6885_v19 = vpop.f32.mrb[106].mxu0 }
 0x34e   :  { %8756 = vst [vmem:[#allocation21_spill] sm:$0xff] %v6885_v19  ;;  %v6887_v44 = vpop.f32.mrb[107].mxu0 }
 0x34f   :  { %8757 = vst [vmem:[#allocation20_spill] sm:$0xff] %v6887_v44 }
 0x351   :  { %v6889_v33 = vpop.f32.mrb[108].mxu0 }
 0x352   :  { %8758 = vst [vmem:[#allocation23_spill] sm:$0xff] %v6889_v33  ;;  %v6891_v7 = vpop.f32.mrb[109].mxu0 }
 0x353   :  { %8759 = vst [vmem:[#allocation22_spill] sm:$0xff] %v6891_v7 }
 0x355   :  { %v6893_v32 = vpop.f32.mrb[110].mxu0 }
 0x356   :  { %8760 = vst [vmem:[#allocation25_spill] sm:$0xff] %v6893_v32  ;;  %v6895_v18 = vpop.f32.mrb[111].mxu0 }
 0x357   :  { %8761 = vst [vmem:[#allocation24_spill] sm:$0xff] %v6895_v18 }
 0x359   :  { %v6897_v60 = vpop.f32.mrb[112].mxu0 }
 0x35a   :  { %8762 = vst [vmem:[#allocation27_spill] sm:$0xff] %v6897_v60  ;;  %v6899_v58 = vpop.f32.mrb[113].mxu0 }
 0x35b   :  { %8763 = vst [vmem:[#allocation26_spill] sm:$0xff] %v6899_v58 }
 0x35d   :  { %v6901_v26 = vpop.f32.mrb[114].mxu0 }
 0x35e   :  { %8764 = vst [vmem:[#allocation29_spill] sm:$0xff] %v6901_v26  ;;  %v6903_v39 = vpop.f32.mrb[115].mxu0 }
 0x35f   :  { %8765 = vst [vmem:[#allocation28_spill] sm:$0xff] %v6903_v39 }
 0x361   :  { %v6905_v42 = vpop.f32.mrb[116].mxu0 }
 0x362   :  { %8766 = vst [vmem:[#allocation31_spill] sm:$0xff] %v6905_v42  ;;  %v6907_v19 = vpop.f32.mrb[117].mxu0 }
 0x363   :  { %8767 = vst [vmem:[#allocation30_spill] sm:$0xff] %v6907_v19 }
 0x365   :  { %v6909_v44 = vpop.f32.mrb[118].mxu0 }
 0x366   :  { %8768 = vst [vmem:[#allocation33_spill] sm:$0xff] %v6909_v44  ;;  %v6911_v33 = vpop.f32.mrb[119].mxu0 }
 0x367   :  { %8769 = vst [vmem:[#allocation32_spill] sm:$0xff] %v6911_v33  ;;  %v777_v33 = vld [vmem:[%s8307_s3] sm:$0x3] }
 0x369   :  { %v6913_v7 = vpop.f32.mrb[120].mxu0 }
 0x36a   :  { %8770 = vst [vmem:[#allocation35_spill] sm:$0xff] %v6913_v7  ;;  %v6915_v32 = vpop.f32.mrb[121].mxu0  ;;  %v2094_v7 = vsub.f32 %v6019_v59, %v6749_v4  ;;  %v2096_v59 = vsub.f32 %v6028_v41, %v6757_v55  ;;  %v2098_v41 = vsub.f32 %v6035_v10, %v6765_v8  ;;  %v2100_v10 = vsub.f32 %v6044_v15, %v6773_v27 }
 0x36b   :  { %8771 = vst [vmem:[#allocation34_spill] sm:$0xff] %v6915_v32  ;;  %v8778_v32 = vld [vmem:[#allocation45_spill] sm:$0xff]  ;;  %v2102_v15 = vsub.f32 %v6051_v28, %v6781_v16 }
 0x36c   :  { %v6935_v44 = vrot.slane %v777_v33, %v8778_v32 }
 0x36d   :  { %v6917_v18 = vpop.f32.mrb[122].mxu0 }
 0x36e   :  { %8772 = vst [vmem:[#allocation37_spill] sm:$0xff] %v6917_v18  ;;  %v6919_v60 = vpop.f32.mrb[123].mxu0 }
 0x36f   :  { %8773 = vst [vmem:[#allocation36_spill] sm:$0xff] %v6919_v60  ;;  %v2095_v60 = vsub.f32 %v6016_v56, %v6751_v53  ;;  %v2097_v56 = vsub.f32 %v6022_v63, %v6759_v54 }
 0x371   :  { %v6921_v58 = vpop.f32.mrb[124].mxu0 }
 0x372   :  { %8774 = vst [vmem:[#allocation39_spill] sm:$0xff] %v6921_v58  ;;  %v6923_v26 = vpop.f32.mrb[125].mxu0  ;;  %v8779_v58 = vld [vmem:[#allocation44_spill] sm:$0xff] }
 0x373   :  { %8775 = vst [vmem:[#allocation38_spill] sm:$0xff] %v6923_v26  ;;  %v778_v26 = vld [vmem:[%s8308_s4] sm:$0x3] }
 0x374   :  { %v6949_v49 = vrot.slane %v778_v26, %v8778_v32  ;;  %v6955_v3 = vrot.slane %v778_v26, %v8779_v58 }
 0x375   :  { %v6925_v39 = vpop.f32.mrb[126].mxu0 }
 0x376   :  { %8776 = vst [vmem:[#allocation41_spill] sm:$0xff] %v6925_v39  ;;  %v6927_v42 = vpop.f32.mrb[127].mxu0 }
 0x377   :  { %8777 = vst [vmem:[#allocation40_spill] sm:$0xff] %v6927_v42  ;;  %v6943_v42 = vrot.slane %v777_v33, %v8779_v58 }
 0x38a   :  { %v1903_v39 = vpop.f32.mrb[128].mxu0 }
 0x38b   :  { %v2158_v18 = vmul.f32 %v2094_v7, %v1903_v39  ;;  %v1905_v19 = vpop.f32.mrb[129].mxu0 }
 0x38c   :  { %v2159_v24 = vmul.f32 %v2095_v60, %v1905_v19  ;;  %v2099_v19 = vsub.f32 %v6032_v6, %v6767_v36  ;;  %v2101_v6 = vsub.f32 %v6038_v14, %v6775_v35  ;;  %v2103_v14 = vsub.f32 %v6048_v23, %v6783_v47 }
 0x38d   :  { %v2233_v4 = vmul.f32 %v6935_v44, %v2158_v18  ;;  %v2104_v23 = vsub.f32 %v6060_v51, %v6789_v21  ;;  %v2106_v51 = vsub.f32 %v6067_v5, %v6797_v11 }
 0x38e   :  { %v2234_v53 = vmul.f32 %v6943_v42, %v2159_v24  ;;  %v1909_v33 = vpop.f32.mrb[130].mxu0 }
 0x38f   :  { %v2160_v39 = vmul.f32 %v2096_v59, %v1909_v33  ;;  %v1911_v7 = vpop.f32.mrb[131].mxu0  ;;  %v2308_v18 = vadd.f32 %v6949_v49, %v2233_v4 }
 0x390   :  { %v2161_v60 = vmul.f32 %v2097_v56, %v1911_v7  ;;  %v2309_v63 = vadd.f32 %v6955_v3, %v2234_v53 }
 0x391   :  { %v2235_v55 = vmul.f32 %v6935_v44, %v2160_v39  ;;  %v2372_v8 = vmax.f32 %v2308_v18, 0.0 }
 0x392   :  { %v2236_v54 = vmul.f32 %v6943_v42, %v2161_v60  ;;  %v1915_v24 = vpop.f32.mrb[132].mxu0  ;;  %v2373_v36 = vmax.f32 %v2309_v63, 0.0 }
 0x393   :  { %v2310_v26 = vadd.f32 %v6949_v49, %v2235_v55  ;;  %v2162_v59 = vmul.f32 %v2098_v41, %v1915_v24  ;;  %v1917_v33 = vpop.f32.mrb[133].mxu0 }
 0x394   :  { %v2311_v56 = vadd.f32 %v6955_v3, %v2236_v54  ;;  %v2163_v7 = vmul.f32 %v2099_v19, %v1917_v33 }
 0x395   :  { %v2374_v4 = vmax.f32 %v2310_v26, 0.0  ;;  %v2237_v39 = vmul.f32 %v6935_v44, %v2162_v59 }
 0x396   :  { %v2375_v53 = vmax.f32 %v2311_v56, 0.0  ;;  %v2238_v60 = vmul.f32 %v6943_v42, %v2163_v7  ;;  %v1921_v55 = vpop.f32.mrb[134].mxu0 }
 0x397   :  { %v2436_v41 = vpack.c.bf16 %v2374_v4, %v2372_v8  ;;  %v2164_v24 = vmul.f32 %v2100_v10, %v1921_v55  ;;  %v1923_v32 = vpop.f32.mrb[135].mxu0  ;;  %v2312_v27 = vadd.f32 %v6949_v49, %v2237_v39  ;;  %v2105_v8 = vsub.f32 %v6054_v43, %v6791_v57 }
 0x398   :  { %v2165_v54 = vmul.f32 %v2101_v6, %v1923_v32  ;;  %v2437_v19 = vpack.c.bf16 %v2375_v53, %v2373_v36  ;;  %v2313_v35 = vadd.f32 %v6955_v3, %v2238_v60  ;;  %v2107_v43 = vsub.f32 %v6064_v62, %v6799_v25  ;;  %v8781_v25 = vld [vmem:[#allocation46_spill] sm:$0xff] }
 0x399   :  { %v2239_v18 = vmul.f32 %v6935_v44, %v2164_v24  ;;  %v2376_v47 = vmax.f32 %v2312_v27, 0.0 }
 0x39a   :  { %v2240_v63 = vmul.f32 %v6943_v42, %v2165_v54  ;;  %v1927_v26 = vpop.f32.mrb[136].mxu0  ;;  %2704 = vmatprep.mubr.bf16.mxu1 %v2437_v19  ;;  %v2377_v4 = vmax.f32 %v2313_v35, 0.0 }
 0x39b   :  { %v2314_v59 = vadd.f32 %v6949_v49, %v2239_v18  ;;  %v2166_v32 = vmul.f32 %v2102_v15, %v1927_v26  ;;  %v1929_v33 = vpop.f32.mrb[137].mxu0  ;;  %2705 = vmatmul.mubr.bf16.vlgmr.msra.gmra.mrb[128].mxu1 %v2436_v41  ;;  %v2109_v26 = vsub.f32 %v8781_v25, %v6810_v9 }
 0x39c   :  { %v2315_v28 = vadd.f32 %v6955_v3, %v2240_v63  ;;  %v2167_v16 = vmul.f32 %v2103_v14, %v1929_v33  ;;  %4898 = vmatpush1.msk.msra.mxu1 %vm5992_vm10, %v8746_v38  ;;  %v2108_v14 = vsub.f32 %v6076_v17, %v6805_v46 }
 0x39d   :  { %v2378_v7 = vmax.f32 %v2314_v59, 0.0  ;;  %v2241_v10 = vmul.f32 %v6935_v44, %v2166_v32 }
 0x39e   :  { %v2379_v39 = vmax.f32 %v2315_v28, 0.0  ;;  %v2242_v6 = vmul.f32 %v6943_v42, %v2167_v16  ;;  %v1933_v36 = vpop.f32.mrb[138].mxu0 }
 0x39f   :  { %v2168_v53 = vmul.f32 %v2104_v23, %v1933_v36  ;;  %v1935_v60 = vpop.f32.mrb[139].mxu0  ;;  %v2438_v55 = vpack.c.bf16 %v2378_v7, %v2376_v47  ;;  %v2316_v21 = vadd.f32 %v6949_v49, %v2241_v10  ;;  %v8782_v10 = vld [vmem:[#allocation48_spill] sm:$0xff] }
 0x3a0   :  { %v2169_v41 = vmul.f32 %v2105_v8, %v1935_v60  ;;  %v2439_v38 = vpack.c.bf16 %v2379_v39, %v2377_v4  ;;  %v2317_v57 = vadd.f32 %v6955_v3, %v2242_v6  ;;  %v2110_v17 = vsub.f32 %v8782_v10, %v6816_v48  ;;  %v8783_v4 = vld [vmem:[#allocation47_spill] sm:$0xff] }
 0x3a1   :  { %v2243_v24 = vmul.f32 %v6935_v44, %v2168_v53  ;;  %v2380_v35 = vmax.f32 %v2316_v21, 0.0  ;;  %v2111_v9 = vsub.f32 %v8783_v4, %v6818_v50 }
 0x3a2   :  { %v2244_v54 = vmul.f32 %v6943_v42, %v2169_v41  ;;  %v1939_v19 = vpop.f32.mrb[140].mxu0  ;;  %2714 = vmatprep.mubr.bf16.mxu1 %v2439_v38  ;;  %v2381_v59 = vmax.f32 %v2317_v57, 0.0  ;;  %v8784_v38 = vld [vmem:[#allocation50_spill] sm:$0xff] }
 0x3a3   :  { %v2318_v15 = vadd.f32 %v6949_v49, %v2243_v24  ;;  %v2170_v27 = vmul.f32 %v2106_v51, %v1939_v19  ;;  %v1941_v18 = vpop.f32.mrb[141].mxu0  ;;  %2715 = vmatmul.mubr.bf16.gmra.mrb[132].mxu1 %v2438_v55  ;;  %v2112_v51 = vsub.f32 %v8784_v38, %v6824_v45 }
 0x3a4   :  { %v2319_v5 = vadd.f32 %v6955_v3, %v2244_v54  ;;  %v2171_v11 = vmul.f32 %v2107_v43, %v1941_v18  ;;  %v8785_v43 = vld [vmem:[#allocation49_spill] sm:$0xff] }
 0x3a5   :  { %v2382_v63 = vmax.f32 %v2318_v15, 0.0  ;;  %v2245_v62 = vmul.f32 %v6935_v44, %v2170_v27  ;;  %v2113_v57 = vsub.f32 %v8785_v43, %v6826_v2 }
 0x3a6   :  { %v2383_v32 = vmax.f32 %v2319_v5, 0.0  ;;  %v2246_v33 = vmul.f32 %v6943_v42, %v2171_v11  ;;  %v1945_v28 = vpop.f32.mrb[142].mxu0 }
 0x3a7   :  { %v2172_v16 = vmul.f32 %v2108_v14, %v1945_v28  ;;  %v1947_v56 = vpop.f32.mrb[143].mxu0  ;;  %v2440_v23 = vpack.c.bf16 %v2382_v63, %v2380_v35  ;;  %v2320_v46 = vadd.f32 %v6949_v49, %v2245_v62  ;;  %v8786_v63 = vld [vmem:[#allocation52_spill] sm:$0xff] }
 0x3a8   :  { %v2173_v47 = vmul.f32 %v2109_v26, %v1947_v56  ;;  %v2441_v7 = vpack.c.bf16 %v2383_v32, %v2381_v59  ;;  %v2321_v39 = vadd.f32 %v6955_v3, %v2246_v33  ;;  %v2114_v45 = vsub.f32 %v8786_v63, %v6832_v12  ;;  %v8787_v26 = vld [vmem:[#allocation51_spill] sm:$0xff] }
 0x3a9   :  { %v2247_v8 = vmul.f32 %v6935_v44, %v2172_v16  ;;  %v2384_v21 = vmax.f32 %v2320_v46, 0.0  ;;  %v2115_v2 = vsub.f32 %v8787_v26, %v6834_v0  ;;  %v8789_v46 = vld [vmem:[#allocation53_spill] sm:$0xff] }
 0x3aa   :  { %v2248_v6 = vmul.f32 %v6943_v42, %v2173_v47  ;;  %v1951_v36 = vpop.f32.mrb[144].mxu0  ;;  %2724 = vmatprep.mubr.bf16.mxu1 %v2441_v7  ;;  %v2385_v54 = vmax.f32 %v2321_v39, 0.0  ;;  %v8788_v47 = vld [vmem:[#allocation54_spill] sm:$0xff] }
 0x3ab   :  { %v2322_v53 = vadd.f32 %v6949_v49, %v2247_v8  ;;  %v2174_v60 = vmul.f32 %v2110_v17, %v1951_v36  ;;  %v1953_v55 = vpop.f32.mrb[145].mxu0  ;;  %2725 = vmatmul.mubr.bf16.gmra.mrb[136].mxu1 %v2440_v23  ;;  %v2116_v7 = vsub.f32 %v8788_v47, %v6838_v61  ;;  %v2117_v8 = vsub.f32 %v8789_v46, %v6840_v37 }
 0x3ac   :  { %v2323_v48 = vadd.f32 %v6955_v3, %v2248_v6  ;;  %v2175_v41 = vmul.f32 %v2111_v9, %v1953_v55 }
 0x3ad   :  { %v2386_v24 = vmax.f32 %v2322_v53, 0.0  ;;  %v2249_v50 = vmul.f32 %v6935_v44, %v2174_v60 }
 0x3ae   :  { %v2387_v19 = vmax.f32 %v2323_v48, 0.0  ;;  %v2250_v15 = vmul.f32 %v6943_v42, %v2175_v41  ;;  %v1957_v27 = vpop.f32.mrb[146].mxu0  ;;  %v8790_v41 = vld [vmem:[#allocation56_spill] sm:$0xff] }
 0x3af   :  { %v2176_v18 = vmul.f32 %v2112_v51, %v1957_v27  ;;  %v1959_v5 = vpop.f32.mrb[147].mxu0  ;;  %v2442_v11 = vpack.c.bf16 %v2386_v24, %v2384_v21  ;;  %v2324_v62 = vadd.f32 %v6949_v49, %v2249_v50  ;;  %v2118_v61 = vsub.f32 %v8790_v41, %v6844_v22  ;;  %v8791_v21 = vld [vmem:[#allocation55_spill] sm:$0xff]  ;;  %v8792_v27 = vld [vmem:[#allocation58_spill] sm:$0xff] }
 0x3b0   :  { %v2177_v14 = vmul.f32 %v2113_v57, %v1959_v5  ;;  %v2443_v35 = vpack.c.bf16 %v2387_v19, %v2385_v54  ;;  %v2325_v59 = vadd.f32 %v6955_v3, %v2250_v15  ;;  %v2119_v37 = vsub.f32 %v8791_v21, %v6846_v20 }
 0x3b1   :  { %v2251_v25 = vmul.f32 %v6935_v44, %v2176_v18  ;;  %v2388_v10 = vmax.f32 %v2324_v62, 0.0  ;;  %v2120_v18 = vsub.f32 %v8792_v27, %v6850_v34 }
 0x3b2   :  { %v2252_v32 = vmul.f32 %v6943_v42, %v2177_v14  ;;  %v1963_v33 = vpop.f32.mrb[148].mxu0  ;;  %2734 = vmatprep.mubr.bf16.mxu1 %v2443_v35  ;;  %v2389_v4 = vmax.f32 %v2325_v59, 0.0  ;;  %v8793_v14 = vld [vmem:[#allocation57_spill] sm:$0xff] }
 0x3b3   :  { %v2326_v28 = vadd.f32 %v6949_v49, %v2251_v25  ;;  %v2178_v16 = vmul.f32 %v2114_v45, %v1963_v33  ;;  %v1965_v56 = vpop.f32.mrb[149].mxu0  ;;  %2735 = vmatmul.mubr.bf16.gmra.mrb[140].mxu1 %v2442_v11  ;;  %v2121_v35 = vsub.f32 %v8793_v14, %v6852_v13 }
 0x3b4   :  { %v2327_v12 = vadd.f32 %v6955_v3, %v2252_v32  ;;  %v2179_v23 = vmul.f32 %v2115_v2, %v1965_v56 }
 0x3b5   :  { %v2390_v17 = vmax.f32 %v2326_v28, 0.0  ;;  %v2253_v0 = vmul.f32 %v6935_v44, %v2178_v16  ;;  %v8794_v28 = vld [vmem:[#allocation60_spill] sm:$0xff] }
 0x3b6   :  { %v2391_v9 = vmax.f32 %v2327_v12, 0.0  ;;  %v2254_v39 = vmul.f32 %v6943_v42, %v2179_v23  ;;  %v1969_v6 = vpop.f32.mrb[150].mxu0  ;;  %v2122_v34 = vsub.f32 %v8794_v28, %v6856_v52  ;;  %v8795_v12 = vld [vmem:[#allocation59_spill] sm:$0xff] }
 0x3b7   :  { %v2180_v36 = vmul.f32 %v2116_v7, %v1969_v6  ;;  %v1971_v53 = vpop.f32.mrb[151].mxu0  ;;  %v2444_v60 = vpack.c.bf16 %v2390_v17, %v2388_v10  ;;  %v2328_v38 = vadd.f32 %v6949_v49, %v2253_v0  ;;  %v2123_v13 = vsub.f32 %v8795_v12, %v6858_v31  ;;  %v8797_v6 = vld [vmem:[#allocation61_spill] sm:$0xff]  ;;  %v8805_v12 = vld [vmem:[#allocation68_spill] sm:$0xff] }
 0x3b8   :  { %v2181_v55 = vmul.f32 %v2117_v8, %v1971_v53  ;;  %v2445_v48 = vpack.c.bf16 %v2391_v9, %v2389_v4  ;;  %v2329_v24 = vadd.f32 %v6955_v3, %v2254_v39  ;;  %v8796_v8 = vld [vmem:[#allocation62_spill] sm:$0xff] }
 0x3b9   :  { %v2255_v51 = vmul.f32 %v6935_v44, %v2180_v36  ;;  %v2392_v5 = vmax.f32 %v2328_v38, 0.0  ;;  %v2124_v4 = vsub.f32 %v8796_v8, %v6861_v1  ;;  %v2125_v36 = vsub.f32 %v8797_v6, %v6863_v30  ;;  %v8808_v6 = vld [vmem:[#allocation17_spill] sm:$0xff] }
 0x3ba   :  { %v2256_v50 = vmul.f32 %v6943_v42, %v2181_v55  ;;  %v1975_v43 = vpop.f32.mrb[152].mxu0  ;;  %2744 = vmatprep.mubr.bf16.mxu1 %v2445_v48  ;;  %v2393_v63 = vmax.f32 %v2329_v24, 0.0 }
 0x3bb   :  { %v2330_v57 = vadd.f32 %v6949_v49, %v2255_v51  ;;  %v2182_v54 = vmul.f32 %v2118_v61, %v1975_v43  ;;  %v1977_v19 = vpop.f32.mrb[153].mxu0  ;;  %2745 = vmatmul.mubr.bf16.gmra.mrb[144].mxu1 %v2444_v60  ;;  %v8799_v43 = vld [vmem:[#allocation63_spill] sm:$0xff] }
 0x3bc   :  { %v2331_v22 = vadd.f32 %v6955_v3, %v2256_v50  ;;  %v2183_v15 = vmul.f32 %v2119_v37, %v1977_v19  ;;  %v8798_v37 = vld [vmem:[#allocation64_spill] sm:$0xff]  ;;  %v2127_v30 = vsub.f32 %v8799_v43, %v6867_v29 }
 0x3bd   :  { %v2394_v11 = vmax.f32 %v2330_v57, 0.0  ;;  %v2257_v20 = vmul.f32 %v6935_v44, %v2182_v54  ;;  %v2126_v1 = vsub.f32 %v8798_v37, %v6865_v40 }
 0x3be   :  { %v2395_v45 = vmax.f32 %v2331_v22, 0.0  ;;  %v2258_v62 = vmul.f32 %v6943_v42, %v2183_v15  ;;  %v1981_v25 = vpop.f32.mrb[154].mxu0 }
 0x3bf   :  { %v2184_v26 = vmul.f32 %v2120_v18, %v1981_v25  ;;  %v1983_v2 = vpop.f32.mrb[155].mxu0  ;;  %v2446_v59 = vpack.c.bf16 %v2394_v11, %v2392_v5  ;;  %v2332_v16 = vadd.f32 %v6949_v49, %v2257_v20  ;;  %v8800_v5 = vld [vmem:[#allocation13_spill] sm:$0xff]  ;;  %v8801_v11 = vld [vmem:[#allocation66_spill] sm:$0xff] }
 0x3c0   :  { %v2185_v32 = vmul.f32 %v2121_v35, %v1983_v2  ;;  %v2447_v33 = vpack.c.bf16 %v2395_v45, %v2393_v63  ;;  %v2333_v23 = vadd.f32 %v6955_v3, %v2258_v62  ;;  %v2128_v20 = vsub.f32 %v8801_v11, %v8800_v5  ;;  %v8802_v63 = vld [vmem:[#allocation12_spill] sm:$0xff]  ;;  %v8803_v45 = vld [vmem:[#allocation65_spill] sm:$0xff] }
 0x3c1   :  { %v2259_v56 = vmul.f32 %v6935_v44, %v2184_v26  ;;  %v2396_v9 = vmax.f32 %v2332_v16, 0.0  ;;  %v2129_v62 = vsub.f32 %v8803_v45, %v8802_v63 }
 0x3c2   :  { %v2260_v47 = vmul.f32 %v6943_v42, %v2185_v32  ;;  %v1987_v7 = vpop.f32.mrb[156].mxu0  ;;  %2754 = vmatprep.mubr.bf16.mxu1 %v2447_v33  ;;  %v2397_v53 = vmax.f32 %v2333_v23, 0.0 }
 0x3c3   :  { %v2334_v10 = vadd.f32 %v6949_v49, %v2259_v56  ;;  %v2186_v17 = vmul.f32 %v2122_v34, %v1987_v7  ;;  %v1989_v0 = vpop.f32.mrb[157].mxu0  ;;  %2755 = vmatmul.mubr.bf16.gmra.mrb[148].mxu1 %v2446_v59  ;;  %v8804_v56 = vld [vmem:[#allocation15_spill] sm:$0xff]  ;;  %v8806_v7 = vld [vmem:[#allocation14_spill] sm:$0xff] }
 0x3c4   :  { %v2335_v52 = vadd.f32 %v6955_v3, %v2260_v47  ;;  %v2187_v46 = vmul.f32 %v2123_v13, %v1989_v0  ;;  %v2130_v13 = vsub.f32 %v8805_v12, %v8804_v56 }
 0x3c5   :  { %v2398_v39 = vmax.f32 %v2334_v10, 0.0  ;;  %v2261_v31 = vmul.f32 %v6935_v44, %v2186_v17  ;;  %v8807_v10 = vld [vmem:[#allocation67_spill] sm:$0xff] }
 0x3c6   :  { %v2399_v60 = vmax.f32 %v2335_v52, 0.0  ;;  %v2262_v55 = vmul.f32 %v6943_v42, %v2187_v46  ;;  %v1993_v48 = vpop.f32.mrb[158].mxu0  ;;  %v2131_v17 = vsub.f32 %v8807_v10, %v8806_v7 }
 0x3c7   :  { %v2188_v41 = vmul.f32 %v2124_v4, %v1993_v48  ;;  %v1995_v61 = vpop.f32.mrb[159].mxu0  ;;  %v2448_v38 = vpack.c.bf16 %v2398_v39, %v2396_v9  ;;  %v2336_v24 = vadd.f32 %v6949_v49, %v2261_v31 }
 0x3c8   :  { %v2189_v51 = vmul.f32 %v2125_v36, %v1995_v61  ;;  %v2449_v21 = vpack.c.bf16 %v2399_v60, %v2397_v53  ;;  %v2337_v57 = vadd.f32 %v6955_v3, %v2262_v55  ;;  %v8809_v36 = vld [vmem:[#allocation70_spill] sm:$0xff]  ;;  %v8811_v61 = vld [vmem:[#allocation69_spill] sm:$0xff] }
 0x3c9   :  { %v2263_v50 = vmul.f32 %v6935_v44, %v2188_v41  ;;  %v2400_v14 = vmax.f32 %v2336_v24, 0.0  ;;  %v2132_v53 = vsub.f32 %v8809_v36, %v8808_v6  ;;  %v8810_v41 = vld [vmem:[#allocation16_spill] sm:$0xff] }
 0x3ca   :  { %v2264_v54 = vmul.f32 %v6943_v42, %v2189_v51  ;;  %v1999_v19 = vpop.f32.mrb[160].mxu0  ;;  %2764 = vmatprep.mubr.bf16.mxu1 %v2449_v21  ;;  %v2401_v25 = vmax.f32 %v2337_v57, 0.0 }
 0x3cb   :  { %v2338_v22 = vadd.f32 %v6949_v49, %v2263_v50  ;;  %v2190_v15 = vmul.f32 %v2126_v1, %v1999_v19  ;;  %v2001_v27 = vpop.f32.mrb[161].mxu0  ;;  %2765 = vmatmul.mubr.bf16.gmra.mrb[152].mxu1 %v2448_v38  ;;  %v2133_v38 = vsub.f32 %v8811_v61, %v8810_v41  ;;  %v8813_v19 = vld [vmem:[#allocation72_spill] sm:$0xff] }
 0x3cc   :  { %v2339_v40 = vadd.f32 %v6955_v3, %v2264_v54  ;;  %v2191_v18 = vmul.f32 %v2127_v30, %v2001_v27  ;;  %v8812_v54 = vld [vmem:[#allocation19_spill] sm:$0xff] }
 0x3cd   :  { %v2402_v35 = vmax.f32 %v2338_v22, 0.0  ;;  %v2265_v29 = vmul.f32 %v6935_v44, %v2190_v15  ;;  %v2134_v22 = vsub.f32 %v8813_v19, %v8812_v54 }
 0x3ce   :  { %v2403_v26 = vmax.f32 %v2339_v40, 0.0  ;;  %v2266_v2 = vmul.f32 %v6943_v42, %v2191_v18  ;;  %v2005_v59 = vpop.f32.mrb[162].mxu0  ;;  %v8814_v40 = vld [vmem:[#allocation18_spill] sm:$0xff]  ;;  %v8815_v18 = vld [vmem:[#allocation71_spill] sm:$0xff] }
 0x3cf   :  { %v2192_v32 = vmul.f32 %v2128_v20, %v2005_v59  ;;  %v2007_v33 = vpop.f32.mrb[163].mxu0  ;;  %v2450_v28 = vpack.c.bf16 %v2402_v35, %v2400_v14  ;;  %v2340_v23 = vadd.f32 %v6949_v49, %v2265_v29  ;;  %v2135_v5 = vsub.f32 %v8815_v18, %v8814_v40 }
 0x3d0   :  { %v2193_v34 = vmul.f32 %v2129_v62, %v2007_v33  ;;  %v2451_v16 = vpack.c.bf16 %v2403_v26, %v2401_v25  ;;  %v2341_v0 = vadd.f32 %v6955_v3, %v2266_v2  ;;  %v8816_v25 = vld [vmem:[#allocation21_spill] sm:$0xff]  ;;  %v8817_v26 = vld [vmem:[#allocation74_spill] sm:$0xff] }
 0x3d1   :  { %v2267_v47 = vmul.f32 %v6935_v44, %v2192_v32  ;;  %v2404_v60 = vmax.f32 %v2340_v23, 0.0  ;;  %v2136_v2 = vsub.f32 %v8817_v26, %v8816_v25 }
 0x3d2   :  { %v2268_v52 = vmul.f32 %v6943_v42, %v2193_v34  ;;  %v2011_v46 = vpop.f32.mrb[164].mxu0  ;;  %2774 = vmatprep.mubr.bf16.mxu1 %v2451_v16  ;;  %v2405_v51 = vmax.f32 %v2341_v0, 0.0  ;;  %v8819_v34 = vld [vmem:[#allocation73_spill] sm:$0xff] }
 0x3d3   :  { %v2342_v8 = vadd.f32 %v6949_v49, %v2267_v47  ;;  %v2194_v4 = vmul.f32 %v2130_v13, %v2011_v46  ;;  %v2013_v9 = vpop.f32.mrb[165].mxu0  ;;  %2775 = vmatmul.mubr.bf16.gmra.mrb[156].mxu1 %v2450_v28  ;;  %v8818_v28 = vld [vmem:[#allocation20_spill] sm:$0xff] }
 0x3d4   :  { %v2343_v39 = vadd.f32 %v6955_v3, %v2268_v52  ;;  %v2195_v31 = vmul.f32 %v2131_v17, %v2013_v9  ;;  %v2137_v16 = vsub.f32 %v8819_v34, %v8818_v28  ;;  %v8820_v52 = vld [vmem:[#allocation23_spill] sm:$0xff]  ;;  %v8821_v46 = vld [vmem:[#allocation76_spill] sm:$0xff] }
 0x3d5   :  { %v2406_v55 = vmax.f32 %v2342_v8, 0.0  ;;  %v2269_v48 = vmul.f32 %v6935_v44, %v2194_v4  ;;  %v2138_v8 = vsub.f32 %v8821_v46, %v8820_v52 }
 0x3d6   :  { %v2407_v21 = vmax.f32 %v2343_v39, 0.0  ;;  %v2270_v37 = vmul.f32 %v6943_v42, %v2195_v31  ;;  %v2017_v1 = vpop.f32.mrb[166].mxu0  ;;  %v8822_v39 = vld [vmem:[#allocation22_spill] sm:$0xff]  ;;  %v8823_v31 = vld [vmem:[#allocation75_spill] sm:$0xff] }
 0x3d7   :  { %v2196_v24 = vmul.f32 %v2132_v53, %v2017_v1  ;;  %v2019_v50 = vpop.f32.mrb[167].mxu0  ;;  %v2452_v43 = vpack.c.bf16 %v2406_v55, %v2404_v60  ;;  %v2344_v15 = vadd.f32 %v6949_v49, %v2269_v48  ;;  %v2139_v6 = vsub.f32 %v8823_v31, %v8822_v39 }
 0x3d8   :  { %v2197_v30 = vmul.f32 %v2133_v38, %v2019_v50  ;;  %v2453_v57 = vpack.c.bf16 %v2407_v21, %v2405_v51  ;;  %v2345_v11 = vadd.f32 %v6955_v3, %v2270_v37  ;;  %v8824_v51 = vld [vmem:[#allocation25_spill] sm:$0xff]  ;;  %v8825_v21 = vld [vmem:[#allocation78_spill] sm:$0xff] }
 0x3d9   :  { %v2271_v27 = vmul.f32 %v6935_v44, %v2196_v24  ;;  %v2408_v59 = vmax.f32 %v2344_v15, 0.0  ;;  %v2140_v37 = vsub.f32 %v8825_v21, %v8824_v51 }
 0x3da   :  { %v2272_v20 = vmul.f32 %v6943_v42, %v2197_v30  ;;  %v2023_v14 = vpop.f32.mrb[168].mxu0  ;;  %2784 = vmatprep.mubr.bf16.mxu1 %v2453_v57  ;;  %v2409_v56 = vmax.f32 %v2345_v11, 0.0  ;;  %v8827_v30 = vld [vmem:[#allocation77_spill] sm:$0xff] }
 0x3db   :  { %v2346_v35 = vadd.f32 %v6949_v49, %v2271_v27  ;;  %v2198_v29 = vmul.f32 %v2134_v22, %v2023_v14  ;;  %v2025_v63 = vpop.f32.mrb[169].mxu0  ;;  %2785 = vmatmul.mubr.bf16.gmra.mrb[160].mxu1 %v2452_v43  ;;  %v8826_v43 = vld [vmem:[#allocation24_spill] sm:$0xff] }
 0x3dc   :  { %v2347_v45 = vadd.f32 %v6955_v3, %v2272_v20  ;;  %v2199_v62 = vmul.f32 %v2135_v5, %v2025_v63  ;;  %v2141_v57 = vsub.f32 %v8827_v30, %v8826_v43  ;;  %v8828_v20 = vld [vmem:[#allocation27_spill] sm:$0xff]  ;;  %v8829_v14 = vld [vmem:[#allocation80_spill] sm:$0xff] }
 0x3dd   :  { %v2410_v32 = vmax.f32 %v2346_v35, 0.0  ;;  %v2273_v33 = vmul.f32 %v6935_v44, %v2198_v29  ;;  %v2142_v35 = vsub.f32 %v8829_v14, %v8828_v20 }
 0x3de   :  { %v2411_v12 = vmax.f32 %v2347_v45, 0.0  ;;  %v2274_v13 = vmul.f32 %v6943_v42, %v2199_v62  ;;  %v2029_v23 = vpop.f32.mrb[170].mxu0  ;;  %v8830_v45 = vld [vmem:[#allocation26_spill] sm:$0xff]  ;;  %v8831_v62 = vld [vmem:[#allocation79_spill] sm:$0xff] }
 0x3df   :  { %v2200_v47 = vmul.f32 %v2136_v2, %v2029_v23  ;;  %v2031_v7 = vpop.f32.mrb[171].mxu0  ;;  %v2454_v10 = vpack.c.bf16 %v2410_v32, %v2408_v59  ;;  %v2348_v4 = vadd.f32 %v6949_v49, %v2273_v33  ;;  %v2143_v25 = vsub.f32 %v8831_v62, %v8830_v45 }
 0x3e0   :  { %v2201_v17 = vmul.f32 %v2137_v16, %v2031_v7  ;;  %v2455_v0 = vpack.c.bf16 %v2411_v12, %v2409_v56  ;;  %v2349_v36 = vadd.f32 %v6955_v3, %v2274_v13  ;;  %v8832_v56 = vld [vmem:[#allocation29_spill] sm:$0xff]  ;;  %v8833_v12 = vld [vmem:[#allocation82_spill] sm:$0xff] }
 0x3e1   :  { %v2275_v9 = vmul.f32 %v6935_v44, %v2200_v47  ;;  %v2412_v1 = vmax.f32 %v2348_v4, 0.0  ;;  %v2144_v13 = vsub.f32 %v8833_v12, %v8832_v56 }
 0x3e2   :  { %v2276_v53 = vmul.f32 %v6943_v42, %v2201_v17  ;;  %v2035_v60 = vpop.f32.mrb[172].mxu0  ;;  %2794 = vmatprep.mubr.bf16.mxu1 %v2455_v0  ;;  %v2413_v54 = vmax.f32 %v2349_v36, 0.0  ;;  %v8835_v17 = vld [vmem:[#allocation81_spill] sm:$0xff] }
 0x3e3   :  { %v2350_v55 = vadd.f32 %v6949_v49, %v2275_v9  ;;  %v2202_v48 = vmul.f32 %v2138_v8, %v2035_v60  ;;  %v2037_v41 = vpop.f32.mrb[173].mxu0  ;;  %2795 = vmatmul.mubr.bf16.gmra.mrb[164].mxu1 %v2454_v10  ;;  %v8834_v10 = vld [vmem:[#allocation28_spill] sm:$0xff] }
 0x3e4   :  { %v2351_v61 = vadd.f32 %v6955_v3, %v2276_v53  ;;  %v2203_v38 = vmul.f32 %v2139_v6, %v2037_v41  ;;  %v2145_v0 = vsub.f32 %v8835_v17, %v8834_v10  ;;  %v8836_v53 = vld [vmem:[#allocation31_spill] sm:$0xff]  ;;  %v8837_v60 = vld [vmem:[#allocation84_spill] sm:$0xff] }
 0x3e5   :  { %v2414_v24 = vmax.f32 %v2350_v55, 0.0  ;;  %v2277_v50 = vmul.f32 %v6935_v44, %v2202_v48  ;;  %v2146_v55 = vsub.f32 %v8837_v60, %v8836_v53 }
 0x3e6   :  { %v2415_v19 = vmax.f32 %v2351_v61, 0.0  ;;  %v2278_v22 = vmul.f32 %v6943_v42, %v2203_v38  ;;  %v2041_v15 = vpop.f32.mrb[174].mxu0  ;;  %v8838_v61 = vld [vmem:[#allocation30_spill] sm:$0xff]  ;;  %v8839_v38 = vld [vmem:[#allocation83_spill] sm:$0xff] }
 0x3e7   :  { %v2204_v27 = vmul.f32 %v2140_v37, %v2041_v15  ;;  %v2043_v40 = vpop.f32.mrb[175].mxu0  ;;  %v2456_v18 = vpack.c.bf16 %v2414_v24, %v2412_v1  ;;  %v2352_v29 = vadd.f32 %v6949_v49, %v2277_v50  ;;  %v2147_v51 = vsub.f32 %v8839_v38, %v8838_v61 }
 0x3e8   :  { %v2205_v5 = vmul.f32 %v2141_v57, %v2043_v40  ;;  %v2457_v11 = vpack.c.bf16 %v2415_v19, %v2413_v54  ;;  %v2353_v26 = vadd.f32 %v6955_v3, %v2278_v22  ;;  %v8840_v54 = vld [vmem:[#allocation33_spill] sm:$0xff]  ;;  %v8841_v19 = vld [vmem:[#allocation86_spill] sm:$0xff] }
 0x3e9   :  { %v2279_v63 = vmul.f32 %v6935_v44, %v2204_v27  ;;  %v2416_v23 = vmax.f32 %v2352_v29, 0.0  ;;  %v2148_v22 = vsub.f32 %v8841_v19, %v8840_v54 }
 0x3ea   :  { %v2280_v2 = vmul.f32 %v6943_v42, %v2205_v5  ;;  %v2047_v59 = vpop.f32.mrb[176].mxu0  ;;  %2804 = vmatprep.mubr.bf16.mxu1 %v2457_v11  ;;  %v2417_v52 = vmax.f32 %v2353_v26, 0.0  ;;  %v8843_v5 = vld [vmem:[#allocation85_spill] sm:$0xff] }
 0x3eb   :  { %v2354_v32 = vadd.f32 %v6949_v49, %v2279_v63  ;;  %v2206_v33 = vmul.f32 %v2142_v35, %v2047_v59  ;;  %v2049_v28 = vpop.f32.mrb[177].mxu0  ;;  %2805 = vmatmul.mubr.bf16.gmra.mrb[168].mxu1 %v2456_v18  ;;  %v8842_v18 = vld [vmem:[#allocation32_spill] sm:$0xff] }
 0x3ec   :  { %v2355_v34 = vadd.f32 %v6955_v3, %v2280_v2  ;;  %v2207_v16 = vmul.f32 %v2143_v25, %v2049_v28  ;;  %v2149_v11 = vsub.f32 %v8843_v5, %v8842_v18  ;;  %v8844_v2 = vld [vmem:[#allocation35_spill] sm:$0xff]  ;;  %v8845_v59 = vld [vmem:[#allocation88_spill] sm:$0xff] }
 0x3ed   :  { %v2418_v47 = vmax.f32 %v2354_v32, 0.0  ;;  %v2281_v7 = vmul.f32 %v6935_v44, %v2206_v33  ;;  %v2150_v32 = vsub.f32 %v8845_v59, %v8844_v2 }
 0x3ee   :  { %v2419_v46 = vmax.f32 %v2355_v34, 0.0  ;;  %v2282_v8 = vmul.f32 %v6943_v42, %v2207_v16  ;;  %v2053_v4 = vpop.f32.mrb[178].mxu0  ;;  %v8846_v34 = vld [vmem:[#allocation34_spill] sm:$0xff]  ;;  %v8847_v16 = vld [vmem:[#allocation87_spill] sm:$0xff] }
 0x3ef   :  { %v2208_v9 = vmul.f32 %v2144_v13, %v2053_v4  ;;  %v2055_v39 = vpop.f32.mrb[179].mxu0  ;;  %v2458_v31 = vpack.c.bf16 %v2418_v47, %v2416_v23  ;;  %v2356_v48 = vadd.f32 %v6949_v49, %v2281_v7  ;;  %v2151_v56 = vsub.f32 %v8847_v16, %v8846_v34 }
 0x3f0   :  { %v2209_v6 = vmul.f32 %v2145_v0, %v2055_v39  ;;  %v2459_v36 = vpack.c.bf16 %v2419_v46, %v2417_v52  ;;  %v2357_v21 = vadd.f32 %v6955_v3, %v2282_v8  ;;  %v8848_v52 = vld [vmem:[#allocation37_spill] sm:$0xff]  ;;  %v8849_v46 = vld [vmem:[#allocation90_spill] sm:$0xff] }
 0x3f1   :  { %v2283_v41 = vmul.f32 %v6935_v44, %v2208_v9  ;;  %v2420_v15 = vmax.f32 %v2356_v48, 0.0  ;;  %v2152_v8 = vsub.f32 %v8849_v46, %v8848_v52 }
 0x3f2   :  { %v2284_v37 = vmul.f32 %v6943_v42, %v2209_v6  ;;  %v2059_v1 = vpop.f32.mrb[180].mxu0  ;;  %2814 = vmatprep.mubr.bf16.mxu1 %v2459_v36  ;;  %v2421_v20 = vmax.f32 %v2357_v21, 0.0  ;;  %v8851_v6 = vld [vmem:[#allocation89_spill] sm:$0xff] }
 0x3f3   :  { %v2358_v24 = vadd.f32 %v6949_v49, %v2283_v41  ;;  %v2210_v50 = vmul.f32 %v2146_v55, %v2059_v1  ;;  %v2061_v43 = vpop.f32.mrb[181].mxu0  ;;  %2815 = vmatmul.mubr.bf16.gmra.mrb[172].mxu1 %v2458_v31  ;;  %v8850_v31 = vld [vmem:[#allocation36_spill] sm:$0xff] }
 0x3f4   :  { %v2359_v30 = vadd.f32 %v6955_v3, %v2284_v37  ;;  %v2211_v57 = vmul.f32 %v2147_v51, %v2061_v43  ;;  %v2153_v36 = vsub.f32 %v8851_v6, %v8850_v31  ;;  %v8852_v37 = vld [vmem:[#allocation39_spill] sm:$0xff]  ;;  %v8853_v1 = vld [vmem:[#allocation92_spill] sm:$0xff] }
 0x3f5   :  { %v2422_v27 = vmax.f32 %v2358_v24, 0.0  ;;  %v2285_v40 = vmul.f32 %v6935_v44, %v2210_v50  ;;  %v2154_v24 = vsub.f32 %v8853_v1, %v8852_v37 }
 0x3f6   :  { %v2423_v14 = vmax.f32 %v2359_v30, 0.0  ;;  %v2286_v35 = vmul.f32 %v6943_v42, %v2211_v57  ;;  %v2065_v29 = vpop.f32.mrb[182].mxu0  ;;  %v8854_v30 = vld [vmem:[#allocation38_spill] sm:$0xff]  ;;  %v8855_v57 = vld [vmem:[#allocation91_spill] sm:$0xff] }
 0x3f7   :  { %v2212_v63 = vmul.f32 %v2148_v22, %v2065_v29  ;;  %v2067_v45 = vpop.f32.mrb[183].mxu0  ;;  %v2460_v62 = vpack.c.bf16 %v2422_v27, %v2420_v15  ;;  %v2360_v33 = vadd.f32 %v6949_v49, %v2285_v40  ;;  %v2155_v54 = vsub.f32 %v8855_v57, %v8854_v30 }
 0x3f8   :  { %v2213_v25 = vmul.f32 %v2149_v11, %v2067_v45  ;;  %v2461_v26 = vpack.c.bf16 %v2423_v14, %v2421_v20  ;;  %v2361_v12 = vadd.f32 %v6955_v3, %v2286_v35  ;;  %v8856_v20 = vld [vmem:[#allocation41_spill] sm:$0xff]  ;;  %v8857_v14 = vld [vmem:[#allocation94_spill] sm:$0xff] }
 0x3f9   :  { %v2287_v28 = vmul.f32 %v6935_v44, %v2212_v63  ;;  %v2424_v4 = vmax.f32 %v2360_v33, 0.0  ;;  %v2156_v35 = vsub.f32 %v8857_v14, %v8856_v20 }
 0x3fa   :  { %v2288_v13 = vmul.f32 %v6943_v42, %v2213_v25  ;;  %v2071_v23 = vpop.f32.mrb[184].mxu0  ;;  %2824 = vmatprep.mubr.bf16.mxu1 %v2461_v26  ;;  %v2425_v53 = vmax.f32 %v2361_v12, 0.0  ;;  %v8859_v25 = vld [vmem:[#allocation93_spill] sm:$0xff] }
 0x3fb   :  { %v2362_v47 = vadd.f32 %v6949_v49, %v2287_v28  ;;  %v2214_v7 = vmul.f32 %v2150_v32, %v2071_v23  ;;  %v2073_v10 = vpop.f32.mrb[185].mxu0  ;;  %2825 = vmatmul.mubr.bf16.gmra.mrb[176].mxu1 %v2460_v62  ;;  %v8858_v62 = vld [vmem:[#allocation40_spill] sm:$0xff] }
 0x3fc   :  { %v2363_v17 = vadd.f32 %v6955_v3, %v2288_v13  ;;  %v2215_v0 = vmul.f32 %v2151_v56, %v2073_v10  ;;  %v2157_v26 = vsub.f32 %v8859_v25, %v8858_v62 }
 0x3fd   :  { %v2426_v9 = vmax.f32 %v2362_v47, 0.0  ;;  %v2289_v39 = vmul.f32 %v6935_v44, %v2214_v7 }
 0x3fe   :  { %v2427_v60 = vmax.f32 %v2363_v17, 0.0  ;;  %v2290_v55 = vmul.f32 %v6943_v42, %v2215_v0  ;;  %v2077_v48 = vpop.f32.mrb[186].mxu0 }
 0x3ff   :  { %v2216_v41 = vmul.f32 %v2152_v8, %v2077_v48  ;;  %v2079_v61 = vpop.f32.mrb[187].mxu0  ;;  %v2462_v38 = vpack.c.bf16 %v2426_v9, %v2424_v4  ;;  %v2364_v50 = vadd.f32 %v6949_v49, %v2289_v39  ;;  %v8860_v39 = vmov 0.0  }
 0x400   :  { %v2217_v51 = vmul.f32 %v2153_v36, %v2079_v61  ;;  %v2463_v21 = vpack.c.bf16 %v2427_v60, %v2425_v53  ;;  %v2365_v19 = vadd.f32 %v6955_v3, %v2290_v55 }
 0x401   :  { %v2291_v43 = vmul.f32 %v6935_v44, %v2216_v41  ;;  %v2428_v29 = vmax.f32 %v2364_v50, 0.0 }
 0x402   :  { %v2292_v22 = vmul.f32 %v6943_v42, %v2217_v51  ;;  %v2083_v15 = vpop.f32.mrb[188].mxu0  ;;  %2834 = vmatprep.mubr.bf16.mxu1 %v2463_v21  ;;  %v2429_v2 = vmax.f32 %v2365_v19, 0.0 }
 0x403   :  { %v2366_v27 = vadd.f32 %v6949_v49, %v2291_v43  ;;  %v2218_v40 = vmul.f32 %v2154_v24, %v2083_v15  ;;  %v2085_v18 = vpop.f32.mrb[189].mxu0  ;;  %2835 = vmatmul.mubr.bf16.gmra.mrb[180].mxu1 %v2462_v38 }
 0x404   :  { %v2367_v5 = vadd.f32 %v6955_v3, %v2292_v22  ;;  %v2219_v11 = vmul.f32 %v2155_v54, %v2085_v18 }
 0x405   :  { %v2430_v63 = vmax.f32 %v2366_v27, 0.0  ;;  %v2293_v45 = vmul.f32 %v6935_v44, %v2218_v40 }
 0x406   :  { %v2431_v59 = vmax.f32 %v2367_v5, 0.0  ;;  %v2294_v32 = vmul.f32 %v6943_v42, %v2219_v11  ;;  %v2089_v33 = vpop.f32.mrb[190].mxu0 }
 0x407   :  { %v2220_v28 = vmul.f32 %v2156_v35, %v2089_v33  ;;  %v2091_v34 = vpop.f32.mrb[191].mxu0  ;;  %v2464_v16 = vpack.c.bf16 %v2430_v63, %v2428_v29  ;;  %v2368_v13 = vadd.f32 %v6949_v49, %v2293_v45 }
 0x408   :  { %v2221_v56 = vmul.f32 %v2157_v26, %v2091_v34  ;;  %v2465_v12 = vpack.c.bf16 %v2431_v59, %v2429_v2  ;;  %v2369_v47 = vadd.f32 %v6955_v3, %v2294_v32 }
 0x409   :  { %v2295_v23 = vmul.f32 %v6935_v44, %v2220_v28  ;;  %v2432_v0 = vmax.f32 %v2368_v13, 0.0 }
 0x40a   :  { %v2296_v7 = vmul.f32 %v6943_v42, %v2221_v56  ;;  %2844 = vmatprep.mubr.bf16.mxu1 %v2465_v12  ;;  %v2433_v46 = vmax.f32 %v2369_v47, 0.0  ;;  %v2500_v42 = vld [vmem:[%s8310_s6] sm:$0x3] }
 0x40b   :  { %v2370_v10 = vadd.f32 %v6949_v49, %v2295_v23  ;;  %2845 = vmatmul.mubr.bf16.gmra.mrb[184].mxu1 %v2464_v16  ;;  %v7211_v44 = vrot.slane %v2500_v42, %v8779_v58  ;;  %v8861_v49 = vld [vmem:[#allocation45_spill] sm:$0xff] }
 0x40c   :  { %v2371_v17 = vadd.f32 %v6955_v3, %v2296_v7  ;;  %v7214_v31 = vrot.slane %v2500_v42, %v8861_v49 }
 0x40d   :  { %v2434_v52 = vmax.f32 %v2370_v10, 0.0 }
 0x40e   :  { %v2435_v8 = vmax.f32 %v2371_v17, 0.0 }
 0x40f   :  { %v2466_v4 = vpack.c.bf16 %v2434_v52, %v2432_v0 }
 0x410   :  { %v2467_v9 = vpack.c.bf16 %v2435_v8, %v2433_v46 }
 0x412   :  { %2854 = vmatprep.mubr.bf16.mxu1 %v2467_v9 }
 0x413   :  { %2855 = vmatmul.mubr.bf16.gmra.mrb[188].mxu1 %v2466_v4 }
 0x414   :  { %3796 = vmatprep.mubr.f32.mxu1 %v8860_v39 }
 0x46e   :  { %v2706_v3 = vpop.f32.mrb[128].mxu1 }
 0x46f   :  { %v2708_v6 = vpop.f32.mrb[129].mxu1  ;;  %v7220_v60 = vadd.f32 %v2706_v3, %v7214_v31 }
 0x470   :  { %v7217_v36 = vadd.f32 %v2708_v6, %v7211_v44  ;;  %v2710_v53 = vpop.f32.mrb[130].mxu1 }
 0x471   :  { %v2712_v55 = vpop.f32.mrb[131].mxu1  ;;  %v7229_v41 = vadd.f32 %v2710_v53, %v7214_v31 }
 0x472   :  { %v7223_v48 = vadd.f32 %v2712_v55, %v7211_v44  ;;  %2995 = vmatprep.mubr.f32.mxu0 %v7217_v36 }
 0x473   :  { %2996 = vmatmul.mubr.f32.vlgmr.msra.gmra.mrb[192].mxu0 %v7220_v60 }
 0x474   :  { %3000 = vmatprep.mubr.f32.mxu0 %v7223_v48 }
 0x476   :  { %v2716_v61 = vpop.f32.mrb[132].mxu1 }
 0x477   :  { %v2718_v38 = vpop.f32.mrb[133].mxu1  ;;  %3001 = vmatmul.mubr.f32.gmra.mrb[194].mxu0 %v7229_v41  ;;  %v7236_v37 = vadd.f32 %v2716_v61, %v7214_v31 }
 0x478   :  { %v7233_v51 = vadd.f32 %v2718_v38, %v7211_v44  ;;  %v2720_v21 = vpop.f32.mrb[134].mxu1 }
 0x479   :  { %v2722_v1 = vpop.f32.mrb[135].mxu1  ;;  %v7245_v50 = vadd.f32 %v2720_v21, %v7214_v31 }
 0x47a   :  { %v7239_v24 = vadd.f32 %v2722_v1, %v7211_v44  ;;  %3005 = vmatprep.mubr.f32.mxu0 %v7233_v51 }
 0x47b   :  { %3006 = vmatmul.mubr.f32.gmra.mrb[196].mxu0 %v7236_v37 }
 0x47c   :  { %3010 = vmatprep.mubr.f32.mxu0 %v7239_v24 }
 0x47e   :  { %v2726_v43 = vpop.f32.mrb[136].mxu1 }
 0x47f   :  { %v2728_v30 = vpop.f32.mrb[137].mxu1  ;;  %3011 = vmatmul.mubr.f32.gmra.mrb[198].mxu0 %v7245_v50  ;;  %v7252_v19 = vadd.f32 %v2726_v43, %v7214_v31 }
 0x480   :  { %v7249_v57 = vadd.f32 %v2728_v30, %v7211_v44  ;;  %v2730_v54 = vpop.f32.mrb[138].mxu1 }
 0x481   :  { %v2732_v22 = vpop.f32.mrb[139].mxu1  ;;  %v7261_v27 = vadd.f32 %v2730_v54, %v7214_v31 }
 0x482   :  { %v7255_v15 = vadd.f32 %v2732_v22, %v7211_v44  ;;  %3015 = vmatprep.mubr.f32.mxu0 %v7249_v57 }
 0x483   :  { %3016 = vmatmul.mubr.f32.gmra.mrb[200].mxu0 %v7252_v19 }
 0x484   :  { %3020 = vmatprep.mubr.f32.mxu0 %v7255_v15 }
 0x486   :  { %v2736_v40 = vpop.f32.mrb[140].mxu1 }
 0x487   :  { %v2738_v18 = vpop.f32.mrb[141].mxu1  ;;  %3021 = vmatmul.mubr.f32.gmra.mrb[202].mxu0 %v7261_v27  ;;  %v7268_v20 = vadd.f32 %v2736_v40, %v7214_v31 }
 0x488   :  { %v7265_v5 = vadd.f32 %v2738_v18, %v7211_v44  ;;  %v2740_v11 = vpop.f32.mrb[142].mxu1 }
 0x489   :  { %v2742_v14 = vpop.f32.mrb[143].mxu1  ;;  %v7277_v29 = vadd.f32 %v2740_v11, %v7214_v31 }
 0x48a   :  { %v7271_v35 = vadd.f32 %v2742_v14, %v7211_v44  ;;  %3025 = vmatprep.mubr.f32.mxu0 %v7265_v5 }
 0x48b   :  { %3026 = vmatmul.mubr.f32.gmra.mrb[204].mxu0 %v7268_v20 }
 0x48c   :  { %8862 = vst [vmem:[#allocation42_spill] sm:$0xff] %v7271_v35  ;;  %3030 = vmatprep.mubr.f32.mxu0 %v7271_v35 }
 0x48e   :  { %v2746_v63 = vpop.f32.mrb[144].mxu1 }
 0x48f   :  { %v2748_v45 = vpop.f32.mrb[145].mxu1  ;;  %3031 = vmatmul.mubr.f32.gmra.mrb[206].mxu0 %v7277_v29  ;;  %v7284_v26 = vadd.f32 %v2746_v63, %v7214_v31 }
 0x490   :  { %v7281_v62 = vadd.f32 %v2748_v45, %v7211_v44  ;;  %v2750_v25 = vpop.f32.mrb[146].mxu1 }
 0x491   :  { %8864 = vst [vmem:[#allocation46_spill] sm:$0xff] %v7284_v26  ;;  %v2752_v2 = vpop.f32.mrb[147].mxu1  ;;  %v7293_v32 = vadd.f32 %v2750_v25, %v7214_v31 }
 0x492   :  { %8863 = vst [vmem:[#allocation43_spill] sm:$0xff] %v7281_v62  ;;  %v7287_v59 = vadd.f32 %v2752_v2, %v7211_v44  ;;  %3035 = vmatprep.mubr.f32.mxu0 %v7281_v62 }
 0x493   :  { %3036 = vmatmul.mubr.f32.gmra.mrb[208].mxu0 %v7284_v26  ;;  %8866 = vst [vmem:[#allocation47_spill] sm:$0xff] %v7293_v32 }
 0x494   :  { %8865 = vst [vmem:[#allocation48_spill] sm:$0xff] %v7287_v59  ;;  %3040 = vmatprep.mubr.f32.mxu0 %v7287_v59 }
 0x496   :  { %v2756_v33 = vpop.f32.mrb[148].mxu1 }
 0x497   :  { %v2758_v28 = vpop.f32.mrb[149].mxu1  ;;  %3041 = vmatmul.mubr.f32.gmra.mrb[210].mxu0 %v7293_v32  ;;  %v7300_v56 = vadd.f32 %v2756_v33, %v7214_v31 }
 0x498   :  { %v7297_v34 = vadd.f32 %v2758_v28, %v7211_v44  ;;  %v2760_v16 = vpop.f32.mrb[150].mxu1 }
 0x499   :  { %8868 = vst [vmem:[#allocation49_spill] sm:$0xff] %v7300_v56  ;;  %v2762_v12 = vpop.f32.mrb[151].mxu1  ;;  %v7309_v23 = vadd.f32 %v2760_v16, %v7214_v31 }
 0x49a   :  { %8867 = vst [vmem:[#allocation50_spill] sm:$0xff] %v7297_v34  ;;  %v7303_v13 = vadd.f32 %v2762_v12, %v7211_v44  ;;  %3045 = vmatprep.mubr.f32.mxu0 %v7297_v34 }
 0x49b   :  { %3046 = vmatmul.mubr.f32.gmra.mrb[212].mxu0 %v7300_v56  ;;  %8870 = vst [vmem:[#allocation51_spill] sm:$0xff] %v7309_v23 }
 0x49c   :  { %8869 = vst [vmem:[#allocation52_spill] sm:$0xff] %v7303_v13  ;;  %3050 = vmatprep.mubr.f32.mxu0 %v7303_v13 }
 0x49e   :  { %v2766_v47 = vpop.f32.mrb[152].mxu1 }
 0x49f   :  { %v2768_v7 = vpop.f32.mrb[153].mxu1  ;;  %3051 = vmatmul.mubr.f32.gmra.mrb[214].mxu0 %v7309_v23  ;;  %v7316_v0 = vadd.f32 %v2766_v47, %v7214_v31 }
 0x4a0   :  { %v7313_v10 = vadd.f32 %v2768_v7, %v7211_v44  ;;  %v2770_v17 = vpop.f32.mrb[154].mxu1 }
 0x4a1   :  { %8872 = vst [vmem:[#allocation53_spill] sm:$0xff] %v7316_v0  ;;  %v2772_v52 = vpop.f32.mrb[155].mxu1  ;;  %v7325_v8 = vadd.f32 %v2770_v17, %v7214_v31 }
 0x4a2   :  { %8871 = vst [vmem:[#allocation54_spill] sm:$0xff] %v7313_v10  ;;  %v7319_v46 = vadd.f32 %v2772_v52, %v7211_v44  ;;  %3055 = vmatprep.mubr.f32.mxu0 %v7313_v10 }
 0x4a3   :  { %3056 = vmatmul.mubr.f32.gmra.mrb[216].mxu0 %v7316_v0  ;;  %8874 = vst [vmem:[#allocation55_spill] sm:$0xff] %v7325_v8 }
 0x4a4   :  { %8873 = vst [vmem:[#allocation56_spill] sm:$0xff] %v7319_v46  ;;  %3060 = vmatprep.mubr.f32.mxu0 %v7319_v46 }
 0x4a6   :  { %v2776_v4 = vpop.f32.mrb[156].mxu1 }
 0x4a7   :  { %v2778_v9 = vpop.f32.mrb[157].mxu1  ;;  %3061 = vmatmul.mubr.f32.gmra.mrb[218].mxu0 %v7325_v8  ;;  %v7332_v6 = vadd.f32 %v2776_v4, %v7214_v31 }
 0x4a8   :  { %v7329_v42 = vadd.f32 %v2778_v9, %v7211_v44  ;;  %v2780_v3 = vpop.f32.mrb[158].mxu1 }
 0x4a9   :  { %8876 = vst [vmem:[#allocation57_spill] sm:$0xff] %v7332_v6  ;;  %v2782_v53 = vpop.f32.mrb[159].mxu1  ;;  %v7341_v61 = vadd.f32 %v2780_v3, %v7214_v31 }
 0x4aa   :  { %8875 = vst [vmem:[#allocation58_spill] sm:$0xff] %v7329_v42  ;;  %v7335_v55 = vadd.f32 %v2782_v53, %v7211_v44  ;;  %3065 = vmatprep.mubr.f32.mxu0 %v7329_v42 }
 0x4ab   :  { %3066 = vmatmul.mubr.f32.gmra.mrb[220].mxu0 %v7332_v6  ;;  %8878 = vst [vmem:[#allocation59_spill] sm:$0xff] %v7341_v61 }
 0x4ac   :  { %8877 = vst [vmem:[#allocation60_spill] sm:$0xff] %v7335_v55  ;;  %3070 = vmatprep.mubr.f32.mxu0 %v7335_v55 }
 0x4ae   :  { %v2786_v38 = vpop.f32.mrb[160].mxu1 }
 0x4af   :  { %v2788_v21 = vpop.f32.mrb[161].mxu1  ;;  %3071 = vmatmul.mubr.f32.gmra.mrb[222].mxu0 %v7341_v61  ;;  %v7348_v30 = vadd.f32 %v2786_v38, %v7214_v31 }
 0x4b0   :  { %v7345_v1 = vadd.f32 %v2788_v21, %v7211_v44  ;;  %v2790_v43 = vpop.f32.mrb[162].mxu1 }
 0x4b1   :  { %8880 = vst [vmem:[#allocation61_spill] sm:$0xff] %v7348_v30  ;;  %v2792_v54 = vpop.f32.mrb[163].mxu1  ;;  %v7357_v40 = vadd.f32 %v2790_v43, %v7214_v31 }
 0x4b2   :  { %8879 = vst [vmem:[#allocation62_spill] sm:$0xff] %v7345_v1  ;;  %v7351_v22 = vadd.f32 %v2792_v54, %v7211_v44  ;;  %3075 = vmatprep.mubr.f32.mxu0 %v7345_v1 }
 0x4b3   :  { %3076 = vmatmul.mubr.f32.gmra.mrb[224].mxu0 %v7348_v30  ;;  %8882 = vst [vmem:[#allocation63_spill] sm:$0xff] %v7357_v40 }
 0x4b4   :  { %8881 = vst [vmem:[#allocation64_spill] sm:$0xff] %v7351_v22  ;;  %3080 = vmatprep.mubr.f32.mxu0 %v7351_v22 }
 0x4b6   :  { %v2796_v18 = vpop.f32.mrb[164].mxu1 }
 0x4b7   :  { %v2798_v11 = vpop.f32.mrb[165].mxu1  ;;  %3081 = vmatmul.mubr.f32.gmra.mrb[226].mxu0 %v7357_v40  ;;  %v7364_v45 = vadd.f32 %v2796_v18, %v7214_v31 }
 0x4b8   :  { %v7361_v14 = vadd.f32 %v2798_v11, %v7211_v44  ;;  %v2800_v63 = vpop.f32.mrb[166].mxu1 }
 0x4b9   :  { %8884 = vst [vmem:[#allocation66_spill] sm:$0xff] %v7364_v45  ;;  %v2802_v25 = vpop.f32.mrb[167].mxu1  ;;  %v7373_v33 = vadd.f32 %v2800_v63, %v7214_v31 }
 0x4ba   :  { %8883 = vst [vmem:[#allocation13_spill] sm:$0xff] %v7361_v14  ;;  %v7367_v2 = vadd.f32 %v2802_v25, %v7211_v44  ;;  %3085 = vmatprep.mubr.f32.mxu0 %v7361_v14 }
 0x4bb   :  { %3086 = vmatmul.mubr.f32.gmra.mrb[228].mxu0 %v7364_v45  ;;  %8886 = vst [vmem:[#allocation65_spill] sm:$0xff] %v7373_v33 }
 0x4bc   :  { %8885 = vst [vmem:[#allocation12_spill] sm:$0xff] %v7367_v2  ;;  %3090 = vmatprep.mubr.f32.mxu0 %v7367_v2 }
 0x4be   :  { %v2806_v28 = vpop.f32.mrb[168].mxu1 }
 0x4bf   :  { %v2808_v16 = vpop.f32.mrb[169].mxu1  ;;  %3091 = vmatmul.mubr.f32.gmra.mrb[230].mxu0 %v7373_v33  ;;  %v7380_v7 = vadd.f32 %v2806_v28, %v7214_v31 }
 0x4c0   :  { %v7377_v12 = vadd.f32 %v2808_v16, %v7211_v44  ;;  %v2810_v47 = vpop.f32.mrb[170].mxu1 }
 0x4c1   :  { %8888 = vst [vmem:[#allocation68_spill] sm:$0xff] %v7380_v7  ;;  %v2812_v17 = vpop.f32.mrb[171].mxu1  ;;  %v7389_v4 = vadd.f32 %v2810_v47, %v7214_v31 }
 0x4c2   :  { %8887 = vst [vmem:[#allocation15_spill] sm:$0xff] %v7377_v12  ;;  %v7383_v52 = vadd.f32 %v2812_v17, %v7211_v44  ;;  %3095 = vmatprep.mubr.f32.mxu0 %v7377_v12 }
 0x4c3   :  { %3096 = vmatmul.mubr.f32.gmra.mrb[232].mxu0 %v7380_v7  ;;  %8890 = vst [vmem:[#allocation67_spill] sm:$0xff] %v7389_v4 }
 0x4c4   :  { %8889 = vst [vmem:[#allocation14_spill] sm:$0xff] %v7383_v52  ;;  %3100 = vmatprep.mubr.f32.mxu0 %v7383_v52 }
 0x4c6   :  { %v2816_v9 = vpop.f32.mrb[172].mxu1 }
 0x4c7   :  { %v2818_v3 = vpop.f32.mrb[173].mxu1  ;;  %3101 = vmatmul.mubr.f32.gmra.mrb[234].mxu0 %v7389_v4  ;;  %v7396_v21 = vadd.f32 %v2816_v9, %v7214_v31 }
 0x4c8   :  { %v7393_v53 = vadd.f32 %v2818_v3, %v7211_v44  ;;  %v2820_v38 = vpop.f32.mrb[174].mxu1 }
 0x4c9   :  { %8892 = vst [vmem:[#allocation70_spill] sm:$0xff] %v7396_v21  ;;  %v2822_v43 = vpop.f32.mrb[175].mxu1  ;;  %v7405_v18 = vadd.f32 %v2820_v38, %v7214_v31 }
 0x4ca   :  { %8891 = vst [vmem:[#allocation17_spill] sm:$0xff] %v7393_v53  ;;  %v7399_v54 = vadd.f32 %v2822_v43, %v7211_v44  ;;  %3105 = vmatprep.mubr.f32.mxu0 %v7393_v53 }
 0x4cb   :  { %3106 = vmatmul.mubr.f32.gmra.mrb[236].mxu0 %v7396_v21  ;;  %8894 = vst [vmem:[#allocation69_spill] sm:$0xff] %v7405_v18 }
 0x4cc   :  { %8893 = vst [vmem:[#allocation16_spill] sm:$0xff] %v7399_v54  ;;  %3110 = vmatprep.mubr.f32.mxu0 %v7399_v54 }
 0x4ce   :  { %v2826_v11 = vpop.f32.mrb[176].mxu1 }
 0x4cf   :  { %v2828_v63 = vpop.f32.mrb[177].mxu1  ;;  %3111 = vmatmul.mubr.f32.gmra.mrb[238].mxu0 %v7405_v18  ;;  %v7412_v16 = vadd.f32 %v2826_v11, %v7214_v31 }
 0x4d0   :  { %v7409_v25 = vadd.f32 %v2828_v63, %v7211_v44  ;;  %v2830_v28 = vpop.f32.mrb[178].mxu1 }
 0x4d1   :  { %8896 = vst [vmem:[#allocation72_spill] sm:$0xff] %v7412_v16  ;;  %v2832_v47 = vpop.f32.mrb[179].mxu1  ;;  %v7421_v9 = vadd.f32 %v2830_v28, %v7214_v31 }
 0x4d2   :  { %8895 = vst [vmem:[#allocation19_spill] sm:$0xff] %v7409_v25  ;;  %v7415_v17 = vadd.f32 %v2832_v47, %v7211_v44  ;;  %3115 = vmatprep.mubr.f32.mxu0 %v7409_v25 }
 0x4d3   :  { %3116 = vmatmul.mubr.f32.gmra.mrb[240].mxu0 %v7412_v16  ;;  %8898 = vst [vmem:[#allocation71_spill] sm:$0xff] %v7421_v9 }
 0x4d4   :  { %8897 = vst [vmem:[#allocation18_spill] sm:$0xff] %v7415_v17  ;;  %3120 = vmatprep.mubr.f32.mxu0 %v7415_v17 }
 0x4d6   :  { %v2836_v3 = vpop.f32.mrb[180].mxu1 }
 0x4d7   :  { %v2838_v38 = vpop.f32.mrb[181].mxu1  ;;  %3121 = vmatmul.mubr.f32.gmra.mrb[242].mxu0 %v7421_v9  ;;  %v7428_v63 = vadd.f32 %v2836_v3, %v7214_v31 }
 0x4d8   :  { %v7425_v43 = vadd.f32 %v2838_v38, %v7211_v44  ;;  %v2840_v11 = vpop.f32.mrb[182].mxu1 }
 0x4d9   :  { %8900 = vst [vmem:[#allocation74_spill] sm:$0xff] %v7428_v63  ;;  %v2842_v47 = vpop.f32.mrb[183].mxu1  ;;  %v7437_v28 = vadd.f32 %v2840_v11, %v7214_v31 }
 0x4da   :  { %8899 = vst [vmem:[#allocation21_spill] sm:$0xff] %v7425_v43  ;;  %v7431_v58 = vadd.f32 %v2842_v47, %v7211_v44  ;;  %3125 = vmatprep.mubr.f32.mxu0 %v7425_v43 }
 0x4db   :  { %3126 = vmatmul.mubr.f32.gmra.mrb[244].mxu0 %v7428_v63  ;;  %8902 = vst [vmem:[#allocation73_spill] sm:$0xff] %v7437_v28 }
 0x4dc   :  { %8901 = vst [vmem:[#allocation20_spill] sm:$0xff] %v7431_v58  ;;  %3130 = vmatprep.mubr.f32.mxu0 %v7431_v58 }
 0x4de   :  { %v2846_v49 = vpop.f32.mrb[184].mxu1 }
 0x4df   :  { %v2848_v38 = vpop.f32.mrb[185].mxu1  ;;  %3131 = vmatmul.mubr.f32.gmra.mrb[246].mxu0 %v7437_v28  ;;  %v7444_v47 = vadd.f32 %v2846_v49, %v7214_v31 }
 0x4e0   :  { %v7441_v3 = vadd.f32 %v2848_v38, %v7211_v44  ;;  %v2850_v9 = vpop.f32.mrb[186].mxu1 }
 0x4e1   :  { %8904 = vst [vmem:[#allocation76_spill] sm:$0xff] %v7444_v47  ;;  %v2852_v17 = vpop.f32.mrb[187].mxu1  ;;  %v7453_v11 = vadd.f32 %v2850_v9, %v7214_v31 }
 0x4e2   :  { %8903 = vst [vmem:[#allocation23_spill] sm:$0xff] %v7441_v3  ;;  %v7447_v43 = vadd.f32 %v2852_v17, %v7211_v44  ;;  %3135 = vmatprep.mubr.f32.mxu0 %v7441_v3 }
 0x4e3   :  { %3136 = vmatmul.mubr.f32.gmra.mrb[248].mxu0 %v7444_v47  ;;  %8906 = vst [vmem:[#allocation75_spill] sm:$0xff] %v7453_v11 }
 0x4e4   :  { %8905 = vst [vmem:[#allocation22_spill] sm:$0xff] %v7447_v43  ;;  %3140 = vmatprep.mubr.f32.mxu0 %v7447_v43 }
 0x4e6   :  { %v2856_v28 = vpop.f32.mrb[188].mxu1 }
 0x4e7   :  { %v2858_v38 = vpop.f32.mrb[189].mxu1  ;;  %3141 = vmatmul.mubr.f32.gmra.mrb[250].mxu0 %v7453_v11  ;;  %v7460_v17 = vadd.f32 %v2856_v28, %v7214_v31  ;;  %v2867_v28 = vmul.f32 %v7220_v60, %v7220_v60 }
 0x4e8   :  { %v7457_v49 = vadd.f32 %v2858_v38, %v7211_v44  ;;  %v2860_v58 = vpop.f32.mrb[190].mxu1  ;;  %v2868_v38 = vmul.f32 %v7217_v36, %v7217_v36 }
 0x4e9   :  { %8908 = vst [vmem:[#allocation78_spill] sm:$0xff] %v7460_v17  ;;  %v2862_v63 = vpop.f32.mrb[191].mxu1  ;;  %v7469_v9 = vadd.f32 %v2860_v58, %v7214_v31  ;;  %v2872_v58 = vmul.f32 %v7233_v51, %v7233_v51  ;;  %v2871_v31 = vmul.f32 %v7236_v37, %v7236_v37 }
 0x4ea   :  { %8907 = vst [vmem:[#allocation25_spill] sm:$0xff] %v7457_v49  ;;  %v7463_v3 = vadd.f32 %v2862_v63, %v7211_v44  ;;  %3145 = vmatprep.mubr.f32.mxu0 %v7457_v49  ;;  %v2870_v44 = vmul.f32 %v7223_v48, %v7223_v48  ;;  %v2869_v63 = vmul.f32 %v7229_v41, %v7229_v41 }
 0x4eb   :  { %3146 = vmatmul.mubr.f32.gmra.mrb[252].mxu0 %v7460_v17  ;;  %8910 = vst [vmem:[#allocation77_spill] sm:$0xff] %v7469_v9 }
 0x4ec   :  { %8909 = vst [vmem:[#allocation24_spill] sm:$0xff] %v7463_v3  ;;  %3150 = vmatprep.mubr.f32.mxu0 %v7463_v3 }
 0x4ef   :  { %3151 = vmatmul.mubr.f32.gmra.mrb[254].mxu0 %v7469_v9 }
 0x4f0   :  { %3155 = vmatprep.mubr.f32.mxu0 %v2868_v38  ;;  %v2874_v38 = vmul.f32 %v7239_v24, %v7239_v24 }
 0x4f3   :  { %3156 = vmatmul.mubr.f32.gmra.mrb[0].mxu0 %v2867_v28  ;;  %v2873_v28 = vmul.f32 %v7245_v50, %v7245_v50 }
 0x4f4   :  { %3160 = vmatprep.mubr.f32.mxu0 %v2870_v44  ;;  %v2876_v44 = vmul.f32 %v7249_v57, %v7249_v57 }
 0x4f7   :  { %3161 = vmatmul.mubr.f32.gmra.mrb[2].mxu0 %v2869_v63  ;;  %v2875_v63 = vmul.f32 %v7252_v19, %v7252_v19 }
 0x4f8   :  { %3165 = vmatprep.mubr.f32.mxu0 %v2872_v58  ;;  %v2878_v58 = vmul.f32 %v7255_v15, %v7255_v15 }
 0x4fb   :  { %3166 = vmatmul.mubr.f32.gmra.mrb[4].mxu0 %v2871_v31  ;;  %v2877_v31 = vmul.f32 %v7261_v27, %v7261_v27 }
 0x4fc   :  { %3170 = vmatprep.mubr.f32.mxu0 %v2874_v38  ;;  %v2880_v38 = vmul.f32 %v7265_v5, %v7265_v5 }
 0x4ff   :  { %3171 = vmatmul.mubr.f32.gmra.mrb[6].mxu0 %v2873_v28  ;;  %v2879_v28 = vmul.f32 %v7268_v20, %v7268_v20 }
 0x500   :  { %3175 = vmatprep.mubr.f32.mxu0 %v2876_v44  ;;  %v2882_v44 = vmul.f32 %v7271_v35, %v7271_v35 }
 0x503   :  { %3176 = vmatmul.mubr.f32.gmra.mrb[8].mxu0 %v2875_v63  ;;  %v2881_v63 = vmul.f32 %v7277_v29, %v7277_v29 }
 0x504   :  { %3180 = vmatprep.mubr.f32.mxu0 %v2878_v58  ;;  %v2884_v58 = vmul.f32 %v7281_v62, %v7281_v62 }
 0x507   :  { %3181 = vmatmul.mubr.f32.gmra.mrb[10].mxu0 %v2877_v31  ;;  %v2883_v31 = vmul.f32 %v7284_v26, %v7284_v26 }
 0x508   :  { %3185 = vmatprep.mubr.f32.mxu0 %v2880_v38  ;;  %v2886_v38 = vmul.f32 %v7287_v59, %v7287_v59 }
 0x50b   :  { %3186 = vmatmul.mubr.f32.gmra.mrb[12].mxu0 %v2879_v28  ;;  %v2885_v28 = vmul.f32 %v7293_v32, %v7293_v32 }
 0x50c   :  { %3190 = vmatprep.mubr.f32.mxu0 %v2882_v44  ;;  %v2888_v44 = vmul.f32 %v7297_v34, %v7297_v34 }
 0x50f   :  { %3191 = vmatmul.mubr.f32.gmra.mrb[14].mxu0 %v2881_v63  ;;  %v2887_v63 = vmul.f32 %v7300_v56, %v7300_v56 }
 0x510   :  { %3195 = vmatprep.mubr.f32.mxu0 %v2884_v58  ;;  %v2890_v58 = vmul.f32 %v7303_v13, %v7303_v13 }
 0x513   :  { %3196 = vmatmul.mubr.f32.gmra.mrb[16].mxu0 %v2883_v31  ;;  %v2889_v31 = vmul.f32 %v7309_v23, %v7309_v23 }
 0x514   :  { %3200 = vmatprep.mubr.f32.mxu0 %v2886_v38  ;;  %v2892_v38 = vmul.f32 %v7313_v10, %v7313_v10 }
 0x517   :  { %3201 = vmatmul.mubr.f32.gmra.mrb[18].mxu0 %v2885_v28  ;;  %v2891_v28 = vmul.f32 %v7316_v0, %v7316_v0 }
 0x518   :  { %3205 = vmatprep.mubr.f32.mxu0 %v2888_v44  ;;  %v2894_v44 = vmul.f32 %v7319_v46, %v7319_v46 }
 0x51b   :  { %3206 = vmatmul.mubr.f32.gmra.mrb[20].mxu0 %v2887_v63  ;;  %v2893_v63 = vmul.f32 %v7325_v8, %v7325_v8 }
 0x51c   :  { %3210 = vmatprep.mubr.f32.mxu0 %v2890_v58  ;;  %v2896_v58 = vmul.f32 %v7329_v42, %v7329_v42 }
 0x51f   :  { %3211 = vmatmul.mubr.f32.gmra.mrb[22].mxu0 %v2889_v31  ;;  %v2895_v31 = vmul.f32 %v7332_v6, %v7332_v6 }
 0x520   :  { %3215 = vmatprep.mubr.f32.mxu0 %v2892_v38  ;;  %v2898_v38 = vmul.f32 %v7335_v55, %v7335_v55 }
 0x523   :  { %3216 = vmatmul.mubr.f32.gmra.mrb[24].mxu0 %v2891_v28  ;;  %v2897_v28 = vmul.f32 %v7341_v61, %v7341_v61 }
 0x524   :  { %3220 = vmatprep.mubr.f32.mxu0 %v2894_v44  ;;  %v2900_v44 = vmul.f32 %v7345_v1, %v7345_v1 }
 0x527   :  { %3221 = vmatmul.mubr.f32.gmra.mrb[26].mxu0 %v2893_v63  ;;  %v2899_v63 = vmul.f32 %v7348_v30, %v7348_v30 }
 0x528   :  { %3225 = vmatprep.mubr.f32.mxu0 %v2896_v58  ;;  %v2902_v58 = vmul.f32 %v7351_v22, %v7351_v22 }
 0x52b   :  { %3226 = vmatmul.mubr.f32.gmra.mrb[28].mxu0 %v2895_v31  ;;  %v2901_v31 = vmul.f32 %v7357_v40, %v7357_v40 }
 0x52c   :  { %3230 = vmatprep.mubr.f32.mxu0 %v2898_v38  ;;  %v2904_v38 = vmul.f32 %v7361_v14, %v7361_v14 }
 0x52f   :  { %3231 = vmatmul.mubr.f32.gmra.mrb[30].mxu0 %v2897_v28  ;;  %v2903_v28 = vmul.f32 %v7364_v45, %v7364_v45 }
 0x530   :  { %3235 = vmatprep.mubr.f32.mxu0 %v2900_v44  ;;  %v2906_v44 = vmul.f32 %v7367_v2, %v7367_v2  ;;  %v2912_v2 = vmul.f32 %v7393_v53, %v7393_v53 }
 0x533   :  { %3236 = vmatmul.mubr.f32.gmra.mrb[32].mxu0 %v2899_v63  ;;  %v2905_v63 = vmul.f32 %v7373_v33, %v7373_v33 }
 0x534   :  { %3240 = vmatprep.mubr.f32.mxu0 %v2902_v58  ;;  %v2908_v58 = vmul.f32 %v7377_v12, %v7377_v12 }
 0x537   :  { %3241 = vmatmul.mubr.f32.gmra.mrb[34].mxu0 %v2901_v31  ;;  %v2907_v31 = vmul.f32 %v7380_v7, %v7380_v7 }
 0x538   :  { %3245 = vmatprep.mubr.f32.mxu0 %v2904_v38  ;;  %v2910_v38 = vmul.f32 %v7383_v52, %v7383_v52 }
 0x53b   :  { %3246 = vmatmul.mubr.f32.gmra.mrb[36].mxu0 %v2903_v28  ;;  %v2909_v28 = vmul.f32 %v7389_v4, %v7389_v4 }
 0x53c   :  { %3250 = vmatprep.mubr.f32.mxu0 %v2906_v44 }
 0x53f   :  { %3251 = vmatmul.mubr.f32.gmra.mrb[38].mxu0 %v2905_v63  ;;  %v2911_v63 = vmul.f32 %v7396_v21, %v7396_v21 }
 0x540   :  { %3255 = vmatprep.mubr.f32.mxu0 %v2908_v58 }
 0x543   :  { %3256 = vmatmul.mubr.f32.gmra.mrb[40].mxu0 %v2907_v31  ;;  %v2914_v31 = vmul.f32 %v7399_v54, %v7399_v54 }
 0x544   :  { %3260 = vmatprep.mubr.f32.mxu0 %v2910_v38 }
 0x546   :  { %v2997_v44 = vpop.f32.mrb[192].mxu0 }
 0x547   :  { %v7562_v33 = vmul.f32 0.03125, %v2997_v44  ;;  %v2999_v12 = vpop.f32.mrb[193].mxu0  ;;  %3261 = vmatmul.mubr.f32.gmra.mrb[42].mxu0 %v2909_v28  ;;  %v2916_v28 = vmul.f32 %v7409_v25, %v7409_v25 }
 0x548   :  { %3265 = vmatprep.mubr.f32.mxu0 %v2912_v2  ;;  %v2913_v2 = vmul.f32 %v7405_v18, %v7405_v18 }
 0x549   :  { %4899 = vmatmul.mubr.msk.f32.vlgmr.msra.gmra.mrb[192].mxu1 %vm1452_vm5, %v7562_v33 }
 0x54a   :  { %v3002_v58 = vpop.f32.mrb[194].mxu0  ;;  %3802 = vmatprep.mubr.f32.mxu1 %v8860_v39 }
 0x54b   :  { %v7571_v38 = vmul.f32 0.03125, %v3002_v58  ;;  %v3004_v53 = vpop.f32.mrb[195].mxu0  ;;  %3266 = vmatmul.mubr.f32.gmra.mrb[44].mxu0 %v2911_v63  ;;  %v8911_v58 = vld [vmem:[#allocation18_spill] sm:$0xff] }
 0x54c   :  { %3270 = vmatprep.mubr.f32.mxu0 %v2914_v31  ;;  %v2915_v53 = vmul.f32 %v7412_v16, %v7412_v16  ;;  %v2918_v31 = vmul.f32 %v8911_v58, %v8911_v58 }
 0x54d   :  { %4900 = vmatmul.mubr.msk.f32.gmra.mrb[194].mxu1 %vm1452_vm5, %v7571_v38  ;;  %v3381_v23 = vmul.f32 %v7571_v38, %v7571_v38 }
 0x54e   :  { %v3007_v12 = vpop.f32.mrb[196].mxu0  ;;  %3808 = vmatprep.mubr.f32.mxu1 %v8860_v39 }
 0x54f   :  { %v7580_v44 = vmul.f32 0.03125, %v3007_v12  ;;  %v3009_v54 = vpop.f32.mrb[197].mxu0  ;;  %3271 = vmatmul.mubr.f32.gmra.mrb[46].mxu0 %v2913_v2 }
 0x550   :  { %3275 = vmatprep.mubr.f32.mxu0 %v2916_v28  ;;  %v8912_v54 = vld [vmem:[#allocation71_spill] sm:$0xff]  ;;  %v8913_v28 = vld [vmem:[#allocation21_spill] sm:$0xff] }
 0x551   :  { %4901 = vmatmul.mubr.msk.f32.gmra.mrb[196].mxu1 %vm1452_vm5, %v7580_v44  ;;  %v2917_v2 = vmul.f32 %v8912_v54, %v8912_v54  ;;  %v2920_v16 = vmul.f32 %v8913_v28, %v8913_v28  ;;  %v3382_v62 = vmul.f32 %v7580_v44, %v7580_v44 }
 0x552   :  { %v3012_v63 = vpop.f32.mrb[198].mxu0  ;;  %3814 = vmatprep.mubr.f32.mxu1 %v8860_v39 }
 0x553   :  { %v7589_v25 = vmul.f32 0.03125, %v3012_v63  ;;  %v3014_v18 = vpop.f32.mrb[199].mxu0  ;;  %3276 = vmatmul.mubr.f32.gmra.mrb[48].mxu0 %v2915_v53 }
 0x554   :  { %3280 = vmatprep.mubr.f32.mxu0 %v2918_v31  ;;  %v8914_v18 = vld [vmem:[#allocation74_spill] sm:$0xff]  ;;  %v8915_v31 = vld [vmem:[#allocation20_spill] sm:$0xff] }
 0x555   :  { %4902 = vmatmul.mubr.msk.f32.gmra.mrb[198].mxu1 %vm1452_vm5, %v7589_v25  ;;  %v2919_v53 = vmul.f32 %v8914_v18, %v8914_v18  ;;  %v2922_v54 = vmul.f32 %v8915_v31, %v8915_v31 }
 0x556   :  { %v3017_v12 = vpop.f32.mrb[200].mxu0  ;;  %3820 = vmatprep.mubr.f32.mxu1 %v8860_v39 }
 0x557   :  { %v7598_v58 = vmul.f32 0.03125, %v3017_v12  ;;  %v3019_v21 = vpop.f32.mrb[201].mxu0  ;;  %3281 = vmatmul.mubr.f32.gmra.mrb[50].mxu0 %v2917_v2  ;;  %v8917_v12 = vld [vmem:[#allocation23_spill] sm:$0xff] }
 0x558   :  { %3285 = vmatprep.mubr.f32.mxu0 %v2920_v16  ;;  %v8916_v21 = vld [vmem:[#allocation73_spill] sm:$0xff]  ;;  %v2924_v18 = vmul.f32 %v8917_v12, %v8917_v12 }
 0x559   :  { %4903 = vmatmul.mubr.msk.f32.gmra.mrb[200].mxu1 %vm1452_vm5, %v7598_v58  ;;  %v2921_v16 = vmul.f32 %v8916_v21, %v8916_v21  ;;  %v3384_v44 = vmul.f32 %v7598_v58, %v7598_v58 }
 0x55a   :  { %v3022_v63 = vpop.f32.mrb[202].mxu0  ;;  %3826 = vmatprep.mubr.f32.mxu1 %v8860_v39 }
 0x55b   :  { %v7607_v28 = vmul.f32 0.03125, %v3022_v63  ;;  %v3024_v52 = vpop.f32.mrb[203].mxu0  ;;  %3286 = vmatmul.mubr.f32.gmra.mrb[52].mxu0 %v2919_v53  ;;  %v2926_v53 = vmul.f32 %v7447_v43, %v7447_v43 }
 0x55c   :  { %3290 = vmatprep.mubr.f32.mxu0 %v2922_v54  ;;  %v2923_v52 = vmul.f32 %v7444_v47, %v7444_v47 }
 0x55d   :  { %4904 = vmatmul.mubr.msk.f32.gmra.mrb[202].mxu1 %vm1452_vm5, %v7607_v28 }
 0x55e   :  { %v3027_v2 = vpop.f32.mrb[204].mxu0  ;;  %3832 = vmatprep.mubr.f32.mxu1 %v8860_v39 }
 0x55f   :  { %v7616_v31 = vmul.f32 0.03125, %v3027_v2  ;;  %v3029_v4 = vpop.f32.mrb[205].mxu0  ;;  %3291 = vmatmul.mubr.f32.gmra.mrb[54].mxu0 %v2921_v16  ;;  %v2928_v16 = vmul.f32 %v7457_v49, %v7457_v49 }
 0x560   :  { %3295 = vmatprep.mubr.f32.mxu0 %v2924_v18  ;;  %v2925_v4 = vmul.f32 %v7453_v11, %v7453_v11 }
 0x561   :  { %4905 = vmatmul.mubr.msk.f32.gmra.mrb[204].mxu1 %vm1452_vm5, %v7616_v31 }
 0x562   :  { %v3032_v54 = vpop.f32.mrb[206].mxu0  ;;  %3838 = vmatprep.mubr.f32.mxu1 %v8860_v39 }
 0x563   :  { %v7625_v63 = vmul.f32 0.03125, %v3032_v54  ;;  %v3034_v12 = vpop.f32.mrb[207].mxu0  ;;  %3296 = vmatmul.mubr.f32.gmra.mrb[56].mxu0 %v2923_v52  ;;  %v2930_v54 = vmul.f32 %v7463_v3, %v7463_v3 }
 0x564   :  { %3300 = vmatprep.mubr.f32.mxu0 %v2926_v53  ;;  %v2927_v12 = vmul.f32 %v7460_v17, %v7460_v17 }
 0x565   :  { %4906 = vmatmul.mubr.msk.f32.gmra.mrb[206].mxu1 %vm1452_vm5, %v7625_v63 }
 0x566   :  { %v3037_v18 = vpop.f32.mrb[208].mxu0  ;;  %3844 = vmatprep.mubr.f32.mxu1 %v8860_v39 }
 0x567   :  { %v7634_v2 = vmul.f32 0.03125, %v3037_v18  ;;  %v3039_v43 = vpop.f32.mrb[209].mxu0  ;;  %3301 = vmatmul.mubr.f32.gmra.mrb[58].mxu0 %v2925_v4 }
 0x568   :  { %3305 = vmatprep.mubr.f32.mxu0 %v2928_v16  ;;  %v2929_v43 = vmul.f32 %v7469_v9, %v7469_v9 }
 0x569   :  { %4907 = vmatmul.mubr.msk.f32.gmra.mrb[208].mxu1 %vm1452_vm5, %v7634_v2 }
 0x56a   :  { %v3042_v52 = vpop.f32.mrb[210].mxu0  ;;  %3850 = vmatprep.mubr.f32.mxu1 %v8860_v39 }
 0x56b   :  { %v7643_v53 = vmul.f32 0.03125, %v3042_v52  ;;  %v3044_v49 = vpop.f32.mrb[211].mxu0  ;;  %3306 = vmatmul.mubr.f32.gmra.mrb[60].mxu0 %v2927_v12 }
 0x56c   :  { %3310 = vmatprep.mubr.f32.mxu0 %v2930_v54 }
 0x56d   :  { %4908 = vmatmul.mubr.msk.f32.gmra.mrb[210].mxu1 %vm1452_vm5, %v7643_v53 }
 0x56e   :  { %v3047_v4 = vpop.f32.mrb[212].mxu0  ;;  %3856 = vmatprep.mubr.f32.mxu1 %v8860_v39 }
 0x56f   :  { %v7650_v18 = vmul.f32 0.03125, %v3047_v4  ;;  %v3049_v16 = vpop.f32.mrb[213].mxu0  ;;  %3311 = vmatmul.mubr.f32.gmra.mrb[62].mxu0 %v2929_v43 }
 0x571   :  { %4909 = vmatmul.mubr.msk.f32.gmra.mrb[212].mxu1 %vm1452_vm5, %v7650_v18 }
 0x572   :  { %v3052_v52 = vpop.f32.mrb[214].mxu0  ;;  %3862 = vmatprep.mubr.f32.mxu1 %v8860_v39 }
 0x573   :  { %v7655_v49 = vmul.f32 0.03125, %v3052_v52  ;;  %v3054_v12 = vpop.f32.mrb[215].mxu0 }
 0x575   :  { %4910 = vmatmul.mubr.msk.f32.gmra.mrb[214].mxu1 %vm1452_vm5, %v7655_v49 }
 0x576   :  { %v3057_v54 = vpop.f32.mrb[216].mxu0  ;;  %3868 = vmatprep.mubr.f32.mxu1 %v8860_v39 }
 0x577   :  { %v7660_v3 = vmul.f32 0.03125, %v3057_v54  ;;  %v3059_v4 = vpop.f32.mrb[217].mxu0 }
 0x579   :  { %4911 = vmatmul.mubr.msk.f32.gmra.mrb[216].mxu1 %vm1452_vm5, %v7660_v3 }
 0x57a   :  { %v3062_v43 = vpop.f32.mrb[218].mxu0  ;;  %3874 = vmatprep.mubr.f32.mxu1 %v8860_v39 }
 0x57b   :  { %v7665_v16 = vmul.f32 0.03125, %v3062_v43  ;;  %v3064_v52 = vpop.f32.mrb[219].mxu0 }
 0x57d   :  { %4912 = vmatmul.mubr.msk.f32.gmra.mrb[218].mxu1 %vm1452_vm5, %v7665_v16 }
 0x57e   :  { %v3067_v12 = vpop.f32.mrb[220].mxu0  ;;  %3880 = vmatprep.mubr.f32.mxu1 %v8860_v39 }
 0x57f   :  { %v7670_v9 = vmul.f32 0.03125, %v3067_v12  ;;  %v3069_v54 = vpop.f32.mrb[221].mxu0 }
 0x581   :  { %4913 = vmatmul.mubr.msk.f32.gmra.mrb[220].mxu1 %vm1452_vm5, %v7670_v9 }
 0x582   :  { %v3072_v4 = vpop.f32.mrb[222].mxu0  ;;  %3886 = vmatprep.mubr.f32.mxu1 %v8860_v39 }
 0x583   :  { %v7675_v17 = vmul.f32 0.03125, %v3072_v4  ;;  %v3074_v43 = vpop.f32.mrb[223].mxu0 }
 0x585   :  { %4914 = vmatmul.mubr.msk.f32.gmra.mrb[222].mxu1 %vm1452_vm5, %v7675_v17 }
 0x586   :  { %v3077_v52 = vpop.f32.mrb[224].mxu0  ;;  %3892 = vmatprep.mubr.f32.mxu1 %v8860_v39 }
 0x587   :  { %v7680_v11 = vmul.f32 0.03125, %v3077_v52  ;;  %v3079_v12 = vpop.f32.mrb[225].mxu0 }
 0x589   :  { %4915 = vmatmul.mubr.msk.f32.gmra.mrb[224].mxu1 %vm1452_vm5, %v7680_v11 }
 0x58a   :  { %v3082_v54 = vpop.f32.mrb[226].mxu0  ;;  %3898 = vmatprep.mubr.f32.mxu1 %v8860_v39 }
 0x58b   :  { %v7685_v47 = vmul.f32 0.03125, %v3082_v54  ;;  %v3084_v4 = vpop.f32.mrb[227].mxu0 }
 0x58d   :  { %4916 = vmatmul.mubr.msk.f32.gmra.mrb[226].mxu1 %vm1452_vm5, %v7685_v47 }
 0x58e   :  { %v3087_v43 = vpop.f32.mrb[228].mxu0  ;;  %3904 = vmatprep.mubr.f32.mxu1 %v8860_v39 }
 0x58f   :  { %v7690_v21 = vmul.f32 0.03125, %v3087_v43  ;;  %v3089_v52 = vpop.f32.mrb[229].mxu0 }
 0x591   :  { %4917 = vmatmul.mubr.msk.f32.gmra.mrb[228].mxu1 %vm1452_vm5, %v7690_v21 }
 0x592   :  { %v3092_v12 = vpop.f32.mrb[230].mxu0  ;;  %3910 = vmatprep.mubr.f32.mxu1 %v8860_v39 }
 0x593   :  { %v7695_v7 = vmul.f32 0.03125, %v3092_v12  ;;  %v3094_v54 = vpop.f32.mrb[231].mxu0 }
 0x595   :  { %4918 = vmatmul.mubr.msk.f32.gmra.mrb[230].mxu1 %vm1452_vm5, %v7695_v7 }
 0x596   :  { %v3097_v4 = vpop.f32.mrb[232].mxu0  ;;  %3916 = vmatprep.mubr.f32.mxu1 %v8860_v39 }
 0x597   :  { %v7700_v14 = vmul.f32 0.03125, %v3097_v4  ;;  %v3099_v43 = vpop.f32.mrb[233].mxu0 }
 0x599   :  { %4919 = vmatmul.mubr.msk.f32.gmra.mrb[232].mxu1 %vm1452_vm5, %v7700_v14 }
 0x59a   :  { %v3102_v52 = vpop.f32.mrb[234].mxu0  ;;  %3922 = vmatprep.mubr.f32.mxu1 %v8860_v39 }
 0x59b   :  { %v7705_v45 = vmul.f32 0.03125, %v3102_v52  ;;  %v3104_v12 = vpop.f32.mrb[235].mxu0 }
 0x59d   :  { %4920 = vmatmul.mubr.msk.f32.gmra.mrb[234].mxu1 %vm1452_vm5, %v7705_v45 }
 0x59e   :  { %v3107_v54 = vpop.f32.mrb[236].mxu0  ;;  %3928 = vmatprep.mubr.f32.mxu1 %v8860_v39 }
 0x59f   :  { %v7710_v22 = vmul.f32 0.03125, %v3107_v54  ;;  %v3109_v4 = vpop.f32.mrb[237].mxu0 }
 0x5a1   :  { %4921 = vmatmul.mubr.msk.f32.gmra.mrb[236].mxu1 %vm1452_vm5, %v7710_v22 }
 0x5a2   :  { %v3112_v43 = vpop.f32.mrb[238].mxu0  ;;  %3934 = vmatprep.mubr.f32.mxu1 %v8860_v39 }
 0x5a3   :  { %v7715_v40 = vmul.f32 0.03125, %v3112_v43  ;;  %v3114_v52 = vpop.f32.mrb[239].mxu0 }
 0x5a5   :  { %4922 = vmatmul.mubr.msk.f32.gmra.mrb[238].mxu1 %vm1452_vm5, %v7715_v40 }
 0x5a6   :  { %v3117_v12 = vpop.f32.mrb[240].mxu0  ;;  %3940 = vmatprep.mubr.f32.mxu1 %v8860_v39 }
 0x5a7   :  { %v7720_v1 = vmul.f32 0.03125, %v3117_v12  ;;  %v3119_v54 = vpop.f32.mrb[241].mxu0 }
 0x5a9   :  { %4923 = vmatmul.mubr.msk.f32.gmra.mrb[240].mxu1 %vm1452_vm5, %v7720_v1 }
 0x5aa   :  { %v3122_v4 = vpop.f32.mrb[242].mxu0  ;;  %3946 = vmatprep.mubr.f32.mxu1 %v8860_v39 }
 0x5ab   :  { %v7725_v30 = vmul.f32 0.03125, %v3122_v4  ;;  %v3124_v43 = vpop.f32.mrb[243].mxu0 }
 0x5ad   :  { %4924 = vmatmul.mubr.msk.f32.gmra.mrb[242].mxu1 %vm1452_vm5, %v7725_v30 }
 0x5ae   :  { %v3127_v52 = vpop.f32.mrb[244].mxu0  ;;  %3952 = vmatprep.mubr.f32.mxu1 %v8860_v39 }
 0x5af   :  { %v7730_v55 = vmul.f32 0.03125, %v3127_v52  ;;  %v3129_v12 = vpop.f32.mrb[245].mxu0 }
 0x5b1   :  { %4925 = vmatmul.mubr.msk.f32.gmra.mrb[244].mxu1 %vm1452_vm5, %v7730_v55 }
 0x5b2   :  { %v3132_v54 = vpop.f32.mrb[246].mxu0  ;;  %3958 = vmatprep.mubr.f32.mxu1 %v8860_v39 }
 0x5b3   :  { %v7735_v61 = vmul.f32 0.03125, %v3132_v54  ;;  %v3134_v4 = vpop.f32.mrb[247].mxu0 }
 0x5b5   :  { %4926 = vmatmul.mubr.msk.f32.gmra.mrb[246].mxu1 %vm1452_vm5, %v7735_v61 }
 0x5b6   :  { %v3137_v43 = vpop.f32.mrb[248].mxu0  ;;  %3964 = vmatprep.mubr.f32.mxu1 %v8860_v39 }
 0x5b7   :  { %v7740_v42 = vmul.f32 0.03125, %v3137_v43  ;;  %v3139_v52 = vpop.f32.mrb[249].mxu0 }
 0x5b9   :  { %4927 = vmatmul.mubr.msk.f32.gmra.mrb[248].mxu1 %vm1452_vm5, %v7740_v42 }
 0x5ba   :  { %v3142_v12 = vpop.f32.mrb[250].mxu0  ;;  %3970 = vmatprep.mubr.f32.mxu1 %v8860_v39 }
 0x5bb   :  { %v7745_v6 = vmul.f32 0.03125, %v3142_v12  ;;  %v3144_v54 = vpop.f32.mrb[251].mxu0 }
 0x5bd   :  { %4928 = vmatmul.mubr.msk.f32.gmra.mrb[250].mxu1 %vm1452_vm5, %v7745_v6 }
 0x5be   :  { %v3147_v4 = vpop.f32.mrb[252].mxu0  ;;  %3976 = vmatprep.mubr.f32.mxu1 %v8860_v39 }
 0x5bf   :  { %v7750_v46 = vmul.f32 0.03125, %v3147_v4  ;;  %v3149_v43 = vpop.f32.mrb[253].mxu0  ;;  %v3380_v4 = vmul.f32 %v7562_v33, %v7562_v33 }
 0x5c1   :  { %4929 = vmatmul.mubr.msk.f32.gmra.mrb[252].mxu1 %vm1452_vm5, %v7750_v46 }
 0x5c2   :  { %v3152_v52 = vpop.f32.mrb[254].mxu0  ;;  %3982 = vmatprep.mubr.f32.mxu1 %v8860_v39 }
 0x5c3   :  { %v7755_v8 = vmul.f32 0.03125, %v3152_v52  ;;  %v3154_v12 = vpop.f32.mrb[255].mxu0 }
 0x5c5   :  { %4930 = vmatmul.mubr.msk.f32.gmra.mrb[254].mxu1 %vm1452_vm5, %v7755_v8 }
 0x5c6   :  { %v3157_v54 = vpop.f32.mrb[0].mxu0  ;;  %3988 = vmatprep.mubr.f32.mxu1 %v8860_v39 }
 0x5c7   :  { %v3348_v10 = vmul.f32 0.03125, %v3157_v54  ;;  %v3159_v43 = vpop.f32.mrb[1].mxu0 }
 0x5c9   :  { %v3412_v0 = vsub.f32 %v3348_v10, %v3380_v4  ;;  %v3383_v4 = vmul.f32 %v7589_v25, %v7589_v25  ;;  %v3385_v25 = vmul.f32 %v7607_v28, %v7607_v28 }
 0x5ca   :  { %v3162_v13 = vpop.f32.mrb[2].mxu0 }
 0x5cb   :  { %v3444_v34 = vmax.f32 %v3412_v0, 0.0  ;;  %v3349_v52 = vmul.f32 0.03125, %v3162_v13  ;;  %v3164_v56 = vpop.f32.mrb[3].mxu0 }
 0x5cd   :  { %v3476_v12 = vadd.f32 1e-05, %v3444_v34  ;;  %v3413_v59 = vsub.f32 %v3349_v52, %v3381_v23 }
 0x5ce   :  { %v3167_v32 = vpop.f32.mrb[4].mxu0 }
 0x5cf   :  { %5231 = vrsqrt.f32 %v3476_v12  ;;  %v3445_v26 = vmax.f32 %v3413_v59, 0.0  ;;  %v3350_v35 = vmul.f32 0.03125, %v3167_v32  ;;  %v3169_v33 = vpop.f32.mrb[5].mxu0 }
 0x5d1   :  { %v3477_v54 = vadd.f32 1e-05, %v3445_v26  ;;  %v3414_v43 = vsub.f32 %v3350_v35, %v3382_v62 }
 0x5d2   :  { %v3172_v10 = vpop.f32.mrb[6].mxu0 }
 0x5d3   :  { %5233 = vrsqrt.f32 %v3477_v54  ;;  %v3446_v0 = vmax.f32 %v3414_v43, 0.0  ;;  %v3351_v13 = vmul.f32 0.03125, %v3172_v10  ;;  %v3174_v56 = vpop.f32.mrb[7].mxu0 }
 0x5d5   :  { %v3478_v34 = vadd.f32 1e-05, %v3446_v0  ;;  %v3415_v23 = vsub.f32 %v3351_v13, %v3383_v4  ;;  %v3386_v13 = vmul.f32 %v7616_v31, %v7616_v31 }
 0x5d6   :  { %v3177_v38 = vpop.f32.mrb[8].mxu0 }
 0x5d7   :  { %5235 = vrsqrt.f32 %v3478_v34  ;;  %v3447_v59 = vmax.f32 %v3415_v23, 0.0  ;;  %v3352_v32 = vmul.f32 0.03125, %v3177_v38  ;;  %v3179_v52 = vpop.f32.mrb[9].mxu0 }
 0x5d9   :  { %v5232_v26 = vpop.eup %5231  ;;  %v3479_v35 = vadd.f32 1e-05, %v3447_v59  ;;  %v3416_v62 = vsub.f32 %v3352_v32, %v3384_v44  ;;  %v3387_v32 = vmul.f32 %v7625_v63, %v7625_v63 }
 0x5da   :  { %v3182_v12 = vpop.f32.mrb[10].mxu0  ;;  %4931 = vmatmul.mubr.msk.f32.gmra.mrb[0].mxu1 %vm1452_vm5, %v5232_v26 }
 0x5db   :  { %5237 = vrsqrt.f32 %v3479_v35  ;;  %v3448_v33 = vmax.f32 %v3416_v62, 0.0  ;;  %v3353_v54 = vmul.f32 0.03125, %v3182_v12  ;;  %v3184_v43 = vpop.f32.mrb[11].mxu0  ;;  %3994 = vmatprep.mubr.f32.mxu1 %v8860_v39 }
 0x5dd   :  { %v5234_v58 = vpop.eup %5233  ;;  %v3480_v10 = vadd.f32 1e-05, %v3448_v33  ;;  %v3417_v4 = vsub.f32 %v3353_v54, %v3385_v25  ;;  %v3388_v33 = vmul.f32 %v7634_v2, %v7634_v2 }
 0x5de   :  { %v3187_v0 = vpop.f32.mrb[12].mxu0  ;;  %4932 = vmatmul.mubr.msk.f32.gmra.mrb[2].mxu1 %vm1452_vm5, %v5234_v58 }
 0x5df   :  { %5239 = vrsqrt.f32 %v3480_v10  ;;  %v3449_v56 = vmax.f32 %v3417_v4, 0.0  ;;  %v3354_v34 = vmul.f32 0.03125, %v3187_v0  ;;  %v3189_v23 = vpop.f32.mrb[13].mxu0  ;;  %4000 = vmatprep.mubr.f32.mxu1 %v8860_v39 }
 0x5e1   :  { %v5236_v28 = vpop.eup %5235  ;;  %v3481_v38 = vadd.f32 1e-05, %v3449_v56  ;;  %v3418_v44 = vsub.f32 %v3354_v34, %v3386_v13  ;;  %v3389_v13 = vmul.f32 %v7643_v53, %v7643_v53 }
 0x5e2   :  { %v3192_v59 = vpop.f32.mrb[14].mxu0  ;;  %4933 = vmatmul.mubr.msk.f32.gmra.mrb[4].mxu1 %vm1452_vm5, %v5236_v28 }
 0x5e3   :  { %5241 = vrsqrt.f32 %v3481_v38  ;;  %v3450_v52 = vmax.f32 %v3418_v44, 0.0  ;;  %v3355_v26 = vmul.f32 0.03125, %v3192_v59  ;;  %v3194_v35 = vpop.f32.mrb[15].mxu0  ;;  %4006 = vmatprep.mubr.f32.mxu1 %v8860_v39  ;;  %v3390_v59 = vmul.f32 %v7650_v18, %v7650_v18 }
 0x5e5   :  { %v5238_v31 = vpop.eup %5237  ;;  %v3482_v62 = vadd.f32 1e-05, %v3450_v52  ;;  %v3419_v12 = vsub.f32 %v3355_v26, %v3387_v32 }
 0x5e6   :  { %v3197_v25 = vpop.f32.mrb[16].mxu0  ;;  %4934 = vmatmul.mubr.msk.f32.gmra.mrb[6].mxu1 %vm1452_vm5, %v5238_v31 }
 0x5e7   :  { %5243 = vrsqrt.f32 %v3482_v62  ;;  %v3451_v54 = vmax.f32 %v3419_v12, 0.0  ;;  %v3356_v43 = vmul.f32 0.03125, %v3197_v25  ;;  %v3199_v58 = vpop.f32.mrb[17].mxu0  ;;  %4012 = vmatprep.mubr.f32.mxu1 %v8860_v39  ;;  %v3391_v12 = vmul.f32 %v7655_v49, %v7655_v49 }
 0x5e9   :  { %v5240_v63 = vpop.eup %5239  ;;  %v3483_v10 = vadd.f32 1e-05, %v3451_v54  ;;  %v3420_v4 = vsub.f32 %v3356_v43, %v3388_v33 }
 0x5ea   :  { %v3202_v0 = vpop.f32.mrb[18].mxu0  ;;  %4935 = vmatmul.mubr.msk.f32.gmra.mrb[8].mxu1 %vm1452_vm5, %v5240_v63 }
 0x5eb   :  { %5245 = vrsqrt.f32 %v3483_v10  ;;  %v3452_v56 = vmax.f32 %v3420_v4, 0.0  ;;  %v3357_v34 = vmul.f32 0.03125, %v3202_v0  ;;  %v3204_v23 = vpop.f32.mrb[19].mxu0  ;;  %4018 = vmatprep.mubr.f32.mxu1 %v8860_v39  ;;  %v3392_v10 = vmul.f32 %v7660_v3, %v7660_v3 }
 0x5ed   :  { %v5242_v2 = vpop.eup %5241  ;;  %v3484_v28 = vadd.f32 1e-05, %v3452_v56  ;;  %v3421_v38 = vsub.f32 %v3357_v34, %v3389_v13 }
 0x5ee   :  { %v3207_v44 = vpop.f32.mrb[20].mxu0  ;;  %4936 = vmatmul.mubr.msk.f32.gmra.mrb[10].mxu1 %vm1452_vm5, %v5242_v2  ;;  %v3393_v2 = vmul.f32 %v7665_v16, %v7665_v16 }
 0x5ef   :  { %5247 = vrsqrt.f32 %v3484_v28  ;;  %v3453_v32 = vmax.f32 %v3421_v38, 0.0  ;;  %v3358_v52 = vmul.f32 0.03125, %v3207_v44  ;;  %v3209_v26 = vpop.f32.mrb[21].mxu0  ;;  %4024 = vmatprep.mubr.f32.mxu1 %v8860_v39 }
 0x5f0   :  { %v3394_v26 = vmul.f32 %v7670_v9, %v7670_v9 }
 0x5f1   :  { %v5244_v53 = vpop.eup %5243  ;;  %v3485_v35 = vadd.f32 1e-05, %v3453_v32  ;;  %v3422_v31 = vsub.f32 %v3358_v52, %v3390_v59 }
 0x5f2   :  { %v3212_v62 = vpop.f32.mrb[22].mxu0  ;;  %4937 = vmatmul.mubr.msk.f32.gmra.mrb[12].mxu1 %vm1452_vm5, %v5244_v53 }
 0x5f3   :  { %5249 = vrsqrt.f32 %v3485_v35  ;;  %v3454_v25 = vmax.f32 %v3422_v31, 0.0  ;;  %v3359_v33 = vmul.f32 0.03125, %v3212_v62  ;;  %v3214_v54 = vpop.f32.mrb[23].mxu0  ;;  %4030 = vmatprep.mubr.f32.mxu1 %v8860_v39 }
 0x5f5   :  { %v5246_v18 = vpop.eup %5245  ;;  %v3486_v43 = vadd.f32 1e-05, %v3454_v25  ;;  %v3423_v58 = vsub.f32 %v3359_v33, %v3391_v12  ;;  %v3395_v33 = vmul.f32 %v7675_v17, %v7675_v17 }
 0x5f6   :  { %v3217_v63 = vpop.f32.mrb[24].mxu0  ;;  %4938 = vmatmul.mubr.msk.f32.gmra.mrb[14].mxu1 %vm1452_vm5, %v5246_v18 }
 0x5f7   :  { %5251 = vrsqrt.f32 %v3486_v43  ;;  %v3455_v4 = vmax.f32 %v3423_v58, 0.0  ;;  %v3360_v0 = vmul.f32 0.03125, %v3217_v63  ;;  %v3219_v13 = vpop.f32.mrb[25].mxu0  ;;  %4036 = vmatprep.mubr.f32.mxu1 %v8860_v39 }
 0x5f9   :  { %v5248_v49 = vpop.eup %5247  ;;  %v3487_v56 = vadd.f32 1e-05, %v3455_v4  ;;  %v3424_v34 = vsub.f32 %v3360_v0, %v3392_v10  ;;  %v3396_v4 = vmul.f32 %v7680_v11, %v7680_v11 }
 0x5fa   :  { %v3222_v23 = vpop.f32.mrb[26].mxu0  ;;  %4939 = vmatmul.mubr.msk.f32.gmra.mrb[16].mxu1 %vm1452_vm5, %v5248_v49 }
 0x5fb   :  { %5253 = vrsqrt.f32 %v3487_v56  ;;  %v3456_v28 = vmax.f32 %v3424_v34, 0.0  ;;  %v3361_v38 = vmul.f32 0.03125, %v3222_v23  ;;  %v3224_v44 = vpop.f32.mrb[27].mxu0  ;;  %4042 = vmatprep.mubr.f32.mxu1 %v8860_v39 }
 0x5fd   :  { %v5250_v3 = vpop.eup %5249  ;;  %v3488_v59 = vadd.f32 1e-05, %v3456_v28  ;;  %v3425_v32 = vsub.f32 %v3361_v38, %v3393_v2  ;;  %v3397_v2 = vmul.f32 %v7685_v47, %v7685_v47 }
 0x5fe   :  { %v3227_v52 = vpop.f32.mrb[28].mxu0  ;;  %4940 = vmatmul.mubr.msk.f32.gmra.mrb[18].mxu1 %vm1452_vm5, %v5250_v3 }
 0x5ff   :  { %5255 = vrsqrt.f32 %v3488_v59  ;;  %v3457_v53 = vmax.f32 %v3425_v32, 0.0  ;;  %v3362_v35 = vmul.f32 0.03125, %v3227_v52  ;;  %v3229_v31 = vpop.f32.mrb[29].mxu0  ;;  %4048 = vmatprep.mubr.f32.mxu1 %v8860_v39  ;;  %v3398_v52 = vmul.f32 %v7690_v21, %v7690_v21 }
 0x601   :  { %v5252_v16 = vpop.eup %5251  ;;  %v3489_v62 = vadd.f32 1e-05, %v3457_v53  ;;  %v3426_v12 = vsub.f32 %v3362_v35, %v3394_v26 }
 0x602   :  { %v3232_v25 = vpop.f32.mrb[30].mxu0  ;;  %4941 = vmatmul.mubr.msk.f32.gmra.mrb[20].mxu1 %vm1452_vm5, %v5252_v16 }
 0x603   :  { %5257 = vrsqrt.f32 %v3489_v62  ;;  %v3458_v54 = vmax.f32 %v3426_v12, 0.0  ;;  %v3363_v18 = vmul.f32 0.03125, %v3232_v25  ;;  %v3234_v43 = vpop.f32.mrb[31].mxu0  ;;  %4054 = vmatprep.mubr.f32.mxu1 %v8860_v39  ;;  %v3399_v12 = vmul.f32 %v7695_v7, %v7695_v7 }
 0x605   :  { %v5254_v9 = vpop.eup %5253  ;;  %v3490_v58 = vadd.f32 1e-05, %v3458_v54  ;;  %v3427_v63 = vsub.f32 %v3363_v18, %v3395_v33 }
 0x606   :  { %v3237_v10 = vpop.f32.mrb[32].mxu0  ;;  %4942 = vmatmul.mubr.msk.f32.gmra.mrb[22].mxu1 %vm1452_vm5, %v5254_v9 }
 0x607   :  { %5259 = vrsqrt.f32 %v3490_v58  ;;  %v3459_v0 = vmax.f32 %v3427_v63, 0.0  ;;  %v3364_v13 = vmul.f32 0.03125, %v3237_v10  ;;  %v3239_v49 = vpop.f32.mrb[33].mxu0  ;;  %4060 = vmatprep.mubr.f32.mxu1 %v8860_v39  ;;  %v3400_v58 = vmul.f32 %v7700_v14, %v7700_v14 }
 0x609   :  { %v5256_v17 = vpop.eup %5255  ;;  %v3491_v56 = vadd.f32 1e-05, %v3459_v0  ;;  %v3428_v34 = vsub.f32 %v3364_v13, %v3396_v4 }
 0x60a   :  { %v3242_v23 = vpop.f32.mrb[34].mxu0  ;;  %4943 = vmatmul.mubr.msk.f32.gmra.mrb[24].mxu1 %vm1452_vm5, %v5256_v17  ;;  %v3401_v17 = vmul.f32 %v7705_v45, %v7705_v45 }
 0x60b   :  { %5261 = vrsqrt.f32 %v3491_v56  ;;  %v3460_v28 = vmax.f32 %v3428_v34, 0.0  ;;  %v3365_v38 = vmul.f32 0.03125, %v3242_v23  ;;  %v3244_v44 = vpop.f32.mrb[35].mxu0  ;;  %4066 = vmatprep.mubr.f32.mxu1 %v8860_v39 }
 0x60d   :  { %v5258_v11 = vpop.eup %5257  ;;  %v3492_v3 = vadd.f32 1e-05, %v3460_v28  ;;  %v3429_v59 = vsub.f32 %v3365_v38, %v3397_v2 }
 0x60e   :  { %v3247_v32 = vpop.f32.mrb[36].mxu0  ;;  %4944 = vmatmul.mubr.msk.f32.gmra.mrb[26].mxu1 %vm1452_vm5, %v5258_v11 }
 0x60f   :  { %5263 = vrsqrt.f32 %v3492_v3  ;;  %v3461_v26 = vmax.f32 %v3429_v59, 0.0  ;;  %v3366_v53 = vmul.f32 0.03125, %v3247_v32  ;;  %v3249_v35 = vpop.f32.mrb[37].mxu0  ;;  %4072 = vmatprep.mubr.f32.mxu1 %v8860_v39  ;;  %v3402_v3 = vmul.f32 %v7710_v22, %v7710_v22 }
 0x611   :  { %v5260_v47 = vpop.eup %5259  ;;  %v3493_v31 = vadd.f32 1e-05, %v3461_v26  ;;  %v3430_v16 = vsub.f32 %v3366_v53, %v3398_v52 }
 0x612   :  { %v3252_v62 = vpop.f32.mrb[38].mxu0  ;;  %4945 = vmatmul.mubr.msk.f32.gmra.mrb[28].mxu1 %vm1452_vm5, %v5260_v47 }
 0x613   :  { %5265 = vrsqrt.f32 %v3493_v31  ;;  %v3462_v25 = vmax.f32 %v3430_v16, 0.0  ;;  %v3367_v33 = vmul.f32 0.03125, %v3252_v62  ;;  %v3254_v54 = vpop.f32.mrb[39].mxu0  ;;  %4078 = vmatprep.mubr.f32.mxu1 %v8860_v39  ;;  %v3403_v16 = vmul.f32 %v7715_v40, %v7715_v40 }
 0x615   :  { %v5262_v21 = vpop.eup %5261  ;;  %v3494_v18 = vadd.f32 1e-05, %v3462_v25  ;;  %v3431_v43 = vsub.f32 %v3367_v33, %v3399_v12 }
 0x616   :  { %v3257_v9 = vpop.f32.mrb[40].mxu0  ;;  %4946 = vmatmul.mubr.msk.f32.gmra.mrb[30].mxu1 %vm1452_vm5, %v5262_v21 }
 0x617   :  { %5267 = vrsqrt.f32 %v3494_v18  ;;  %v3463_v63 = vmax.f32 %v3431_v43, 0.0  ;;  %v3368_v10 = vmul.f32 0.03125, %v3257_v9  ;;  %v3259_v4 = vpop.f32.mrb[41].mxu0  ;;  %4084 = vmatprep.mubr.f32.mxu1 %v8860_v39  ;;  %v3404_v9 = vmul.f32 %v7720_v1, %v7720_v1 }
 0x619   :  { %v5264_v7 = vpop.eup %5263  ;;  %v3495_v0 = vadd.f32 1e-05, %v3463_v63  ;;  %v3432_v13 = vsub.f32 %v3368_v10, %v3400_v58 }
 0x61a   :  { %v3262_v49 = vpop.f32.mrb[42].mxu0  ;;  %4947 = vmatmul.mubr.msk.f32.gmra.mrb[32].mxu1 %vm1452_vm5, %v5264_v7 }
 0x61b   :  { %5269 = vrsqrt.f32 %v3495_v0  ;;  %v3464_v56 = vmax.f32 %v3432_v13, 0.0  ;;  %v3369_v34 = vmul.f32 0.03125, %v3262_v49  ;;  %v3264_v23 = vpop.f32.mrb[43].mxu0  ;;  %4090 = vmatprep.mubr.f32.mxu1 %v8860_v39 }
 0x61c   :  { %v7838_v14 = vpop.f32.mrb[192].mxu1 }
 0x61d   :  { %v5266_v2 = vpop.eup %5265  ;;  %v3496_v28 = vadd.f32 1e-05, %v3464_v56  ;;  %v3433_v38 = vsub.f32 %v3369_v34, %v3401_v17  ;;  %v7840_v44 = vpop.f32.mrb[193].mxu1  ;;  %v3405_v17 = vmul.f32 %v7725_v30, %v7725_v30 }
 0x61e   :  { %v3267_v11 = vpop.f32.mrb[44].mxu0  ;;  %4948 = vmatmul.mubr.msk.f32.gmra.mrb[34].mxu1 %vm1452_vm5, %v5266_v2 }
 0x61f   :  { %5271 = vrsqrt.f32 %v3496_v28  ;;  %v3465_v45 = vmax.f32 %v3433_v38, 0.0  ;;  %v3370_v59 = vmul.f32 0.03125, %v3267_v11  ;;  %v3269_v32 = vpop.f32.mrb[45].mxu0  ;;  %4096 = vmatprep.mubr.f32.mxu1 %v8860_v39 }
 0x620   :  { %v7846_v52 = vpop.f32.mrb[194].mxu1 }
 0x621   :  { %v5268_v26 = vpop.eup %5267  ;;  %v3497_v53 = vadd.f32 1e-05, %v3465_v45  ;;  %v3434_v35 = vsub.f32 %v3370_v59, %v3402_v3  ;;  %v7848_v47 = vpop.f32.mrb[195].mxu1  ;;  %v3406_v45 = vmul.f32 %v7730_v55, %v7730_v55 }
 0x622   :  { %v3272_v31 = vpop.f32.mrb[46].mxu0  ;;  %4949 = vmatmul.mubr.msk.f32.gmra.mrb[36].mxu1 %vm1452_vm5, %v5268_v26 }
 0x623   :  { %5273 = vrsqrt.f32 %v3497_v53  ;;  %v3466_v22 = vmax.f32 %v3434_v35, 0.0  ;;  %v3371_v62 = vmul.f32 0.03125, %v3272_v31  ;;  %v3274_v12 = vpop.f32.mrb[47].mxu0  ;;  %4102 = vmatprep.mubr.f32.mxu1 %v8860_v39 }
 0x624   :  { %v7854_v25 = vpop.f32.mrb[196].mxu1 }
 0x625   :  { %v5270_v33 = vpop.eup %5269  ;;  %v3498_v54 = vadd.f32 1e-05, %v3466_v22  ;;  %v3435_v21 = vsub.f32 %v3371_v62, %v3403_v16  ;;  %v7856_v18 = vpop.f32.mrb[197].mxu1  ;;  %v3407_v62 = vmul.f32 %v7735_v61, %v7735_v61 }
 0x626   :  { %v3277_v43 = vpop.f32.mrb[48].mxu0  ;;  %4950 = vmatmul.mubr.msk.f32.gmra.mrb[38].mxu1 %vm1452_vm5, %v5270_v33 }
 0x627   :  { %5275 = vrsqrt.f32 %v3498_v54  ;;  %v3467_v40 = vmax.f32 %v3435_v21, 0.0  ;;  %v3372_v58 = vmul.f32 0.03125, %v3277_v43  ;;  %v3279_v63 = vpop.f32.mrb[49].mxu0  ;;  %4108 = vmatprep.mubr.f32.mxu1 %v8860_v39 }
 0x628   :  { %v7862_v10 = vpop.f32.mrb[198].mxu1  ;;  %v3408_v63 = vmul.f32 %v7740_v42, %v7740_v42 }
 0x629   :  { %v5272_v4 = vpop.eup %5271  ;;  %v3499_v7 = vadd.f32 1e-05, %v3467_v40  ;;  %v3436_v0 = vsub.f32 %v3372_v58, %v3404_v9  ;;  %v7864_v13 = vpop.f32.mrb[199].mxu1 }
 0x62a   :  { %v3282_v49 = vpop.f32.mrb[50].mxu0  ;;  %4951 = vmatmul.mubr.msk.f32.gmra.mrb[40].mxu1 %vm1452_vm5, %v5272_v4 }
 0x62b   :  { %5277 = vrsqrt.f32 %v3499_v7  ;;  %v3468_v1 = vmax.f32 %v3436_v0, 0.0  ;;  %v3373_v56 = vmul.f32 0.03125, %v3282_v49  ;;  %v3284_v34 = vpop.f32.mrb[51].mxu0  ;;  %4114 = vmatprep.mubr.f32.mxu1 %v8860_v39 }
 0x62c   :  { %v7870_v23 = vpop.f32.mrb[200].mxu1 }
 0x62d   :  { %v5274_v2 = vpop.eup %5273  ;;  %v3500_v28 = vadd.f32 1e-05, %v3468_v1  ;;  %v3437_v38 = vsub.f32 %v3373_v56, %v3405_v17  ;;  %v7872_v11 = vpop.f32.mrb[201].mxu1 }
 0x62e   :  { %v3287_v3 = vpop.f32.mrb[52].mxu0  ;;  %4952 = vmatmul.mubr.msk.f32.gmra.mrb[42].mxu1 %vm1452_vm5, %v5274_v2  ;;  %v3409_v2 = vmul.f32 %v7745_v6, %v7745_v6 }
 0x62f   :  { %5279 = vrsqrt.f32 %v3500_v28  ;;  %v3469_v30 = vmax.f32 %v3437_v38, 0.0  ;;  %v3374_v59 = vmul.f32 0.03125, %v3287_v3  ;;  %v3289_v32 = vpop.f32.mrb[53].mxu0  ;;  %4120 = vmatprep.mubr.f32.mxu1 %v8860_v39 }
 0x630   :  { %v7878_v26 = vpop.f32.mrb[202].mxu1 }
 0x631   :  { %v5276_v53 = vpop.eup %5275  ;;  %v3501_v35 = vadd.f32 1e-05, %v3469_v30  ;;  %v3438_v31 = vsub.f32 %v3374_v59, %v3406_v45  ;;  %v7880_v16 = vpop.f32.mrb[203].mxu1 }
 0x632   :  { %v3292_v22 = vpop.f32.mrb[54].mxu0  ;;  %4953 = vmatmul.mubr.msk.f32.gmra.mrb[44].mxu1 %vm1452_vm5, %v5276_v53 }
 0x633   :  { %5281 = vrsqrt.f32 %v3501_v35  ;;  %v3470_v55 = vmax.f32 %v3438_v31, 0.0  ;;  %v3375_v12 = vmul.f32 0.03125, %v3292_v22  ;;  %v3294_v33 = vpop.f32.mrb[55].mxu0  ;;  %4126 = vmatprep.mubr.f32.mxu1 %v8860_v39  ;;  %v3410_v35 = vmul.f32 %v7750_v46, %v7750_v46 }
 0x634   :  { %v7886_v54 = vpop.f32.mrb[204].mxu1 }
 0x635   :  { %v5278_v21 = vpop.eup %5277  ;;  %v3502_v43 = vadd.f32 1e-05, %v3470_v55  ;;  %v3439_v9 = vsub.f32 %v3375_v12, %v3407_v62  ;;  %v7888_v40 = vpop.f32.mrb[205].mxu1 }
 0x636   :  { %v3297_v58 = vpop.f32.mrb[56].mxu0  ;;  %4954 = vmatmul.mubr.msk.f32.gmra.mrb[46].mxu1 %vm1452_vm5, %v5278_v21 }
 0x637   :  { %5283 = vrsqrt.f32 %v3502_v43  ;;  %v3471_v61 = vmax.f32 %v3439_v9, 0.0  ;;  %v3376_v4 = vmul.f32 0.03125, %v3297_v58  ;;  %v3299_v7 = vpop.f32.mrb[57].mxu0  ;;  %4132 = vmatprep.mubr.f32.mxu1 %v8860_v39  ;;  %v3411_v9 = vmul.f32 %v7755_v8, %v7755_v8 }
 0x638   :  { %v7894_v0 = vpop.f32.mrb[206].mxu1 }
 0x639   :  { %v5280_v49 = vpop.eup %5279  ;;  %v3503_v17 = vadd.f32 1e-05, %v3471_v61  ;;  %v3440_v1 = vsub.f32 %v3376_v4, %v3408_v63  ;;  %v7896_v56 = vpop.f32.mrb[207].mxu1 }
 0x63a   :  { %v3302_v34 = vpop.f32.mrb[58].mxu0  ;;  %4955 = vmatmul.mubr.msk.f32.gmra.mrb[48].mxu1 %vm1452_vm5, %v5280_v49 }
 0x63b   :  { %5285 = vrsqrt.f32 %v3503_v17  ;;  %v3472_v42 = vmax.f32 %v3440_v1, 0.0  ;;  %v3377_v28 = vmul.f32 0.03125, %v3302_v34  ;;  %v3304_v38 = vpop.f32.mrb[59].mxu0  ;;  %4138 = vmatprep.mubr.f32.mxu1 %v8860_v39 }
 0x63c   :  { %v7902_v3 = vpop.f32.mrb[208].mxu1 }
 0x63d   :  { %v5282_v45 = vpop.eup %5281  ;;  %v3504_v30 = vadd.f32 1e-05, %v3472_v42  ;;  %v3441_v59 = vsub.f32 %v3377_v28, %v3409_v2  ;;  %v7904_v32 = vpop.f32.mrb[209].mxu1 }
 0x63e   :  { %v3307_v53 = vpop.f32.mrb[60].mxu0  ;;  %4956 = vmatmul.mubr.msk.f32.gmra.mrb[50].mxu1 %vm1452_vm5, %v5282_v45 }
 0x63f   :  { %5287 = vrsqrt.f32 %v3504_v30  ;;  %v3473_v6 = vmax.f32 %v3441_v59, 0.0  ;;  %v3378_v31 = vmul.f32 0.03125, %v3307_v53  ;;  %v3309_v22 = vpop.f32.mrb[61].mxu0  ;;  %4144 = vmatprep.mubr.f32.mxu1 %v8860_v39 }
 0x640   :  { %v7910_v62 = vpop.f32.mrb[210].mxu1 }
 0x641   :  { %v5284_v55 = vpop.eup %5283  ;;  %v3505_v12 = vadd.f32 1e-05, %v3473_v6  ;;  %v3442_v33 = vsub.f32 %v3378_v31, %v3410_v35  ;;  %v7912_v21 = vpop.f32.mrb[211].mxu1 }
 0x642   :  { %v3312_v43 = vpop.f32.mrb[62].mxu0  ;;  %4957 = vmatmul.mubr.msk.f32.gmra.mrb[52].mxu1 %vm1452_vm5, %v5284_v55 }
 0x643   :  { %5289 = vrsqrt.f32 %v3505_v12  ;;  %v3474_v46 = vmax.f32 %v3442_v33, 0.0  ;;  %v3379_v58 = vmul.f32 0.03125, %v3312_v43  ;;  %v3314_v63 = vpop.f32.mrb[63].mxu0  ;;  %4150 = vmatprep.mubr.f32.mxu1 %v8860_v39 }
 0x644   :  { %v7918_v61 = vpop.f32.mrb[212].mxu1 }
 0x645   :  { %v5286_v4 = vpop.eup %5285  ;;  %v3506_v7 = vadd.f32 1e-05, %v3474_v46  ;;  %v3443_v49 = vsub.f32 %v3379_v58, %v3411_v9  ;;  %v7920_v17 = vpop.f32.mrb[213].mxu1 }
 0x646   :  { %4958 = vmatmul.mubr.msk.f32.gmra.mrb[54].mxu1 %vm1452_vm5, %v5286_v4 }
 0x647   :  { %5291 = vrsqrt.f32 %v3506_v7  ;;  %v3475_v1 = vmax.f32 %v3443_v49, 0.0  ;;  %4156 = vmatprep.mubr.f32.mxu1 %v8860_v39 }
 0x648   :  { %v7924_v8 = vpop.f32.mrb[214].mxu1 }
 0x649   :  { %v5288_v34 = vpop.eup %5287  ;;  %v3507_v2 = vadd.f32 1e-05, %v3475_v1  ;;  %v7926_v42 = vpop.f32.mrb[215].mxu1 }
 0x64a   :  { %4959 = vmatmul.mubr.msk.f32.gmra.mrb[56].mxu1 %vm1452_vm5, %v5288_v34 }
 0x64b   :  { %5293 = vrsqrt.f32 %v3507_v2  ;;  %4162 = vmatprep.mubr.f32.mxu1 %v8860_v39 }
 0x64c   :  { %v7930_v28 = vpop.f32.mrb[216].mxu1 }
 0x64d   :  { %v5290_v38 = vpop.eup %5289  ;;  %v7932_v45 = vpop.f32.mrb[217].mxu1 }
 0x64e   :  { %4960 = vmatmul.mubr.msk.f32.gmra.mrb[58].mxu1 %vm1452_vm5, %v5290_v38 }
 0x64f   :  { %4168 = vmatprep.mubr.f32.mxu1 %v8860_v39 }
 0x650   :  { %v7936_v30 = vpop.f32.mrb[218].mxu1 }
 0x651   :  { %v5292_v59 = vpop.eup %5291  ;;  %v7938_v53 = vpop.f32.mrb[219].mxu1 }
 0x652   :  { %4961 = vmatmul.mubr.msk.f32.gmra.mrb[60].mxu1 %vm1452_vm5, %v5292_v59 }
 0x653   :  { %4174 = vmatprep.mubr.f32.mxu1 %v8860_v39 }
 0x654   :  { %v7942_v35 = vpop.f32.mrb[220].mxu1 }
 0x655   :  { %v5294_v6 = vpop.eup %5293  ;;  %v7944_v31 = vpop.f32.mrb[221].mxu1 }
 0x656   :  { %4962 = vmatmul.mubr.msk.f32.gmra.mrb[62].mxu1 %vm1452_vm5, %v5294_v6 }
 0x658   :  { %v7947_v22 = vpop.f32.mrb[222].mxu1 }
 0x659   :  { %v7949_v55 = vpop.f32.mrb[223].mxu1 }
 0x65c   :  { %v7951_v12 = vpop.f32.mrb[224].mxu1 }
 0x65d   :  { %v7953_v33 = vpop.f32.mrb[225].mxu1 }
 0x660   :  { %v7955_v43 = vpop.f32.mrb[226].mxu1 }
 0x661   :  { %v7957_v9 = vpop.f32.mrb[227].mxu1 }
 0x662   :  { %8918 = vst [vmem:[#allocation27_spill] sm:$0xff] %v7957_v9 }
 0x664   :  { %v7959_v39 = vpop.f32.mrb[228].mxu1 }
 0x665   :  { %8919 = vst [vmem:[#allocation80_spill] sm:$0xff] %v7959_v39  ;;  %v7961_v46 = vpop.f32.mrb[229].mxu1 }
 0x666   :  { %8920 = vst [vmem:[#allocation26_spill] sm:$0xff] %v7961_v46 }
 0x668   :  { %v7963_v58 = vpop.f32.mrb[230].mxu1 }
 0x669   :  { %8921 = vst [vmem:[#allocation79_spill] sm:$0xff] %v7963_v58  ;;  %v7965_v63 = vpop.f32.mrb[231].mxu1 }
 0x66a   :  { %8922 = vst [vmem:[#allocation29_spill] sm:$0xff] %v7965_v63 }
 0x66c   :  { %v7967_v4 = vpop.f32.mrb[232].mxu1 }
 0x66d   :  { %8923 = vst [vmem:[#allocation82_spill] sm:$0xff] %v7967_v4  ;;  %v7969_v7 = vpop.f32.mrb[233].mxu1 }
 0x66e   :  { %8924 = vst [vmem:[#allocation28_spill] sm:$0xff] %v7969_v7 }
 0x670   :  { %v7971_v49 = vpop.f32.mrb[234].mxu1 }
 0x671   :  { %8925 = vst [vmem:[#allocation81_spill] sm:$0xff] %v7971_v49  ;;  %v7973_v1 = vpop.f32.mrb[235].mxu1 }
 0x672   :  { %8926 = vst [vmem:[#allocation31_spill] sm:$0xff] %v7973_v1 }
 0x674   :  { %v7975_v34 = vpop.f32.mrb[236].mxu1 }
 0x675   :  { %8927 = vst [vmem:[#allocation84_spill] sm:$0xff] %v7975_v34  ;;  %v7977_v2 = vpop.f32.mrb[237].mxu1 }
 0x676   :  { %8928 = vst [vmem:[#allocation30_spill] sm:$0xff] %v7977_v2 }
 0x678   :  { %v7979_v38 = vpop.f32.mrb[238].mxu1 }
 0x679   :  { %8929 = vst [vmem:[#allocation83_spill] sm:$0xff] %v7979_v38  ;;  %v7981_v59 = vpop.f32.mrb[239].mxu1 }
 0x67a   :  { %8930 = vst [vmem:[#allocation33_spill] sm:$0xff] %v7981_v59 }
 0x67c   :  { %v7983_v6 = vpop.f32.mrb[240].mxu1 }
 0x67d   :  { %8931 = vst [vmem:[#allocation86_spill] sm:$0xff] %v7983_v6  ;;  %v7985_v58 = vpop.f32.mrb[241].mxu1 }
 0x67e   :  { %8932 = vst [vmem:[#allocation32_spill] sm:$0xff] %v7985_v58 }
 0x680   :  { %v7987_v63 = vpop.f32.mrb[242].mxu1 }
 0x681   :  { %8933 = vst [vmem:[#allocation85_spill] sm:$0xff] %v7987_v63  ;;  %v7989_v4 = vpop.f32.mrb[243].mxu1 }
 0x682   :  { %8934 = vst [vmem:[#allocation35_spill] sm:$0xff] %v7989_v4 }
 0x684   :  { %v7991_v7 = vpop.f32.mrb[244].mxu1 }
 0x685   :  { %8935 = vst [vmem:[#allocation88_spill] sm:$0xff] %v7991_v7  ;;  %v7993_v49 = vpop.f32.mrb[245].mxu1 }
 0x686   :  { %8936 = vst [vmem:[#allocation34_spill] sm:$0xff] %v7993_v49 }
 0x688   :  { %v7995_v1 = vpop.f32.mrb[246].mxu1 }
 0x689   :  { %8937 = vst [vmem:[#allocation87_spill] sm:$0xff] %v7995_v1  ;;  %v7997_v34 = vpop.f32.mrb[247].mxu1 }
 0x68a   :  { %8938 = vst [vmem:[#allocation37_spill] sm:$0xff] %v7997_v34  ;;  %v2865_v34 = vld [vmem:[%s8311_s7] sm:$0x3]  ;;  %s5464_s7 = smov [#allocation8]  }
 0x68c   :  { %v7999_v2 = vpop.f32.mrb[248].mxu1 }
 0x68d   :  { %8939 = vst [vmem:[#allocation90_spill] sm:$0xff] %v7999_v2  ;;  %v8001_v38 = vpop.f32.mrb[249].mxu1 }
 0x68e   :  { %8940 = vst [vmem:[#allocation36_spill] sm:$0xff] %v8001_v38  ;;  %v2866_v38 = vld [vmem:[%s8312_s8] sm:$0x3]  ;;  %s4656_s8 = sshll.u32 %s5464_s7, 4  ;;  %s4657_s8 = int_to_ptr.vmem [resolvable:$true] %s4656_s8 }
 0x68f   :  { %s5425_s13 = scalar_lea.vmem %s4657_s8, 8192  ;;  %p5430_p11 = scmp.lt.s32.totalorder %s4657_s8, %s4657_s8 }
 0x690   :  { %v8003_v59 = vpop.f32.mrb[250].mxu1  ;;  %p5426_p10 = scmp.ne.s32.totalorder %s4657_s8, %s5425_s13  ;;  %p5431_p12 = scmp.lt.s32.totalorder %s5425_s13, %s5425_s13 }
 0x691   :  { %8941 = vst [vmem:[#allocation89_spill] sm:$0xff] %v8003_v59  ;;  %v8005_v6 = vpop.f32.mrb[251].mxu1  ;;  %v4181_v59 = vsub.f32 %v7220_v60, %v7838_v14  ;;  %v4183_v60 = vsub.f32 %v7229_v41, %v7846_v52  ;;  %v4186_v52 = vsub.f32 %v7233_v51, %v7856_v18 }
 0x692   :  { %8942 = vst [vmem:[#allocation39_spill] sm:$0xff] %v8005_v6  ;;  %v8947_v6 = vld [vmem:[#allocation45_spill] sm:$0xff]  ;;  %p5432_p13 = por %p5431_p12, %p5430_p11 }
 0x693   :  { %v8024_v2 = vrot.slane %v2865_v34, %v8947_v6  ;;  %v8032_v49 = vrot.slane %v2866_v38, %v8947_v6 }
 0x694   :  { %v8007_v58 = vpop.f32.mrb[252].mxu1  ;;  %p5433_p0 = pnand %p5432_p13, %p5426_p10 }
 0x695   :  { %8943 = vst [vmem:[#allocation92_spill] sm:$0xff] %v8007_v58  ;;  %v8009_v63 = vpop.f32.mrb[253].mxu1  ;;  %v8948_v58 = vld [vmem:[#allocation44_spill] sm:$0xff] }
 0x696   :  { %8944 = vst [vmem:[#allocation38_spill] sm:$0xff] %v8009_v63  ;;  %v4182_v63 = vsub.f32 %v7217_v36, %v7840_v44  ;;  %v8035_v9 = vrot.slane %v2866_v38, %v8948_v58  ;;  %v4184_v36 = vsub.f32 %v7223_v48, %v7848_v47 }
 0x698   :  { %v8011_v4 = vpop.f32.mrb[254].mxu1 }
 0x699   :  { %8945 = vst [vmem:[#allocation91_spill] sm:$0xff] %v8011_v4  ;;  %v8013_v7 = vpop.f32.mrb[255].mxu1 }
 0x69a   :  { %8946 = vst [vmem:[#allocation41_spill] sm:$0xff] %v8013_v7  ;;  %v8029_v7 = vrot.slane %v2865_v34, %v8948_v58  ;;  %v4185_v58 = vsub.f32 %v7236_v37, %v7854_v25 }
 0x6ad   :  { %v3990_v4 = vpop.f32.mrb[0].mxu1 }
 0x6ae   :  { %v4245_v1 = vmul.f32 %v4181_v59, %v3990_v4  ;;  %v3992_v46 = vpop.f32.mrb[1].mxu1 }
 0x6af   :  { %v4246_v39 = vmul.f32 %v4182_v63, %v3992_v46 }
 0x6b0   :  { %v4320_v14 = vmul.f32 %v8024_v2, %v4245_v1  ;;  %v5295_v1 = vld [vmem:[#allocation2] sm:$0xff] }
 0x6b1   :  { %v4321_v44 = vmul.f32 %v8029_v7, %v4246_v39  ;;  %v3996_v34 = vpop.f32.mrb[2].mxu1 }
 0x6b2   :  { %v4395_v4 = vadd.f32 %v8032_v49, %v4320_v14  ;;  %v4247_v59 = vmul.f32 %v4183_v60, %v3996_v34  ;;  %v3998_v6 = vpop.f32.mrb[3].mxu1 }
 0x6b3   :  { %v4396_v46 = vadd.f32 %v8035_v9, %v4321_v44  ;;  %v4248_v63 = vmul.f32 %v4184_v36, %v3998_v6  ;;  %v5296_v36 = vld [vmem:[#allocation2 + $0x8] sm:$0xff] }
 0x6b4   :  { %v4459_v38 = vmax.f32 %v4395_v4, 0.0  ;;  %v4322_v41 = vmul.f32 %v8024_v2, %v4247_v59  ;;  %v4187_v4 = vsub.f32 %v7245_v50, %v7862_v10  ;;  %v4188_v59 = vsub.f32 %v7239_v24, %v7864_v13 }
 0x6b5   :  { %v4460_v48 = vmax.f32 %v4396_v46, 0.0  ;;  %v4323_v47 = vmul.f32 %v8029_v7, %v4248_v63  ;;  %v4002_v39 = vpop.f32.mrb[4].mxu1 }
 0x6b6   :  { %v4523_v14 = vadd.f32 %v5295_v1, %v4459_v38  ;;  %v4397_v60 = vadd.f32 %v8032_v49, %v4322_v41  ;;  %v4249_v34 = vmul.f32 %v4185_v58, %v4002_v39  ;;  %v4004_v44 = vpop.f32.mrb[5].mxu1  ;;  %v5297_v38 = vld [vmem:[#allocation2 + $0x10] sm:$0xff]  ;;  %v5298_v39 = vld [vmem:[#allocation2 + $0x18] sm:$0xff] }
 0x6b7   :  { %v4524_v6 = vadd.f32 %v5296_v36, %v4460_v48  ;;  %v4398_v37 = vadd.f32 %v8035_v9, %v4323_v47  ;;  %v4250_v25 = vmul.f32 %v4186_v52, %v4004_v44 }
 0x6b8   :  { %4587 = vst [vmem:[#allocation8] sm:$0xff] %v4523_v14  ;;  %v4461_v51 = vmax.f32 %v4397_v60, 0.0  ;;  %v4324_v18 = vmul.f32 %v8024_v2, %v4249_v34  ;;  %v4189_v14 = vsub.f32 %v7252_v19, %v7870_v23  ;;  %v4190_v60 = vsub.f32 %v7249_v57, %v7872_v11 }
 0x6b9   :  { %4588 = vst [vmem:[#allocation8 + $0x8] sm:$0xff] %v4524_v6  ;;  %v4462_v46 = vmax.f32 %v4398_v37, 0.0  ;;  %v4325_v63 = vmul.f32 %v8029_v7, %v4250_v25  ;;  %v4008_v58 = vpop.f32.mrb[6].mxu1  ;;  %v5299_v6 = vld [vmem:[#allocation2 + $0x20] sm:$0xff] }
 0x6ba   :  { %v4525_v41 = vadd.f32 %v5297_v38, %v4461_v51  ;;  %v4399_v48 = vadd.f32 %v8032_v49, %v4324_v18  ;;  %v4251_v52 = vmul.f32 %v4187_v4, %v4008_v58  ;;  %v4010_v47 = vpop.f32.mrb[7].mxu1  ;;  %v5300_v18 = vld [vmem:[#allocation2 + $0x28] sm:$0xff] }
 0x6bb   :  { %v4526_v50 = vadd.f32 %v5298_v39, %v4462_v46  ;;  %v4400_v10 = vadd.f32 %v8035_v9, %v4325_v63  ;;  %v4252_v1 = vmul.f32 %v4188_v59, %v4010_v47  ;;  %v4191_v46 = vsub.f32 %v7261_v27, %v7878_v26 }
 0x6bc   :  { %4589 = vst [vmem:[#allocation8 + $0x10] sm:$0xff] %v4525_v41  ;;  %v4463_v24 = vmax.f32 %v4399_v48, 0.0  ;;  %v4326_v13 = vmul.f32 %v8024_v2, %v4251_v52  ;;  %v4192_v63 = vsub.f32 %v7255_v15, %v7880_v16  ;;  %v5301_v48 = vld [vmem:[#allocation2 + $0x30] sm:$0xff] }
 0x6bd   :  { %4590 = vst [vmem:[#allocation8 + $0x18] sm:$0xff] %v4526_v50  ;;  %v4464_v34 = vmax.f32 %v4400_v10, 0.0  ;;  %v4327_v44 = vmul.f32 %v8029_v7, %v4252_v1  ;;  %v4014_v36 = vpop.f32.mrb[8].mxu1  ;;  %v5302_v10 = vld [vmem:[#allocation2 + $0x38] sm:$0xff] }
 0x6be   :  { %v4527_v37 = vadd.f32 %v5299_v6, %v4463_v24  ;;  %v4401_v25 = vadd.f32 %v8032_v49, %v4326_v13  ;;  %v4253_v4 = vmul.f32 %v4189_v14, %v4014_v36  ;;  %v4016_v51 = vpop.f32.mrb[9].mxu1  ;;  %v4193_v14 = vsub.f32 %v7268_v20, %v7886_v54 }
 0x6bf   :  { %v4528_v19 = vadd.f32 %v5300_v18, %v4464_v34  ;;  %v4402_v23 = vadd.f32 %v8035_v9, %v4327_v44  ;;  %v4254_v59 = vmul.f32 %v4190_v60, %v4016_v51  ;;  %v4194_v24 = vsub.f32 %v7265_v5, %v7888_v40  ;;  %v5303_v44 = vld [vmem:[#allocation2 + $0x40] sm:$0xff] }
 0x6c0   :  { %4591 = vst [vmem:[#allocation8 + $0x20] sm:$0xff] %v4527_v37  ;;  %v4465_v57 = vmax.f32 %v4401_v25, 0.0  ;;  %v4328_v11 = vmul.f32 %v8024_v2, %v4253_v4  ;;  %v5304_v4 = vld [vmem:[#allocation2 + $0x48] sm:$0xff]  ;;  %v4195_v18 = vsub.f32 %v7277_v29, %v7894_v0 }
 0x6c1   :  { %4592 = vst [vmem:[#allocation8 + $0x28] sm:$0xff] %v4528_v19  ;;  %v4466_v58 = vmax.f32 %v4402_v23, 0.0  ;;  %v4329_v38 = vmul.f32 %v8029_v7, %v4254_v59  ;;  %v4020_v41 = vpop.f32.mrb[10].mxu1  ;;  %v8949_v19 = vld [vmem:[#allocation42_spill] sm:$0xff] }
 0x6c2   :  { %v4529_v52 = vadd.f32 %v5301_v48, %v4465_v57  ;;  %v4403_v47 = vadd.f32 %v8032_v49, %v4328_v11  ;;  %v4255_v39 = vmul.f32 %v4191_v46, %v4020_v41  ;;  %v4022_v50 = vpop.f32.mrb[11].mxu1  ;;  %v4196_v23 = vsub.f32 %v8949_v19, %v7896_v56  ;;  %v5305_v11 = vld [vmem:[#allocation2 + $0x50] sm:$0xff]  ;;  %v5306_v48 = vld [vmem:[#allocation2 + $0x58] sm:$0xff] }
 0x6c3   :  { %v4530_v27 = vadd.f32 %v5302_v10, %v4466_v58  ;;  %v4404_v26 = vadd.f32 %v8035_v9, %v4329_v38  ;;  %v4256_v1 = vmul.f32 %v4192_v63, %v4022_v50  ;;  %v8951_v10 = vld [vmem:[#allocation43_spill] sm:$0xff] }
 0x6c4   :  { %4593 = vst [vmem:[#allocation8 + $0x30] sm:$0xff] %v4529_v52  ;;  %v4467_v15 = vmax.f32 %v4403_v47, 0.0  ;;  %v4330_v16 = vmul.f32 %v8024_v2, %v4255_v39  ;;  %v8950_v47 = vld [vmem:[#allocation46_spill] sm:$0xff] }
 0x6c5   :  { %4594 = vst [vmem:[#allocation8 + $0x38] sm:$0xff] %v4530_v27  ;;  %v4468_v13 = vmax.f32 %v4404_v26, 0.0  ;;  %v4331_v60 = vmul.f32 %v8029_v7, %v4256_v1  ;;  %v4026_v34 = vpop.f32.mrb[12].mxu1  ;;  %v4197_v39 = vsub.f32 %v8950_v47, %v7902_v3  ;;  %v4198_v27 = vsub.f32 %v8951_v10, %v7904_v32  ;;  %v5311_v47 = vld [vmem:[#allocation2 + $0x80] sm:$0xff] }
 0x6c6   :  { %v4531_v36 = vadd.f32 %v5303_v44, %v4467_v15  ;;  %v4405_v6 = vadd.f32 %v8032_v49, %v4330_v16  ;;  %v4257_v37 = vmul.f32 %v4193_v14, %v4026_v34  ;;  %v4028_v25 = vpop.f32.mrb[13].mxu1  ;;  %v5307_v15 = vld [vmem:[#allocation2 + $0x60] sm:$0xff]  ;;  %v5308_v34 = vld [vmem:[#allocation2 + $0x68] sm:$0xff] }
 0x6c7   :  { %v4532_v20 = vadd.f32 %v5304_v4, %v4468_v13  ;;  %v4406_v54 = vadd.f32 %v8035_v9, %v4331_v60  ;;  %v4258_v51 = vmul.f32 %v4194_v24, %v4028_v25  ;;  %v8953_v4 = vld [vmem:[#allocation48_spill] sm:$0xff] }
 0x6c8   :  { %4595 = vst [vmem:[#allocation8 + $0x40] sm:$0xff] %v4531_v36  ;;  %v4469_v5 = vmax.f32 %v4405_v6, 0.0  ;;  %v4332_v40 = vmul.f32 %v8024_v2, %v4257_v37  ;;  %v8952_v6 = vld [vmem:[#allocation47_spill] sm:$0xff] }
 0x6c9   :  { %4596 = vst [vmem:[#allocation8 + $0x48] sm:$0xff] %v4532_v20  ;;  %v4470_v59 = vmax.f32 %v4406_v54, 0.0  ;;  %v4333_v46 = vmul.f32 %v8029_v7, %v4258_v51  ;;  %v4032_v57 = vpop.f32.mrb[14].mxu1  ;;  %v4199_v37 = vsub.f32 %v8952_v6, %v7910_v62  ;;  %v4200_v20 = vsub.f32 %v8953_v4, %v7912_v21 }
 0x6ca   :  { %v4533_v63 = vadd.f32 %v5305_v11, %v4469_v5  ;;  %v4407_v58 = vadd.f32 %v8032_v49, %v4332_v40  ;;  %v4259_v38 = vmul.f32 %v4195_v18, %v4032_v57  ;;  %v4034_v41 = vpop.f32.mrb[15].mxu1  ;;  %v5309_v5 = vld [vmem:[#allocation2 + $0x70] sm:$0xff] }
 0x6cb   :  { %v4534_v29 = vadd.f32 %v5306_v48, %v4470_v59  ;;  %v4408_v0 = vadd.f32 %v8035_v9, %v4333_v46  ;;  %v4260_v52 = vmul.f32 %v4196_v23, %v4034_v41  ;;  %v5310_v46 = vld [vmem:[#allocation2 + $0x78] sm:$0xff]  ;;  %v8955_v41 = vld [vmem:[#allocation50_spill] sm:$0xff] }
 0x6cc   :  { %4597 = vst [vmem:[#allocation8 + $0x50] sm:$0xff] %v4533_v63  ;;  %v4471_v56 = vmax.f32 %v4407_v58, 0.0  ;;  %v4334_v50 = vmul.f32 %v8024_v2, %v4259_v38  ;;  %v8954_v63 = vld [vmem:[#allocation49_spill] sm:$0xff]  ;;  %v4202_v48 = vsub.f32 %v8955_v41, %v7920_v17  ;;  %v8960_v41 = vld [vmem:[#allocation55_spill] sm:$0xff] }
 0x6cd   :  { %4598 = vst [vmem:[#allocation8 + $0x58] sm:$0xff] %v4534_v29  ;;  %v4472_v26 = vmax.f32 %v4408_v0, 0.0  ;;  %v4335_v1 = vmul.f32 %v8029_v7, %v4260_v52  ;;  %v4038_v14 = vpop.f32.mrb[16].mxu1  ;;  %v4201_v58 = vsub.f32 %v8954_v63, %v7918_v61 }
 0x6ce   :  { %v4535_v16 = vadd.f32 %v5307_v15, %v4471_v56  ;;  %v4409_v24 = vadd.f32 %v8032_v49, %v4334_v50  ;;  %v4261_v13 = vmul.f32 %v4197_v39, %v4038_v14  ;;  %v4040_v60 = vpop.f32.mrb[17].mxu1  ;;  %v8956_v14 = vld [vmem:[#allocation51_spill] sm:$0xff] }
 0x6cf   :  { %v4536_v3 = vadd.f32 %v5308_v34, %v4472_v26  ;;  %v4410_v44 = vadd.f32 %v8035_v9, %v4335_v1  ;;  %v4262_v36 = vmul.f32 %v4198_v27, %v4040_v60  ;;  %v5312_v27 = vld [vmem:[#allocation2 + $0x88] sm:$0xff]  ;;  %v4203_v15 = vsub.f32 %v8956_v14, %v7924_v8 }
 0x6d0   :  { %4599 = vst [vmem:[#allocation8 + $0x60] sm:$0xff] %v4535_v16  ;;  %v4473_v32 = vmax.f32 %v4409_v24, 0.0  ;;  %v4336_v25 = vmul.f32 %v8024_v2, %v4261_v13  ;;  %v8957_v24 = vld [vmem:[#allocation52_spill] sm:$0xff] }
 0x6d1   :  { %4600 = vst [vmem:[#allocation8 + $0x68] sm:$0xff] %v4536_v3  ;;  %v4474_v54 = vmax.f32 %v4410_v44, 0.0  ;;  %v4337_v51 = vmul.f32 %v8029_v7, %v4262_v36  ;;  %v4044_v18 = vpop.f32.mrb[18].mxu1  ;;  %v4204_v13 = vsub.f32 %v8957_v24, %v7926_v42  ;;  %v5313_v44 = vld [vmem:[#allocation2 + $0x90] sm:$0xff] }
 0x6d2   :  { %v4537_v40 = vadd.f32 %v5309_v5, %v4473_v32  ;;  %v4411_v19 = vadd.f32 %v8032_v49, %v4336_v25  ;;  %v4263_v23 = vmul.f32 %v4199_v37, %v4044_v18  ;;  %v4046_v59 = vpop.f32.mrb[19].mxu1  ;;  %v5314_v25 = vld [vmem:[#allocation2 + $0x98] sm:$0xff]  ;;  %v8959_v5 = vld [vmem:[#allocation54_spill] sm:$0xff] }
 0x6d3   :  { %v4538_v62 = vadd.f32 %v5310_v46, %v4474_v54  ;;  %v4412_v57 = vadd.f32 %v8035_v9, %v4337_v51  ;;  %v4264_v11 = vmul.f32 %v4200_v20, %v4046_v59  ;;  %v8958_v54 = vld [vmem:[#allocation53_spill] sm:$0xff]  ;;  %v5315_v46 = vld [vmem:[#allocation2 + $0xa0] sm:$0xff] }
 0x6d4   :  { %4601 = vst [vmem:[#allocation8 + $0x70] sm:$0xff] %v4537_v40  ;;  %v4475_v21 = vmax.f32 %v4411_v19, 0.0  ;;  %v4338_v38 = vmul.f32 %v8024_v2, %v4263_v23  ;;  %v4205_v51 = vsub.f32 %v8958_v54, %v7930_v28  ;;  %v4206_v40 = vsub.f32 %v8959_v5, %v7932_v45  ;;  %v8964_v54 = vld [vmem:[#allocation59_spill] sm:$0xff] }
 0x6d5   :  { %4602 = vst [vmem:[#allocation8 + $0x78] sm:$0xff] %v4538_v62  ;;  %v4476_v29 = vmax.f32 %v4412_v57, 0.0  ;;  %v4339_v0 = vmul.f32 %v8029_v7, %v4264_v11  ;;  %v4050_v52 = vpop.f32.mrb[20].mxu1 }
 0x6d6   :  { %v4539_v39 = vadd.f32 %v5311_v47, %v4475_v21  ;;  %v4413_v56 = vadd.f32 %v8032_v49, %v4338_v38  ;;  %v4265_v50 = vmul.f32 %v4201_v58, %v4050_v52  ;;  %v4052_v10 = vpop.f32.mrb[21].mxu1  ;;  %v5316_v58 = vld [vmem:[#allocation2 + $0xa8] sm:$0xff] }
 0x6d7   :  { %v4540_v61 = vadd.f32 %v5312_v27, %v4476_v29  ;;  %v4414_v26 = vadd.f32 %v8035_v9, %v4339_v0  ;;  %v4266_v1 = vmul.f32 %v4202_v48, %v4052_v10  ;;  %v4207_v48 = vsub.f32 %v8960_v41, %v7936_v30  ;;  %v8961_v0 = vld [vmem:[#allocation56_spill] sm:$0xff] }
 0x6d8   :  { %4603 = vst [vmem:[#allocation8 + $0x80] sm:$0xff] %v4539_v39  ;;  %v4477_v17 = vmax.f32 %v4413_v56, 0.0  ;;  %v4340_v16 = vmul.f32 %v8024_v2, %v4265_v50  ;;  %v4208_v52 = vsub.f32 %v8961_v0, %v7938_v53  ;;  %v5317_v50 = vld [vmem:[#allocation2 + $0xb0] sm:$0xff] }
 0x6d9   :  { %4604 = vst [vmem:[#allocation8 + $0x88] sm:$0xff] %v4540_v61  ;;  %v4478_v60 = vmax.f32 %v4414_v26, 0.0  ;;  %v4341_v34 = vmul.f32 %v8029_v7, %v4266_v1  ;;  %v4056_v3 = vpop.f32.mrb[22].mxu1  ;;  %v5318_v1 = vld [vmem:[#allocation2 + $0xb8] sm:$0xff] }
 0x6da   :  { %v4541_v36 = vadd.f32 %v5313_v44, %v4477_v17  ;;  %v4415_v6 = vadd.f32 %v8032_v49, %v4340_v16  ;;  %v4267_v37 = vmul.f32 %v4203_v15, %v4056_v3  ;;  %v4058_v32 = vpop.f32.mrb[23].mxu1  ;;  %v8962_v17 = vld [vmem:[#allocation57_spill] sm:$0xff] }
 0x6db   :  { %v4542_v8 = vadd.f32 %v5314_v25, %v4478_v60  ;;  %v4416_v4 = vadd.f32 %v8035_v9, %v4341_v34  ;;  %v4268_v20 = vmul.f32 %v4204_v13, %v4058_v32  ;;  %v4209_v16 = vsub.f32 %v8962_v17, %v7942_v35  ;;  %v8963_v13 = vld [vmem:[#allocation58_spill] sm:$0xff]  ;;  %v8970_v17 = vld [vmem:[#allocation64_spill] sm:$0xff] }
 0x6dc   :  { %4605 = vst [vmem:[#allocation8 + $0x90] sm:$0xff] %v4541_v36  ;;  %v4479_v42 = vmax.f32 %v4415_v6, 0.0  ;;  %v4342_v18 = vmul.f32 %v8024_v2, %v4267_v37  ;;  %v4210_v60 = vsub.f32 %v8963_v13, %v7944_v31  ;;  %v5319_v36 = vld [vmem:[#allocation2 + $0xc0] sm:$0xff] }
 0x6dd   :  { %4606 = vst [vmem:[#allocation8 + $0x98] sm:$0xff] %v4542_v8  ;;  %v4480_v19 = vmax.f32 %v4416_v4, 0.0  ;;  %v4343_v23 = vmul.f32 %v8029_v7, %v4268_v20  ;;  %v4062_v59 = vpop.f32.mrb[24].mxu1  ;;  %v5320_v8 = vld [vmem:[#allocation2 + $0xc8] sm:$0xff] }
 0x6de   :  { %v4543_v62 = vadd.f32 %v5315_v46, %v4479_v42  ;;  %v4417_v57 = vadd.f32 %v8032_v49, %v4342_v18  ;;  %v4269_v11 = vmul.f32 %v4205_v51, %v4062_v59  ;;  %v4064_v63 = vpop.f32.mrb[25].mxu1  ;;  %v4211_v51 = vsub.f32 %v8964_v54, %v7947_v22  ;;  %v8965_v18 = vld [vmem:[#allocation60_spill] sm:$0xff]  ;;  %v5321_v59 = vld [vmem:[#allocation2 + $0xd0] sm:$0xff] }
 0x6df   :  { %v4544_v28 = vadd.f32 %v5316_v58, %v4480_v19  ;;  %v4418_v21 = vadd.f32 %v8035_v9, %v4343_v23  ;;  %v4270_v38 = vmul.f32 %v4206_v40, %v4064_v63  ;;  %v4212_v5 = vsub.f32 %v8965_v18, %v7949_v55  ;;  %v5322_v63 = vld [vmem:[#allocation2 + $0xd8] sm:$0xff]  ;;  %v8973_v54 = vld [vmem:[#allocation26_spill] sm:$0xff] }
 0x6e0   :  { %4607 = vst [vmem:[#allocation8 + $0xa0] sm:$0xff] %v4543_v62  ;;  %v4481_v45 = vmax.f32 %v4417_v57, 0.0  ;;  %v4344_v29 = vmul.f32 %v8024_v2, %v4269_v11 }
 0x6e1   :  { %4608 = vst [vmem:[#allocation8 + $0xa8] sm:$0xff] %v4544_v28  ;;  %v4482_v47 = vmax.f32 %v4418_v21, 0.0  ;;  %v4345_v39 = vmul.f32 %v8029_v7, %v4270_v38  ;;  %v4068_v56 = vpop.f32.mrb[26].mxu1  ;;  %v8966_v21 = vld [vmem:[#allocation61_spill] sm:$0xff] }
 0x6e2   :  { %v4545_v10 = vadd.f32 %v5317_v50, %v4481_v45  ;;  %v4419_v27 = vadd.f32 %v8032_v49, %v4344_v29  ;;  %v4271_v61 = vmul.f32 %v4207_v48, %v4068_v56  ;;  %v4070_v26 = vpop.f32.mrb[27].mxu1  ;;  %v4213_v38 = vsub.f32 %v8966_v21, %v7951_v12  ;;  %v8967_v48 = vld [vmem:[#allocation62_spill] sm:$0xff] }
 0x6e3   :  { %v4546_v30 = vadd.f32 %v5318_v1, %v4482_v47  ;;  %v4420_v14 = vadd.f32 %v8035_v9, %v4345_v39  ;;  %v4272_v15 = vmul.f32 %v4208_v52, %v4070_v26  ;;  %v4214_v45 = vsub.f32 %v8967_v48, %v7953_v33  ;;  %v5323_v47 = vld [vmem:[#allocation2 + $0xe0] sm:$0xff]  ;;  %v8968_v1 = vld [vmem:[#allocation63_spill] sm:$0xff] }
 0x6e4   :  { %4609 = vst [vmem:[#allocation8 + $0xb0] sm:$0xff] %v4545_v10  ;;  %v4483_v53 = vmax.f32 %v4419_v27, 0.0  ;;  %v4346_v24 = vmul.f32 %v8024_v2, %v4271_v61  ;;  %v5324_v27 = vld [vmem:[#allocation2 + $0xe8] sm:$0xff] }
 0x6e5   :  { %4610 = vst [vmem:[#allocation8 + $0xb8] sm:$0xff] %v4546_v30  ;;  %v4484_v34 = vmax.f32 %v4420_v14, 0.0  ;;  %v4347_v3 = vmul.f32 %v8029_v7, %v4272_v15  ;;  %v4074_v44 = vpop.f32.mrb[28].mxu1  ;;  %v4215_v30 = vsub.f32 %v8968_v1, %v7955_v43  ;;  %v8969_v15 = vld [vmem:[#allocation27_spill] sm:$0xff]  ;;  %v8980_v1 = vld [vmem:[#allocation68_spill] sm:$0xff] }
 0x6e6   :  { %v4547_v6 = vadd.f32 %v5319_v36, %v4483_v53  ;;  %v4421_v37 = vadd.f32 %v8032_v49, %v4346_v24  ;;  %v4273_v32 = vmul.f32 %v4209_v16, %v4074_v44  ;;  %v4076_v25 = vpop.f32.mrb[29].mxu1  ;;  %v4216_v16 = vsub.f32 %v8970_v17, %v8969_v15  ;;  %v8981_v15 = vld [vmem:[#allocation28_spill] sm:$0xff]  ;;  %v8982_v17 = vld [vmem:[#allocation15_spill] sm:$0xff] }
 0x6e7   :  { %v4548_v35 = vadd.f32 %v5320_v8, %v4484_v34  ;;  %v4422_v4 = vadd.f32 %v8035_v9, %v4347_v3  ;;  %v4274_v20 = vmul.f32 %v4210_v60, %v4076_v25  ;;  %v5325_v60 = vld [vmem:[#allocation2 + $0xf0] sm:$0xff]  ;;  %v8971_v25 = vld [vmem:[#allocation80_spill] sm:$0xff] }
 0x6e8   :  { %4611 = vst [vmem:[#allocation8 + $0xc0] sm:$0xff] %v4547_v6  ;;  %v4485_v31 = vmax.f32 %v4421_v37, 0.0  ;;  %v4348_v42 = vmul.f32 %v8024_v2, %v4273_v32  ;;  %v5326_v6 = vld [vmem:[#allocation2 + $0xf8] sm:$0xff]  ;;  %v8972_v8 = vld [vmem:[#allocation66_spill] sm:$0xff] }
 0x6e9   :  { %4612 = vst [vmem:[#allocation8 + $0xc8] sm:$0xff] %v4548_v35  ;;  %v4486_v40 = vmax.f32 %v4422_v4, 0.0  ;;  %v4349_v19 = vmul.f32 %v8029_v7, %v4274_v20  ;;  %v4080_v23 = vpop.f32.mrb[30].mxu1  ;;  %v4217_v35 = vsub.f32 %v8972_v8, %v8971_v25  ;;  %v8983_v25 = vld [vmem:[#allocation81_spill] sm:$0xff]  ;;  %v8984_v8 = vld [vmem:[#allocation67_spill] sm:$0xff] }
 0x6ea   :  { %v4549_v46 = vadd.f32 %v5321_v59, %v4485_v31  ;;  %v4423_v62 = vadd.f32 %v8032_v49, %v4348_v42  ;;  %v4275_v57 = vmul.f32 %v4211_v51, %v4080_v23  ;;  %v4082_v11 = vpop.f32.mrb[31].mxu1  ;;  %v8974_v51 = vld [vmem:[#allocation13_spill] sm:$0xff] }
 0x6eb   :  { %v4550_v22 = vadd.f32 %v5322_v63, %v4486_v40  ;;  %v4424_v58 = vadd.f32 %v8035_v9, %v4349_v19  ;;  %v4276_v28 = vmul.f32 %v4212_v5, %v4082_v11  ;;  %v4218_v31 = vsub.f32 %v8974_v51, %v8973_v54  ;;  %v5327_v40 = vld [vmem:[#allocation2 + $0x100] sm:$0xff]  ;;  %v8985_v54 = vld [vmem:[#allocation31_spill] sm:$0xff]  ;;  %v8986_v51 = vld [vmem:[#allocation14_spill] sm:$0xff] }
 0x6ec   :  { %4613 = vst [vmem:[#allocation8 + $0xd0] sm:$0xff] %v4549_v46  ;;  %v4487_v55 = vmax.f32 %v4423_v62, 0.0  ;;  %v4350_v41 = vmul.f32 %v8024_v2, %v4275_v57  ;;  %v5328_v62 = vld [vmem:[#allocation2 + $0x108] sm:$0xff] }
 0x6ed   :  { %4614 = vst [vmem:[#allocation8 + $0xd8] sm:$0xff] %v4550_v22  ;;  %v4488_v29 = vmax.f32 %v4424_v58, 0.0  ;;  %v4351_v0 = vmul.f32 %v8029_v7, %v4276_v28  ;;  %v4086_v52 = vpop.f32.mrb[32].mxu1  ;;  %v8975_v22 = vld [vmem:[#allocation79_spill] sm:$0xff]  ;;  %v8976_v58 = vld [vmem:[#allocation65_spill] sm:$0xff] }
 0x6ee   :  { %v4551_v39 = vadd.f32 %v5323_v47, %v4487_v55  ;;  %v4425_v56 = vadd.f32 %v8032_v49, %v4350_v41  ;;  %v4277_v50 = vmul.f32 %v4213_v38, %v4086_v52  ;;  %v4088_v10 = vpop.f32.mrb[33].mxu1  ;;  %v4219_v28 = vsub.f32 %v8976_v58, %v8975_v22  ;;  %v8977_v55 = vld [vmem:[#allocation29_spill] sm:$0xff]  ;;  %v8978_v41 = vld [vmem:[#allocation12_spill] sm:$0xff]  ;;  %v5329_v52 = vld [vmem:[#allocation2 + $0x110] sm:$0xff] }
 0x6ef   :  { %v4552_v12 = vadd.f32 %v5324_v27, %v4488_v29  ;;  %v4426_v61 = vadd.f32 %v8035_v9, %v4351_v0  ;;  %v4278_v26 = vmul.f32 %v4214_v45, %v4088_v10  ;;  %v4220_v48 = vsub.f32 %v8978_v41, %v8977_v55  ;;  %v5330_v10 = vld [vmem:[#allocation2 + $0x118] sm:$0xff]  ;;  %v8987_v22 = vld [vmem:[#allocation84_spill] sm:$0xff]  ;;  %v8988_v58 = vld [vmem:[#allocation70_spill] sm:$0xff] }
 0x6f0   :  { %4615 = vst [vmem:[#allocation8 + $0xe0] sm:$0xff] %v4551_v39  ;;  %v4489_v33 = vmax.f32 %v4425_v56, 0.0  ;;  %v4352_v14 = vmul.f32 %v8024_v2, %v4277_v50  ;;  %v8989_v55 = vld [vmem:[#allocation30_spill] sm:$0xff]  ;;  %v8990_v41 = vld [vmem:[#allocation17_spill] sm:$0xff] }
 0x6f1   :  { %4616 = vst [vmem:[#allocation8 + $0xe8] sm:$0xff] %v4552_v12  ;;  %v4490_v53 = vmax.f32 %v4426_v61, 0.0  ;;  %v4353_v24 = vmul.f32 %v8029_v7, %v4278_v26  ;;  %v4092_v13 = vpop.f32.mrb[34].mxu1  ;;  %v8979_v26 = vld [vmem:[#allocation82_spill] sm:$0xff] }
 0x6f2   :  { %v4553_v34 = vadd.f32 %v5325_v60, %v4489_v33  ;;  %v4427_v3 = vadd.f32 %v8032_v49, %v4352_v14  ;;  %v4279_v44 = vmul.f32 %v4215_v30, %v4092_v13  ;;  %v4094_v36 = vpop.f32.mrb[35].mxu1  ;;  %v4221_v30 = vsub.f32 %v8980_v1, %v8979_v26  ;;  %v5331_v60 = vld [vmem:[#allocation2 + $0x120] sm:$0xff]  ;;  %v8991_v26 = vld [vmem:[#allocation83_spill] sm:$0xff]  ;;  %v8992_v1 = vld [vmem:[#allocation69_spill] sm:$0xff] }
 0x6f3   :  { %v4554_v43 = vadd.f32 %v5326_v6, %v4490_v53  ;;  %v4428_v37 = vadd.f32 %v8035_v9, %v4353_v24  ;;  %v4280_v32 = vmul.f32 %v4216_v16, %v4094_v36  ;;  %v4222_v16 = vsub.f32 %v8982_v17, %v8981_v15  ;;  %v5332_v6 = vld [vmem:[#allocation2 + $0x128] sm:$0xff]  ;;  %v8994_v17 = vld [vmem:[#allocation16_spill] sm:$0xff] }
 0x6f4   :  { %4617 = vst [vmem:[#allocation8 + $0xf0] sm:$0xff] %v4553_v34  ;;  %v4491_v4 = vmax.f32 %v4427_v3, 0.0  ;;  %v4354_v20 = vmul.f32 %v8024_v2, %v4279_v44  ;;  %v8993_v15 = vld [vmem:[#allocation33_spill] sm:$0xff] }
 0x6f5   :  { %4618 = vst [vmem:[#allocation8 + $0xf8] sm:$0xff] %v4554_v43  ;;  %v4492_v42 = vmax.f32 %v4428_v37, 0.0  ;;  %v4355_v18 = vmul.f32 %v8029_v7, %v4280_v32  ;;  %v4098_v5 = vpop.f32.mrb[36].mxu1 }
 0x6f6   :  { %v4555_v19 = vadd.f32 %v5327_v40, %v4491_v4  ;;  %v4429_v23 = vadd.f32 %v8032_v49, %v4354_v20  ;;  %v4281_v59 = vmul.f32 %v4217_v35, %v4098_v5  ;;  %v4100_v46 = vpop.f32.mrb[37].mxu1  ;;  %v4223_v35 = vsub.f32 %v8984_v8, %v8983_v25  ;;  %v5333_v40 = vld [vmem:[#allocation2 + $0x130] sm:$0xff]  ;;  %v8996_v8 = vld [vmem:[#allocation72_spill] sm:$0xff] }
 0x6f7   :  { %v4556_v57 = vadd.f32 %v5328_v62, %v4492_v42  ;;  %v4430_v11 = vadd.f32 %v8035_v9, %v4355_v18  ;;  %v4282_v63 = vmul.f32 %v4218_v31, %v4100_v46  ;;  %v4224_v31 = vsub.f32 %v8986_v51, %v8985_v54  ;;  %v5334_v62 = vld [vmem:[#allocation2 + $0x138] sm:$0xff]  ;;  %v8995_v25 = vld [vmem:[#allocation86_spill] sm:$0xff]  ;;  %v8997_v54 = vld [vmem:[#allocation32_spill] sm:$0xff] }
 0x6f8   :  { %4619 = vst [vmem:[#allocation8 + $0x100] sm:$0xff] %v4555_v19  ;;  %v4493_v21 = vmax.f32 %v4429_v23, 0.0  ;;  %v4356_v38 = vmul.f32 %v8024_v2, %v4281_v59  ;;  %v8998_v51 = vld [vmem:[#allocation19_spill] sm:$0xff] }
 0x6f9   :  { %4620 = vst [vmem:[#allocation8 + $0x108] sm:$0xff] %v4556_v57  ;;  %v4494_v45 = vmax.f32 %v4430_v11, 0.0  ;;  %v4357_v29 = vmul.f32 %v8029_v7, %v4282_v63  ;;  %v4104_v0 = vpop.f32.mrb[38].mxu1 }
 0x6fa   :  { %v4557_v47 = vadd.f32 %v5329_v52, %v4493_v21  ;;  %v4431_v39 = vadd.f32 %v8032_v49, %v4356_v38  ;;  %v4283_v56 = vmul.f32 %v4219_v28, %v4104_v0  ;;  %v4106_v50 = vpop.f32.mrb[39].mxu1  ;;  %v4225_v28 = vsub.f32 %v8988_v58, %v8987_v22  ;;  %v5335_v52 = vld [vmem:[#allocation2 + $0x140] sm:$0xff]  ;;  %v8999_v22 = vld [vmem:[#allocation85_spill] sm:$0xff]  ;;  %v9000_v58 = vld [vmem:[#allocation71_spill] sm:$0xff] }
 0x6fb   :  { %v4558_v27 = vadd.f32 %v5330_v10, %v4494_v45  ;;  %v4432_v12 = vadd.f32 %v8035_v9, %v4357_v29  ;;  %v4284_v61 = vmul.f32 %v4220_v48, %v4106_v50  ;;  %v4226_v48 = vsub.f32 %v8990_v41, %v8989_v55  ;;  %v5336_v10 = vld [vmem:[#allocation2 + $0x148] sm:$0xff]  ;;  %v9001_v55 = vld [vmem:[#allocation35_spill] sm:$0xff]  ;;  %v9002_v41 = vld [vmem:[#allocation18_spill] sm:$0xff] }
 0x6fc   :  { %4621 = vst [vmem:[#allocation8 + $0x110] sm:$0xff] %v4557_v47  ;;  %v4495_v33 = vmax.f32 %v4431_v39, 0.0  ;;  %v4358_v14 = vmul.f32 %v8024_v2, %v4283_v56 }
 0x6fd   :  { %4622 = vst [vmem:[#allocation8 + $0x118] sm:$0xff] %v4558_v27  ;;  %v4496_v53 = vmax.f32 %v4432_v12, 0.0  ;;  %v4359_v24 = vmul.f32 %v8029_v7, %v4284_v61  ;;  %v4110_v13 = vpop.f32.mrb[40].mxu1 }
 0x6fe   :  { %v4559_v34 = vadd.f32 %v5331_v60, %v4495_v33  ;;  %v4433_v3 = vadd.f32 %v8032_v49, %v4358_v14  ;;  %v4285_v44 = vmul.f32 %v4221_v30, %v4110_v13  ;;  %v4112_v36 = vpop.f32.mrb[41].mxu1  ;;  %v4227_v30 = vsub.f32 %v8992_v1, %v8991_v26  ;;  %v5337_v60 = vld [vmem:[#allocation2 + $0x150] sm:$0xff]  ;;  %v9003_v26 = vld [vmem:[#allocation88_spill] sm:$0xff] }
 0x6ff   :  { %v4560_v43 = vadd.f32 %v5332_v6, %v4496_v53  ;;  %v4434_v37 = vadd.f32 %v8035_v9, %v4359_v24  ;;  %v4286_v32 = vmul.f32 %v4222_v16, %v4112_v36  ;;  %v4228_v16 = vsub.f32 %v8994_v17, %v8993_v15  ;;  %v5338_v6 = vld [vmem:[#allocation2 + $0x158] sm:$0xff]  ;;  %v9004_v1 = vld [vmem:[#allocation74_spill] sm:$0xff]  ;;  %v9006_v17 = vld [vmem:[#allocation21_spill] sm:$0xff] }
 0x700   :  { %4623 = vst [vmem:[#allocation8 + $0x120] sm:$0xff] %v4559_v34  ;;  %v4497_v4 = vmax.f32 %v4433_v3, 0.0  ;;  %v4360_v20 = vmul.f32 %v8024_v2, %v4285_v44  ;;  %v9005_v15 = vld [vmem:[#allocation34_spill] sm:$0xff] }
 0x701   :  { %4624 = vst [vmem:[#allocation8 + $0x128] sm:$0xff] %v4560_v43  ;;  %v4498_v42 = vmax.f32 %v4434_v37, 0.0  ;;  %v4361_v18 = vmul.f32 %v8029_v7, %v4286_v32  ;;  %v4116_v5 = vpop.f32.mrb[42].mxu1 }
 0x702   :  { %v4561_v19 = vadd.f32 %v5333_v40, %v4497_v4  ;;  %v4435_v23 = vadd.f32 %v8032_v49, %v4360_v20  ;;  %v4287_v59 = vmul.f32 %v4223_v35, %v4116_v5  ;;  %v4118_v46 = vpop.f32.mrb[43].mxu1  ;;  %v4229_v35 = vsub.f32 %v8996_v8, %v8995_v25  ;;  %v5339_v40 = vld [vmem:[#allocation2 + $0x160] sm:$0xff]  ;;  %v9007_v25 = vld [vmem:[#allocation87_spill] sm:$0xff]  ;;  %v9008_v8 = vld [vmem:[#allocation73_spill] sm:$0xff] }
 0x703   :  { %v4562_v57 = vadd.f32 %v5334_v62, %v4498_v42  ;;  %v4436_v11 = vadd.f32 %v8035_v9, %v4361_v18  ;;  %v4288_v63 = vmul.f32 %v4224_v31, %v4118_v46  ;;  %v4230_v31 = vsub.f32 %v8998_v51, %v8997_v54  ;;  %v5340_v62 = vld [vmem:[#allocation2 + $0x168] sm:$0xff]  ;;  %v9010_v51 = vld [vmem:[#allocation20_spill] sm:$0xff] }
 0x704   :  { %4625 = vst [vmem:[#allocation8 + $0x130] sm:$0xff] %v4561_v19  ;;  %v4499_v21 = vmax.f32 %v4435_v23, 0.0  ;;  %v4362_v38 = vmul.f32 %v8024_v2, %v4287_v59  ;;  %v9009_v54 = vld [vmem:[#allocation37_spill] sm:$0xff] }
 0x705   :  { %4626 = vst [vmem:[#allocation8 + $0x138] sm:$0xff] %v4562_v57  ;;  %v4500_v45 = vmax.f32 %v4436_v11, 0.0  ;;  %v4363_v29 = vmul.f32 %v8029_v7, %v4288_v63  ;;  %v4122_v0 = vpop.f32.mrb[44].mxu1 }
 0x706   :  { %v4563_v47 = vadd.f32 %v5335_v52, %v4499_v21  ;;  %v4437_v39 = vadd.f32 %v8032_v49, %v4362_v38  ;;  %v4289_v56 = vmul.f32 %v4225_v28, %v4122_v0  ;;  %v4124_v50 = vpop.f32.mrb[45].mxu1  ;;  %v4231_v28 = vsub.f32 %v9000_v58, %v8999_v22  ;;  %v5341_v52 = vld [vmem:[#allocation2 + $0x170] sm:$0xff]  ;;  %v9012_v58 = vld [vmem:[#allocation76_spill] sm:$0xff] }
 0x707   :  { %v4564_v27 = vadd.f32 %v5336_v10, %v4500_v45  ;;  %v4438_v12 = vadd.f32 %v8035_v9, %v4363_v29  ;;  %v4290_v61 = vmul.f32 %v4226_v48, %v4124_v50  ;;  %v4232_v48 = vsub.f32 %v9002_v41, %v9001_v55  ;;  %v5342_v10 = vld [vmem:[#allocation2 + $0x178] sm:$0xff]  ;;  %v9011_v22 = vld [vmem:[#allocation90_spill] sm:$0xff]  ;;  %v9013_v55 = vld [vmem:[#allocation36_spill] sm:$0xff] }
 0x708   :  { %4627 = vst [vmem:[#allocation8 + $0x140] sm:$0xff] %v4563_v47  ;;  %v4501_v33 = vmax.f32 %v4437_v39, 0.0  ;;  %v4364_v14 = vmul.f32 %v8024_v2, %v4289_v56  ;;  %v9014_v41 = vld [vmem:[#allocation23_spill] sm:$0xff] }
 0x709   :  { %4628 = vst [vmem:[#allocation8 + $0x148] sm:$0xff] %v4564_v27  ;;  %v4502_v53 = vmax.f32 %v4438_v12, 0.0  ;;  %v4365_v24 = vmul.f32 %v8029_v7, %v4290_v61  ;;  %v4128_v13 = vpop.f32.mrb[46].mxu1 }
 0x70a   :  { %v4565_v34 = vadd.f32 %v5337_v60, %v4501_v33  ;;  %v4439_v3 = vadd.f32 %v8032_v49, %v4364_v14  ;;  %v4291_v44 = vmul.f32 %v4227_v30, %v4128_v13  ;;  %v4130_v36 = vpop.f32.mrb[47].mxu1  ;;  %v4233_v30 = vsub.f32 %v9004_v1, %v9003_v26  ;;  %v5343_v60 = vld [vmem:[#allocation2 + $0x180] sm:$0xff]  ;;  %v9015_v26 = vld [vmem:[#allocation89_spill] sm:$0xff]  ;;  %v9016_v1 = vld [vmem:[#allocation75_spill] sm:$0xff] }
 0x70b   :  { %v4566_v43 = vadd.f32 %v5338_v6, %v4502_v53  ;;  %v4440_v37 = vadd.f32 %v8035_v9, %v4365_v24  ;;  %v4292_v32 = vmul.f32 %v4228_v16, %v4130_v36  ;;  %v4234_v16 = vsub.f32 %v9006_v17, %v9005_v15  ;;  %v5344_v6 = vld [vmem:[#allocation2 + $0x188] sm:$0xff]  ;;  %v9017_v15 = vld [vmem:[#allocation39_spill] sm:$0xff]  ;;  %v9018_v17 = vld [vmem:[#allocation22_spill] sm:$0xff] }
 0x70c   :  { %4629 = vst [vmem:[#allocation8 + $0x150] sm:$0xff] %v4565_v34  ;;  %v4503_v4 = vmax.f32 %v4439_v3, 0.0  ;;  %v4366_v20 = vmul.f32 %v8024_v2, %v4291_v44 }
 0x70d   :  { %4630 = vst [vmem:[#allocation8 + $0x158] sm:$0xff] %v4566_v43  ;;  %v4504_v42 = vmax.f32 %v4440_v37, 0.0  ;;  %v4367_v18 = vmul.f32 %v8029_v7, %v4292_v32  ;;  %v4134_v5 = vpop.f32.mrb[48].mxu1 }
 0x70e   :  { %v4567_v19 = vadd.f32 %v5339_v40, %v4503_v4  ;;  %v4441_v23 = vadd.f32 %v8032_v49, %v4366_v20  ;;  %v4293_v59 = vmul.f32 %v4229_v35, %v4134_v5  ;;  %v4136_v46 = vpop.f32.mrb[49].mxu1  ;;  %v4235_v35 = vsub.f32 %v9008_v8, %v9007_v25  ;;  %v5345_v40 = vld [vmem:[#allocation2 + $0x190] sm:$0xff]  ;;  %v9019_v25 = vld [vmem:[#allocation92_spill] sm:$0xff] }
 0x70f   :  { %v4568_v57 = vadd.f32 %v5340_v62, %v4504_v42  ;;  %v4442_v11 = vadd.f32 %v8035_v9, %v4367_v18  ;;  %v4294_v63 = vmul.f32 %v4230_v31, %v4136_v46  ;;  %v4236_v31 = vsub.f32 %v9010_v51, %v9009_v54  ;;  %v5346_v62 = vld [vmem:[#allocation2 + $0x198] sm:$0xff]  ;;  %v9020_v8 = vld [vmem:[#allocation78_spill] sm:$0xff]  ;;  %v9022_v51 = vld [vmem:[#allocation25_spill] sm:$0xff] }
 0x710   :  { %4631 = vst [vmem:[#allocation8 + $0x160] sm:$0xff] %v4567_v19  ;;  %v4505_v21 = vmax.f32 %v4441_v23, 0.0  ;;  %v4368_v38 = vmul.f32 %v8024_v2, %v4293_v59  ;;  %v9021_v54 = vld [vmem:[#allocation38_spill] sm:$0xff] }
 0x711   :  { %4632 = vst [vmem:[#allocation8 + $0x168] sm:$0xff] %v4568_v57  ;;  %v4506_v45 = vmax.f32 %v4442_v11, 0.0  ;;  %v4369_v29 = vmul.f32 %v8029_v7, %v4294_v63  ;;  %v4140_v0 = vpop.f32.mrb[50].mxu1 }
 0x712   :  { %v4569_v47 = vadd.f32 %v5341_v52, %v4505_v21  ;;  %v4443_v39 = vadd.f32 %v8032_v49, %v4368_v38  ;;  %v4295_v56 = vmul.f32 %v4231_v28, %v4140_v0  ;;  %v4142_v50 = vpop.f32.mrb[51].mxu1  ;;  %v4237_v28 = vsub.f32 %v9012_v58, %v9011_v22  ;;  %v5347_v52 = vld [vmem:[#allocation2 + $0x1a0] sm:$0xff]  ;;  %v9023_v22 = vld [vmem:[#allocation91_spill] sm:$0xff]  ;;  %v9024_v58 = vld [vmem:[#allocation77_spill] sm:$0xff] }
 0x713   :  { %v4570_v27 = vadd.f32 %v5342_v10, %v4506_v45  ;;  %v4444_v12 = vadd.f32 %v8035_v9, %v4369_v29  ;;  %v4296_v61 = vmul.f32 %v4232_v48, %v4142_v50  ;;  %v4238_v48 = vsub.f32 %v9014_v41, %v9013_v55  ;;  %v5348_v10 = vld [vmem:[#allocation2 + $0x1a8] sm:$0xff]  ;;  %v9026_v41 = vld [vmem:[#allocation24_spill] sm:$0xff] }
 0x714   :  { %4633 = vst [vmem:[#allocation8 + $0x170] sm:$0xff] %v4569_v47  ;;  %v4507_v33 = vmax.f32 %v4443_v39, 0.0  ;;  %v4370_v14 = vmul.f32 %v8024_v2, %v4295_v56  ;;  %v9025_v55 = vld [vmem:[#allocation41_spill] sm:$0xff] }
 0x715   :  { %4634 = vst [vmem:[#allocation8 + $0x178] sm:$0xff] %v4570_v27  ;;  %v4508_v53 = vmax.f32 %v4444_v12, 0.0  ;;  %v4371_v24 = vmul.f32 %v8029_v7, %v4296_v61  ;;  %v4146_v13 = vpop.f32.mrb[52].mxu1 }
 0x716   :  { %v4571_v34 = vadd.f32 %v5343_v60, %v4507_v33  ;;  %v4445_v3 = vadd.f32 %v8032_v49, %v4370_v14  ;;  %v4297_v44 = vmul.f32 %v4233_v30, %v4146_v13  ;;  %v4148_v36 = vpop.f32.mrb[53].mxu1  ;;  %v4239_v30 = vsub.f32 %v9016_v1, %v9015_v26  ;;  %v5349_v60 = vld [vmem:[#allocation2 + $0x1b0] sm:$0xff] }
 0x717   :  { %v4572_v43 = vadd.f32 %v5344_v6, %v4508_v53  ;;  %v4446_v37 = vadd.f32 %v8035_v9, %v4371_v24  ;;  %v4298_v32 = vmul.f32 %v4234_v16, %v4148_v36  ;;  %v4240_v16 = vsub.f32 %v9018_v17, %v9017_v15  ;;  %v5350_v6 = vld [vmem:[#allocation2 + $0x1b8] sm:$0xff] }
 0x718   :  { %4635 = vst [vmem:[#allocation8 + $0x180] sm:$0xff] %v4571_v34  ;;  %v4509_v4 = vmax.f32 %v4445_v3, 0.0  ;;  %v4372_v20 = vmul.f32 %v8024_v2, %v4297_v44 }
 0x719   :  { %4636 = vst [vmem:[#allocation8 + $0x188] sm:$0xff] %v4572_v43  ;;  %v4510_v42 = vmax.f32 %v4446_v37, 0.0  ;;  %v4373_v18 = vmul.f32 %v8029_v7, %v4298_v32  ;;  %v4152_v5 = vpop.f32.mrb[54].mxu1 }
 0x71a   :  { %v4573_v19 = vadd.f32 %v5345_v40, %v4509_v4  ;;  %v4447_v23 = vadd.f32 %v8032_v49, %v4372_v20  ;;  %v4299_v59 = vmul.f32 %v4235_v35, %v4152_v5  ;;  %v4154_v46 = vpop.f32.mrb[55].mxu1  ;;  %v4241_v35 = vsub.f32 %v9020_v8, %v9019_v25  ;;  %v5351_v40 = vld [vmem:[#allocation2 + $0x1c0] sm:$0xff] }
 0x71b   :  { %v4574_v57 = vadd.f32 %v5346_v62, %v4510_v42  ;;  %v4448_v11 = vadd.f32 %v8035_v9, %v4373_v18  ;;  %v4300_v63 = vmul.f32 %v4236_v31, %v4154_v46  ;;  %v4242_v31 = vsub.f32 %v9022_v51, %v9021_v54  ;;  %v5352_v62 = vld [vmem:[#allocation2 + $0x1c8] sm:$0xff] }
 0x71c   :  { %4637 = vst [vmem:[#allocation8 + $0x190] sm:$0xff] %v4573_v19  ;;  %v4511_v21 = vmax.f32 %v4447_v23, 0.0  ;;  %v4374_v38 = vmul.f32 %v8024_v2, %v4299_v59 }
 0x71d   :  { %4638 = vst [vmem:[#allocation8 + $0x198] sm:$0xff] %v4574_v57  ;;  %v4512_v45 = vmax.f32 %v4448_v11, 0.0  ;;  %v4375_v29 = vmul.f32 %v8029_v7, %v4300_v63  ;;  %v4158_v0 = vpop.f32.mrb[56].mxu1 }
 0x71e   :  { %v4575_v47 = vadd.f32 %v5347_v52, %v4511_v21  ;;  %v4449_v39 = vadd.f32 %v8032_v49, %v4374_v38  ;;  %v4301_v56 = vmul.f32 %v4237_v28, %v4158_v0  ;;  %v4160_v50 = vpop.f32.mrb[57].mxu1  ;;  %v4243_v28 = vsub.f32 %v9024_v58, %v9023_v22  ;;  %v5353_v52 = vld [vmem:[#allocation2 + $0x1d0] sm:$0xff] }
 0x71f   :  { %v4576_v27 = vadd.f32 %v5348_v10, %v4512_v45  ;;  %v4450_v12 = vadd.f32 %v8035_v9, %v4375_v29  ;;  %v4302_v61 = vmul.f32 %v4238_v48, %v4160_v50  ;;  %v4244_v48 = vsub.f32 %v9026_v41, %v9025_v55  ;;  %v5354_v10 = vld [vmem:[#allocation2 + $0x1d8] sm:$0xff] }
 0x720   :  { %4639 = vst [vmem:[#allocation8 + $0x1a0] sm:$0xff] %v4575_v47  ;;  %v4513_v33 = vmax.f32 %v4449_v39, 0.0  ;;  %v4376_v14 = vmul.f32 %v8024_v2, %v4301_v56 }
 0x721   :  { %4640 = vst [vmem:[#allocation8 + $0x1a8] sm:$0xff] %v4576_v27  ;;  %v4514_v53 = vmax.f32 %v4450_v12, 0.0  ;;  %v4377_v24 = vmul.f32 %v8029_v7, %v4302_v61  ;;  %v4164_v13 = vpop.f32.mrb[58].mxu1 }
 0x722   :  { %v4577_v34 = vadd.f32 %v5349_v60, %v4513_v33  ;;  %v4451_v3 = vadd.f32 %v8032_v49, %v4376_v14  ;;  %v4303_v44 = vmul.f32 %v4239_v30, %v4164_v13  ;;  %v4166_v36 = vpop.f32.mrb[59].mxu1  ;;  %v5355_v14 = vld [vmem:[#allocation2 + $0x1e0] sm:$0xff] }
 0x723   :  { %v4578_v43 = vadd.f32 %v5350_v6, %v4514_v53  ;;  %v4452_v37 = vadd.f32 %v8035_v9, %v4377_v24  ;;  %v4304_v32 = vmul.f32 %v4240_v16, %v4166_v36  ;;  %v5356_v16 = vld [vmem:[#allocation2 + $0x1e8] sm:$0xff] }
 0x724   :  { %4641 = vst [vmem:[#allocation8 + $0x1b0] sm:$0xff] %v4577_v34  ;;  %v4515_v4 = vmax.f32 %v4451_v3, 0.0  ;;  %v4378_v20 = vmul.f32 %v8024_v2, %v4303_v44  ;;  %v5357_v34 = vld [vmem:[#allocation2 + $0x1f0] sm:$0xff]  ;;  %v5358_v3 = vld [vmem:[#allocation2 + $0x1f8] sm:$0xff] }
 0x725   :  { %4642 = vst [vmem:[#allocation8 + $0x1b8] sm:$0xff] %v4578_v43  ;;  %v4516_v42 = vmax.f32 %v4452_v37, 0.0  ;;  %v4379_v18 = vmul.f32 %v8029_v7, %v4304_v32  ;;  %v4170_v5 = vpop.f32.mrb[60].mxu1 }
 0x726   :  { %v4579_v19 = vadd.f32 %v5351_v40, %v4515_v4  ;;  %v4453_v23 = vadd.f32 %v8032_v49, %v4378_v20  ;;  %v4305_v59 = vmul.f32 %v4241_v35, %v4170_v5  ;;  %v4172_v46 = vpop.f32.mrb[61].mxu1 }
 0x727   :  { %v4580_v57 = vadd.f32 %v5352_v62, %v4516_v42  ;;  %v4454_v11 = vadd.f32 %v8035_v9, %v4379_v18  ;;  %v4306_v63 = vmul.f32 %v4242_v31, %v4172_v46 }
 0x728   :  { %4643 = vst [vmem:[#allocation8 + $0x1c0] sm:$0xff] %v4579_v19  ;;  %v4517_v21 = vmax.f32 %v4453_v23, 0.0  ;;  %v4380_v38 = vmul.f32 %v8024_v2, %v4305_v59 }
 0x729   :  { %4644 = vst [vmem:[#allocation8 + $0x1c8] sm:$0xff] %v4580_v57  ;;  %v4518_v45 = vmax.f32 %v4454_v11, 0.0  ;;  %v4381_v29 = vmul.f32 %v8029_v7, %v4306_v63  ;;  %v4176_v0 = vpop.f32.mrb[62].mxu1 }
 0x72a   :  { %v4581_v47 = vadd.f32 %v5353_v52, %v4517_v21  ;;  %v4455_v39 = vadd.f32 %v8032_v49, %v4380_v38  ;;  %v4307_v56 = vmul.f32 %v4243_v28, %v4176_v0  ;;  %v4178_v50 = vpop.f32.mrb[63].mxu1 }
 0x72b   :  { %v4582_v27 = vadd.f32 %v5354_v10, %v4518_v45  ;;  %v4456_v12 = vadd.f32 %v8035_v9, %v4381_v29  ;;  %v4308_v61 = vmul.f32 %v4244_v48, %v4178_v50 }
 0x72c   :  { %4645 = vst [vmem:[#allocation8 + $0x1d0] sm:$0xff] %v4581_v47  ;;  %v4519_v26 = vmax.f32 %v4455_v39, 0.0  ;;  %v4382_v1 = vmul.f32 %v8024_v2, %v4307_v56 }
 0x72d   :  { %4646 = vst [vmem:[#allocation8 + $0x1d8] sm:$0xff] %v4582_v27  ;;  %v4520_v30 = vmax.f32 %v4456_v12, 0.0  ;;  %v4383_v33 = vmul.f32 %v8029_v7, %v4308_v61 }
 0x72e   :  { %v4583_v15 = vadd.f32 %v5355_v14, %v4519_v26  ;;  %v4457_v17 = vadd.f32 %v8032_v49, %v4382_v1 }
 0x72f   :  { %v4584_v53 = vadd.f32 %v5356_v16, %v4520_v30  ;;  %v4458_v24 = vadd.f32 %v8035_v9, %v4383_v33 }
 0x730   :  { %4647 = vst [vmem:[#allocation8 + $0x1e0] sm:$0xff] %v4583_v15  ;;  %v4521_v13 = vmax.f32 %v4457_v17, 0.0 }
 0x731   :  { %4648 = vst [vmem:[#allocation8 + $0x1e8] sm:$0xff] %v4584_v53  ;;  %v4522_v60 = vmax.f32 %v4458_v24, 0.0 }
 0x732   :  { %v4585_v2 = vadd.f32 %v5357_v34, %v4521_v13 }
 0x733   :  { %v4586_v44 = vadd.f32 %v5358_v3, %v4522_v60 }
 0x734   :  { %4649 = vst [vmem:[#allocation8 + $0x1f0] sm:$0xff] %v4585_v2 }
 0x735   :  { %4650 = vst [vmem:[#allocation8 + $0x1f8] sm:$0xff] %v4586_v44 }
 0x736   :  { %5436 = shalt.err (!%p5433_p0)
}
 0x737   :  { %s5437_s16 = scalar_lea.hbm %s8313_s9, 8192 }
 0x738   :  { %p5438_p1 = scmp.ne.s32.totalorder %s8313_s9, %s5437_s16  ;;  %p5441_p2 = scmp.lt.u32.totalorder %s5437_s16, %s8313_s9 }
 0x73a   :  { %p5443_p3 = pnand %p5441_p2, %p5438_p1 }
 0x73c   :  { %5446 = shalt.err (!%p5443_p3)
}
 0x73d   :  { %4662 = dma.vmem_to_hbm [thread:$0]  %s4657_s8, 8192, %s8313_s9, [#allocation4], %s5457_s1, %s5457_s1, %s5458_s10  }
 0x73e   :  { %5451 = dma.done.wait [#allocation4], 8192  }
 0x73f   :  { %5452 = vsyncadd [#allocation4], 4294959104 }
 0x740   :  { %4666 = vsyncpa [#allocation3], 1 }
 0x741   :  { %4667 = vsyncpa [#allocation6], 1 }
 0x742   :  { %4668 = vsyncpa [#allocation4], 1 }

</bundles_post_ra>
